<compile_context>
chip_gen: v7x
topology: tpu7x:2x2x1
jax: 0.10.0
libtpu: 0.0.40
codegen_flags: <defaults>
</compile_context>

<pallas_src>
import functools
import math

import jax
import jax.numpy as jnp
from jax import lax
from jax.experimental import pallas as pl
from jax.experimental.pallas import tpu as pltpu

_SUBLANE = 8  # f32/bf16 sublane granularity; batch chunk is a multiple of this


# ----------------------------------------------------------------------------
# Fused kernel
# ----------------------------------------------------------------------------

def _build_kernel(stages, head_srcs, T, BP, H):
    """Build the fused TC_base forward kernel (one batch chunk of BP rows).

    stages:    tuple over bidirectional LSTM layers; each entry is a tuple of
               source-buffer ids (0 = input x, 1+2s / 2+2s = fwd / bwd half of
               the output of layer s).
    head_srcs: ((f,b), (f,b), (f,b)) buffer ids of the final outputs of the
               three LSTM modules (out1, out2, out3).
    """
    H2 = 2 * H
    H8 = 8 * H
    n_stages = len(stages)
    t_chunk = max(1, min(T, max(1, 256 // BP)))   # prologue row-tile (~256 rows)
    unroll = True if T <= 16 else 8               # partial unroll for large T

    def kernel(*refs):
        # ---- unpack refs (inputs, output, scratch) according to static plan
        pos = 0
        x_ref = refs[pos]; pos += 1
        stage_w = []
        for srcs in stages:
            k = len(srcs)
            wf = refs[pos:pos + k]; pos += k          # per-source fwd input W
            wb = refs[pos:pos + k]; pos += k          # per-source bwd input W
            b8_ref = refs[pos]; u_ref = refs[pos + 1]; pos += 2
            stage_w.append((wf, wb, b8_ref, u_ref))
        wfc_ref = refs[pos]; bfc_ref = refs[pos + 1]; pos += 2
        logits_ref = refs[pos]; pos += 1
        out_scs = []
        for _ in range(n_stages):
            out_scs.append((refs[pos], refs[pos + 1])); pos += 2
        g_sc = refs[pos]                              # fused pre-gates (T,BP,8H)

        # Buffer table: id 0 = x, id 1+2s / 2+2s = fwd / bwd output of layer s.
        bufs = [x_ref]
        for of_sc, ob_sc in out_scs:
            bufs.append(of_sc)
            bufs.append(ob_sc)

        for s_idx in range(n_stages):
            srcs = stages[s_idx]
            wf, wb, b8_ref, u_ref = stage_w[s_idx]
            of_sc, ob_sc = out_scs[s_idx]

            # ---- Prologue: input projections for ALL timesteps, chunked over
            #      time.  The backward-direction projections are folded in
            #      time-reversed so the recurrence reads ONE (BP,8H) slice/step.
            for t0 in range(0, T, t_chunk):
                tc = min(t_chunk, T - t0)
                s0 = T - t0 - tc                      # mirrored bwd source chunk
                accf = None
                accb = None
                for src_id, wf_ref, wb_ref in zip(srcs, wf, wb):
                    src_f = bufs[src_id][t0:t0 + tc].reshape(tc * BP, -1)
                    mf = jnp.dot(src_f, wf_ref[...],
                                 preferred_element_type=jnp.float32)
                    accf = mf if accf is None else accf + mf
                    src_b = bufs[src_id][s0:s0 + tc].reshape(tc * BP, -1)
                    mb = jnp.dot(src_b, wb_ref[...],
                                 preferred_element_type=jnp.float32)
                    accb = mb if accb is None else accb + mb
                accf = (accf + b8_ref[...]).reshape(tc, BP, H8)
                accb = accb.reshape(tc, BP, H8)
                for j in range(tc):
                    # dest time t0+j: fwd proj(t0+j) + bias + bwd proj(T-1-(t0+j))
                    g_sc[t0 + j] = (accf[j] + accb[tc - 1 - j]).astype(jnp.bfloat16)

            # ---- Fused fwd/bwd recurrence: h, c live in vregs; only h @ W_hh
            #      sits on the serial per-timestep chain.
            # TODO(synk): latch U in the MXU weight registers across the T-step
            # loop (pltpu.matmul_push_rhs / matmul_acc_lhs / matmul_pop) instead
            # of re-streaming it with jnp.dot every step.
            def step(t, carry):
                h, c = carry                               # h: bf16, c: f32, (BP,2H)
                g = g_sc[t] + jnp.dot(h, u_ref[...],
                                      preferred_element_type=jnp.float32)
                sg = jax.nn.sigmoid(g[:, 0:3 * H2])        # gates [i | f | o]
                i_g = sg[:, 0:H2]
                f_g = sg[:, H2:2 * H2]
                o_g = sg[:, 2 * H2:3 * H2]
                g_g = jnp.tanh(g[:, 3 * H2:4 * H2])        # gate [g]
                c_new = f_g * c + i_g * g_g
                h_new = (o_g * jnp.tanh(c_new)).astype(jnp.bfloat16)
                of_sc[t] = h_new[:, 0:H]                   # fwd output at time t
                ob_sc[T - 1 - t] = h_new[:, H:H2]          # bwd output at time T-1-t
                return (h_new, c_new)

            init = (jnp.zeros((BP, H2), jnp.bfloat16),
                    jnp.zeros((BP, H2), jnp.float32))
            lax.fori_loop(0, T, step, init, unroll=unroll)

        # ---- Head: logits = fc1(out1[:, -1] + out2[:, -1] + out3[:, -1]).
        sf = None
        sb = None
        for f_id, b_id in head_srcs:
            vf = bufs[f_id][T - 1].astype(jnp.float32)
            vb = bufs[b_id][T - 1].astype(jnp.float32)
            sf = vf if sf is None else sf + vf
            sb = vb if sb is None else sb + vb
        logits = (
            jnp.dot(sf.astype(jnp.bfloat16), wfc_ref[0:H, :],
                    preferred_element_type=jnp.float32)
            + jnp.dot(sb.astype(jnp.bfloat16), wfc_ref[H:H2, :],
                      preferred_element_type=jnp.float32)
            + bfc_ref[...]
        )
        logits_ref[...] = logits

    return kernel


# ----------------------------------------------------------------------------
# Wrapper around pallas_call
# ----------------------------------------------------------------------------

def _round_up(x, m):
    return ((x + m - 1) // m) * m


def _forward_impl(features, weights, *, stages, head_srcs, H, C):
    """features: (B, T, in_features) f32 -> logits (B, C) f32."""
    B, T, D = features.shape
    BPc = min(_round_up(B, _SUBLANE), 128)        # batch rows per grid step
    n_chunks = -(-B // BPc)
    B_pad = n_chunks * BPc

    # Time-major bf16, batch padded to a whole number of chunks.  Padded rows
    # never mix with real rows and are sliced off at the end.
    x = jnp.transpose(features, (1, 0, 2))                      # (T, B, D)
    x = jnp.pad(x, ((0, 0), (0, B_pad - B), (0, 0))).astype(jnp.bfloat16)

    kernel = _build_kernel(stages, head_srcs, T, BPc, H)

    n_stages = len(stages)
    scratch = []
    for _ in range(n_stages):
        scratch.append(pltpu.VMEM((T, BPc, H), jnp.bfloat16))   # out fwd half
        scratch.append(pltpu.VMEM((T, BPc, H), jnp.bfloat16))   # out bwd half
    scratch.append(pltpu.VMEM((T, BPc, 8 * H), jnp.bfloat16))   # fused pre-gates

    in_specs = [pl.BlockSpec((T, BPc, D), lambda b: (0, b, 0))]
    in_specs += [pl.BlockSpec(w.shape, lambda b: (0, 0)) for w in weights]
    out_spec = pl.BlockSpec((BPc, C), lambda b: (b, 0))

    scratch_bytes = (2 * n_stages * T * BPc * H + T * BPc * 8 * H) * 2  # bf16
    io_bytes = (T * BPc * D * 2 + BPc * C * 4
                + sum(int(w.size) * w.dtype.itemsize for w in weights))
    vmem_limit = int(scratch_bytes + 2 * io_bytes) + (4 << 20)
    vmem_limit = max(32 << 20, min(vmem_limit, 100 << 20))

    logits_p = pl.pallas_call(
        kernel,
        out_shape=jax.ShapeDtypeStruct((B_pad, C), jnp.float32),
        grid=(n_chunks,),
        in_specs=in_specs,
        out_specs=out_spec,
        scratch_shapes=scratch,
        compiler_params=pltpu.CompilerParams(
            dimension_semantics=("parallel",),
            vmem_limit_bytes=vmem_limit),
    )(x, *weights)
    return logits_p[:B]


# ----------------------------------------------------------------------------
# Parameter construction (PyTorch-default-style uniform init) + weight fusion
# ----------------------------------------------------------------------------

def _make_lstm_raw(key, input_size, hidden_size, num_layers):
    """Per bidirectional layer: ((w_ih, w_hh, b), (w_ih, w_hh, b)) fwd/bwd."""
    H = hidden_size
    bound = 1.0 / math.sqrt(H)
    layers = []
    for layer in range(num_layers):
        in_sz = input_size if layer == 0 else 2 * H
        dirs = []
        for _ in range(2):  # forward, backward
            key, k1, k2, k3, k4 = jax.random.split(key, 5)
            w_ih = jax.random.uniform(k1, (4 * H, in_sz), jnp.float32, -bound, bound)
            w_hh = jax.random.uniform(k2, (4 * H, H), jnp.float32, -bound, bound)
            b_ih = jax.random.uniform(k3, (4 * H,), jnp.float32, -bound, bound)
            b_hh = jax.random.uniform(k4, (4 * H,), jnp.float32, -bound, bound)
            dirs.append((w_ih, w_hh, b_ih + b_hh))
        layers.append(tuple(dirs))
    return layers, key


def _fuse_bilayer(fwd, bwd, H, src_widths):
    """Rearrange one bidirectional layer into the fused kernel layout.

    Combined gate axis (8H): [i_f,i_b | f_f,f_b | o_f,o_b | g_f,g_b]
    (sigmoid gates first, tanh gate last; [fwd|bwd] within each gate matches
    the (BP, 2H) fused state).  Returns (wf per source, wb per source,
    bias (1, 8H) f32, U (2H, 8H) bf16).
    """
    H2, H8 = 2 * H, 8 * H
    # PyTorch gate order in w_ih/w_hh/bias rows is [i, f, g, o]; destination
    # gate slots in the fused layout [i, f, o, g]:
    dest = (0, 1, 3, 2)

    def scatter_cols(w_t, d):           # w_t: (Din, 4H), PyTorch gate order
        out = jnp.zeros((w_t.shape[0], H8), jnp.float32)
        for p, q in enumerate(dest):
            out = out.at[:, q * H2 + d * H: q * H2 + (d + 1) * H].set(
                w_t[:, p * H:(p + 1) * H])
        return out

    def scatter_bias(b, d):
        out = jnp.zeros((H8,), jnp.float32)
        for p, q in enumerate(dest):
            out = out.at[q * H2 + d * H: q * H2 + (d + 1) * H].set(
                b[p * H:(p + 1) * H])
        return out

    (wih_f, whh_f, b_f) = fwd
    (wih_b, whh_b, b_b) = bwd
    assert sum(src_widths) == wih_f.shape[1]

    wf8 = scatter_cols(wih_f.T, 0)                               # (Din, 8H)
    wb8 = scatter_cols(wih_b.T, 1)
    b8 = (scatter_bias(b_f, 0) + scatter_bias(b_b, 1))[None, :]  # (1, 8H)
    u8 = jnp.concatenate([scatter_cols(whh_f.T, 0),
                          scatter_cols(whh_b.T, 1)], axis=0)     # (2H, 8H)

    wf_list, wb_list, off = [], [], 0
    for w in src_widths:
        wf_list.append(wf8[off:off + w].astype(jnp.bfloat16))
        wb_list.append(wb8[off:off + w].astype(jnp.bfloat16))
        off += w
    return wf_list, wb_list, b8, u8.astype(jnp.bfloat16)


def make_tc_base(key, in_features, class_num, num_layers, hidden_size,
                 dropout_rate=0.0):
    """Returns (forward_fn, weights); forward_fn(features, weights) -> logits."""
    del dropout_rate  # LSTM inter-layer dropout is training-only (eval forward)
    H, C = hidden_size, class_num
    raw1, key = _make_lstm_raw(key, in_features, H, num_layers)
    raw2, key = _make_lstm_raw(key, 2 * H, H, num_layers)
    raw3, key = _make_lstm_raw(key, 4 * H, H, num_layers)

    key, kw, kb = jax.random.split(key, 3)
    bound = 1.0 / math.sqrt(2 * H)
    fc_w = jax.random.uniform(kw, (C, 2 * H), jnp.float32, -bound, bound)
    fc_b = jax.random.uniform(kb, (C,), jnp.float32, -bound, bound)

    stages = []     # per bidirectional layer: tuple of source-buffer ids
    weights = []    # flat kernel weight args, kernel-unpack order

    def add_module(raw_layers, src_ids, src_widths):
        for fwd, bwd in raw_layers:
            s = len(stages)
            wf_l, wb_l, b8, u8 = _fuse_bilayer(fwd, bwd, H, src_widths)
            stages.append(tuple(src_ids))
            weights.extend(wf_l)
            weights.extend(wb_l)
            weights.append(b8)
            weights.append(u8)
            src_ids, src_widths = (1 + 2 * s, 2 + 2 * s), (H, H)
        return src_ids

    m1 = add_module(raw1, (0,), (in_features,))                 # lstm1(x)
    m2 = add_module(raw2, m1, (H, H))                           # lstm2(out1)
    m3 = add_module(raw3, tuple(m1) + tuple(m2), (H, H, H, H))  # lstm3(cat(out1,out2))
    weights.append(fc_w.T.astype(jnp.bfloat16))   # (2H, C) bf16
    weights.append(fc_b[None, :])                 # (1, C)  f32

    forward = jax.jit(functools.partial(
        _forward_impl, stages=tuple(stages), head_srcs=(m1, m2, m3), H=H, C=C))
    return forward, weights


# ----------------------------------------------------------------------------
# main
# ----------------------------------------------------------------------------

if __name__ == "__main__":
    B, T = 2, 8
    in_features = 16
    class_num = 4
    num_layers = 1
    hidden_size = 32
    dropout_rate = 0.0

    key = jax.random.PRNGKey(0)
    key, k_x = jax.random.split(key)
    features = jax.random.normal(k_x, (B, T, in_features), jnp.float32)

    forward, weights = make_tc_base(key, in_features, class_num, num_layers,
                                    hidden_size, dropout_rate)
    logits = forward(features, weights)
    jax.block_until_ready(logits)

    assert logits.shape == (B, class_num), logits.shape
    assert logits.dtype == jnp.float32
    assert bool(jnp.all(jnp.isfinite(logits)))
    print("KERNEL_OK")
</pallas_src>

<mosaic_0001>
module attributes {stable_mosaic.version = 11 : i64} {
  func.func @kernel(%arg0: i32, %arg1: memref<8x8x16xbf16, #tpu.memory_space<vmem>>, %arg2: memref<16x256xbf16, #tpu.memory_space<vmem>>, %arg3: memref<16x256xbf16, #tpu.memory_space<vmem>>, %arg4: memref<1x256xf32, #tpu.memory_space<vmem>>, %arg5: memref<64x256xbf16, #tpu.memory_space<vmem>>, %arg6: memref<32x256xbf16, #tpu.memory_space<vmem>>, %arg7: memref<32x256xbf16, #tpu.memory_space<vmem>>, %arg8: memref<32x256xbf16, #tpu.memory_space<vmem>>, %arg9: memref<32x256xbf16, #tpu.memory_space<vmem>>, %arg10: memref<1x256xf32, #tpu.memory_space<vmem>>, %arg11: memref<64x256xbf16, #tpu.memory_space<vmem>>, %arg12: memref<32x256xbf16, #tpu.memory_space<vmem>>, %arg13: memref<32x256xbf16, #tpu.memory_space<vmem>>, %arg14: memref<32x256xbf16, #tpu.memory_space<vmem>>, %arg15: memref<32x256xbf16, #tpu.memory_space<vmem>>, %arg16: memref<32x256xbf16, #tpu.memory_space<vmem>>, %arg17: memref<32x256xbf16, #tpu.memory_space<vmem>>, %arg18: memref<32x256xbf16, #tpu.memory_space<vmem>>, %arg19: memref<32x256xbf16, #tpu.memory_space<vmem>>, %arg20: memref<1x256xf32, #tpu.memory_space<vmem>>, %arg21: memref<64x256xbf16, #tpu.memory_space<vmem>>, %arg22: memref<64x4xbf16, #tpu.memory_space<vmem>>, %arg23: memref<1x4xf32, #tpu.memory_space<vmem>>, %arg24: memref<8x4xf32, #tpu.memory_space<vmem>>, %arg25: memref<8x8x32xbf16, #tpu.memory_space<vmem>>, %arg26: memref<8x8x32xbf16, #tpu.memory_space<vmem>>, %arg27: memref<8x8x32xbf16, #tpu.memory_space<vmem>>, %arg28: memref<8x8x32xbf16, #tpu.memory_space<vmem>>, %arg29: memref<8x8x32xbf16, #tpu.memory_space<vmem>>, %arg30: memref<8x8x32xbf16, #tpu.memory_space<vmem>>, %arg31: memref<8x8x256xbf16, #tpu.memory_space<vmem>>) attributes {dimension_semantics = [#tpu.dimension_semantics<parallel>], iteration_bounds = array<i64: 1>, scalar_prefetch = 0 : i64, scratch_operands = 7 : i64, tpu.core_type = #tpu.core_type<tc>, window_params = [{transform_indices = @transform_0, window_bounds = array<i64: 8, 8, 16>}, {pipeline_mode = #tpu.pipeline_mode<synchronous>, transform_indices = @transform_1, window_bounds = array<i64: 16, 256>}, {pipeline_mode = #tpu.pipeline_mode<synchronous>, transform_indices = @transform_2, window_bounds = array<i64: 16, 256>}, {pipeline_mode = #tpu.pipeline_mode<synchronous>, transform_indices = @transform_3, window_bounds = array<i64: 1, 256>}, {pipeline_mode = #tpu.pipeline_mode<synchronous>, transform_indices = @transform_4, window_bounds = array<i64: 64, 256>}, {pipeline_mode = #tpu.pipeline_mode<synchronous>, transform_indices = @transform_5, window_bounds = array<i64: 32, 256>}, {pipeline_mode = #tpu.pipeline_mode<synchronous>, transform_indices = @transform_6, window_bounds = array<i64: 32, 256>}, {pipeline_mode = #tpu.pipeline_mode<synchronous>, transform_indices = @transform_7, window_bounds = array<i64: 32, 256>}, {pipeline_mode = #tpu.pipeline_mode<synchronous>, transform_indices = @transform_8, window_bounds = array<i64: 32, 256>}, {pipeline_mode = #tpu.pipeline_mode<synchronous>, transform_indices = @transform_9, window_bounds = array<i64: 1, 256>}, {pipeline_mode = #tpu.pipeline_mode<synchronous>, transform_indices = @transform_10, window_bounds = array<i64: 64, 256>}, {pipeline_mode = #tpu.pipeline_mode<synchronous>, transform_indices = @transform_11, window_bounds = array<i64: 32, 256>}, {pipeline_mode = #tpu.pipeline_mode<synchronous>, transform_indices = @transform_12, window_bounds = array<i64: 32, 256>}, {pipeline_mode = #tpu.pipeline_mode<synchronous>, transform_indices = @transform_13, window_bounds = array<i64: 32, 256>}, {pipeline_mode = #tpu.pipeline_mode<synchronous>, transform_indices = @transform_14, window_bounds = array<i64: 32, 256>}, {pipeline_mode = #tpu.pipeline_mode<synchronous>, transform_indices = @transform_15, window_bounds = array<i64: 32, 256>}, {pipeline_mode = #tpu.pipeline_mode<synchronous>, transform_indices = @transform_16, window_bounds = array<i64: 32, 256>}, {pipeline_mode = #tpu.pipeline_mode<synchronous>, transform_indices = @transform_17, window_bounds = array<i64: 32, 256>}, {pipeline_mode = #tpu.pipeline_mode<synchronous>, transform_indices = @transform_18, window_bounds = array<i64: 32, 256>}, {pipeline_mode = #tpu.pipeline_mode<synchronous>, transform_indices = @transform_19, window_bounds = array<i64: 1, 256>}, {pipeline_mode = #tpu.pipeline_mode<synchronous>, transform_indices = @transform_20, window_bounds = array<i64: 64, 256>}, {pipeline_mode = #tpu.pipeline_mode<synchronous>, transform_indices = @transform_21, window_bounds = array<i64: 64, 4>}, {pipeline_mode = #tpu.pipeline_mode<synchronous>, transform_indices = @transform_22, window_bounds = array<i64: 1, 4>}, {transform_indices = @transform_23, window_bounds = array<i64: 8, 4>}]} {
    %c0 = arith.constant 0 : index
    %c0_0 = arith.constant 0 : index
    %c0_1 = arith.constant 0 : index
    %0 = vector.load %arg1[%c0, %c0_0, %c0_1] : memref<8x8x16xbf16, #tpu.memory_space<vmem>>, vector<8x8x16xbf16>
    %1 = vector.shape_cast %0 : vector<8x8x16xbf16> to vector<64x16xbf16>
    %c0_2 = arith.constant 0 : index
    %c0_3 = arith.constant 0 : index
    %2 = vector.load %arg2[%c0_2, %c0_3] : memref<16x256xbf16, #tpu.memory_space<vmem>>, vector<16x256xbf16>
    %cst = arith.constant dense<0.000000e+00> : vector<64x256xf32>
    %3 = tpu.matmul %1, %2, %cst {dimension_numbers = #tpu.dot_dimension_numbers<[1], [0], [0], [1], [0, 0, 1, 1], [], []>} : vector<64x16xbf16>, vector<16x256xbf16>, vector<64x256xf32> -> vector<64x256xf32>
    %c0_4 = arith.constant 0 : index
    %c0_5 = arith.constant 0 : index
    %c0_6 = arith.constant 0 : index
    %4 = vector.load %arg1[%c0_4, %c0_5, %c0_6] : memref<8x8x16xbf16, #tpu.memory_space<vmem>>, vector<8x8x16xbf16>
    %5 = vector.shape_cast %4 : vector<8x8x16xbf16> to vector<64x16xbf16>
    %c0_7 = arith.constant 0 : index
    %c0_8 = arith.constant 0 : index
    %6 = vector.load %arg3[%c0_7, %c0_8] : memref<16x256xbf16, #tpu.memory_space<vmem>>, vector<16x256xbf16>
    %cst_9 = arith.constant dense<0.000000e+00> : vector<64x256xf32>
    %7 = tpu.matmul %5, %6, %cst_9 {dimension_numbers = #tpu.dot_dimension_numbers<[1], [0], [0], [1], [0, 0, 1, 1], [], []>} : vector<64x16xbf16>, vector<16x256xbf16>, vector<64x256xf32> -> vector<64x256xf32>
    %c0_10 = arith.constant 0 : index
    %c0_11 = arith.constant 0 : index
    %8 = vector.load %arg4[%c0_10, %c0_11] : memref<1x256xf32, #tpu.memory_space<vmem>>, vector<1x256xf32>
    %9 = vector.broadcast %8 : vector<1x256xf32> to vector<64x256xf32>
    %10 = arith.addf %3, %9 : vector<64x256xf32>
    %11 = vector.shape_cast %10 : vector<64x256xf32> to vector<8x8x256xf32>
    %12 = vector.shape_cast %7 : vector<64x256xf32> to vector<8x8x256xf32>
    %13 = vector.extract_strided_slice %11 {offsets = [0, 0, 0], sizes = [1, 8, 256], strides = [1, 1, 1]} : vector<8x8x256xf32> to vector<1x8x256xf32>
    %14 = vector.shape_cast %13 : vector<1x8x256xf32> to vector<8x256xf32>
    %15 = vector.extract_strided_slice %12 {offsets = [7, 0, 0], sizes = [1, 8, 256], strides = [1, 1, 1]} : vector<8x8x256xf32> to vector<1x8x256xf32>
    %16 = vector.shape_cast %15 : vector<1x8x256xf32> to vector<8x256xf32>
    %17 = arith.addf %14, %16 : vector<8x256xf32>
    %18 = arith.truncf %17 : vector<8x256xf32> to vector<8x256xbf16>
    %c0_12 = arith.constant 0 : index
    %c0_13 = arith.constant 0 : index
    %c0_14 = arith.constant 0 : index
    %19 = vector.load %arg31[%c0_12, %c0_13, %c0_14] : memref<8x8x256xbf16, #tpu.memory_space<vmem>>, vector<1x8x256xbf16>
    %20 = vector.shape_cast %19 : vector<1x8x256xbf16> to vector<8x256xbf16>
    %21 = vector.shape_cast %18 : vector<8x256xbf16> to vector<1x8x256xbf16>
    tpu.vector_store %arg31[%c0_12, %c0_13, %c0_14], %21 {strides = array<i32>} : memref<8x8x256xbf16, #tpu.memory_space<vmem>>, vector<1x8x256xbf16>,
    %22 = vector.extract_strided_slice %11 {offsets = [1, 0, 0], sizes = [1, 8, 256], strides = [1, 1, 1]} : vector<8x8x256xf32> to vector<1x8x256xf32>
    %23 = vector.shape_cast %22 : vector<1x8x256xf32> to vector<8x256xf32>
    %24 = vector.extract_strided_slice %12 {offsets = [6, 0, 0], sizes = [1, 8, 256], strides = [1, 1, 1]} : vector<8x8x256xf32> to vector<1x8x256xf32>
    %25 = vector.shape_cast %24 : vector<1x8x256xf32> to vector<8x256xf32>
    %26 = arith.addf %23, %25 : vector<8x256xf32>
    %27 = arith.truncf %26 : vector<8x256xf32> to vector<8x256xbf16>
    %c1 = arith.constant 1 : index
    %c0_15 = arith.constant 0 : index
    %c0_16 = arith.constant 0 : index
    %28 = vector.load %arg31[%c1, %c0_15, %c0_16] : memref<8x8x256xbf16, #tpu.memory_space<vmem>>, vector<1x8x256xbf16>
    %29 = vector.shape_cast %28 : vector<1x8x256xbf16> to vector<8x256xbf16>
    %30 = vector.shape_cast %27 : vector<8x256xbf16> to vector<1x8x256xbf16>
    tpu.vector_store %arg31[%c1, %c0_15, %c0_16], %30 {strides = array<i32>} : memref<8x8x256xbf16, #tpu.memory_space<vmem>>, vector<1x8x256xbf16>,
    %31 = vector.extract_strided_slice %11 {offsets = [2, 0, 0], sizes = [1, 8, 256], strides = [1, 1, 1]} : vector<8x8x256xf32> to vector<1x8x256xf32>
    %32 = vector.shape_cast %31 : vector<1x8x256xf32> to vector<8x256xf32>
    %33 = vector.extract_strided_slice %12 {offsets = [5, 0, 0], sizes = [1, 8, 256], strides = [1, 1, 1]} : vector<8x8x256xf32> to vector<1x8x256xf32>
    %34 = vector.shape_cast %33 : vector<1x8x256xf32> to vector<8x256xf32>
    %35 = arith.addf %32, %34 : vector<8x256xf32>
    %36 = arith.truncf %35 : vector<8x256xf32> to vector<8x256xbf16>
    %c2 = arith.constant 2 : index
    %c0_17 = arith.constant 0 : index
    %c0_18 = arith.constant 0 : index
    %37 = vector.load %arg31[%c2, %c0_17, %c0_18] : memref<8x8x256xbf16, #tpu.memory_space<vmem>>, vector<1x8x256xbf16>
    %38 = vector.shape_cast %37 : vector<1x8x256xbf16> to vector<8x256xbf16>
    %39 = vector.shape_cast %36 : vector<8x256xbf16> to vector<1x8x256xbf16>
    tpu.vector_store %arg31[%c2, %c0_17, %c0_18], %39 {strides = array<i32>} : memref<8x8x256xbf16, #tpu.memory_space<vmem>>, vector<1x8x256xbf16>,
    %40 = vector.extract_strided_slice %11 {offsets = [3, 0, 0], sizes = [1, 8, 256], strides = [1, 1, 1]} : vector<8x8x256xf32> to vector<1x8x256xf32>
    %41 = vector.shape_cast %40 : vector<1x8x256xf32> to vector<8x256xf32>
    %42 = vector.extract_strided_slice %12 {offsets = [4, 0, 0], sizes = [1, 8, 256], strides = [1, 1, 1]} : vector<8x8x256xf32> to vector<1x8x256xf32>
    %43 = vector.shape_cast %42 : vector<1x8x256xf32> to vector<8x256xf32>
    %44 = arith.addf %41, %43 : vector<8x256xf32>
    %45 = arith.truncf %44 : vector<8x256xf32> to vector<8x256xbf16>
    %c3 = arith.constant 3 : index
    %c0_19 = arith.constant 0 : index
    %c0_20 = arith.constant 0 : index
    %46 = vector.load %arg31[%c3, %c0_19, %c0_20] : memref<8x8x256xbf16, #tpu.memory_space<vmem>>, vector<1x8x256xbf16>
    %47 = vector.shape_cast %46 : vector<1x8x256xbf16> to vector<8x256xbf16>
    %48 = vector.shape_cast %45 : vector<8x256xbf16> to vector<1x8x256xbf16>
    tpu.vector_store %arg31[%c3, %c0_19, %c0_20], %48 {strides = array<i32>} : memref<8x8x256xbf16, #tpu.memory_space<vmem>>, vector<1x8x256xbf16>,
    %49 = vector.extract_strided_slice %11 {offsets = [4, 0, 0], sizes = [1, 8, 256], strides = [1, 1, 1]} : vector<8x8x256xf32> to vector<1x8x256xf32>
    %50 = vector.shape_cast %49 : vector<1x8x256xf32> to vector<8x256xf32>
    %51 = vector.extract_strided_slice %12 {offsets = [3, 0, 0], sizes = [1, 8, 256], strides = [1, 1, 1]} : vector<8x8x256xf32> to vector<1x8x256xf32>
    %52 = vector.shape_cast %51 : vector<1x8x256xf32> to vector<8x256xf32>
    %53 = arith.addf %50, %52 : vector<8x256xf32>
    %54 = arith.truncf %53 : vector<8x256xf32> to vector<8x256xbf16>
    %c4 = arith.constant 4 : index
    %c0_21 = arith.constant 0 : index
    %c0_22 = arith.constant 0 : index
    %55 = vector.load %arg31[%c4, %c0_21, %c0_22] : memref<8x8x256xbf16, #tpu.memory_space<vmem>>, vector<1x8x256xbf16>
    %56 = vector.shape_cast %55 : vector<1x8x256xbf16> to vector<8x256xbf16>
    %57 = vector.shape_cast %54 : vector<8x256xbf16> to vector<1x8x256xbf16>
    tpu.vector_store %arg31[%c4, %c0_21, %c0_22], %57 {strides = array<i32>} : memref<8x8x256xbf16, #tpu.memory_space<vmem>>, vector<1x8x256xbf16>,
    %58 = vector.extract_strided_slice %11 {offsets = [5, 0, 0], sizes = [1, 8, 256], strides = [1, 1, 1]} : vector<8x8x256xf32> to vector<1x8x256xf32>
    %59 = vector.shape_cast %58 : vector<1x8x256xf32> to vector<8x256xf32>
    %60 = vector.extract_strided_slice %12 {offsets = [2, 0, 0], sizes = [1, 8, 256], strides = [1, 1, 1]} : vector<8x8x256xf32> to vector<1x8x256xf32>
    %61 = vector.shape_cast %60 : vector<1x8x256xf32> to vector<8x256xf32>
    %62 = arith.addf %59, %61 : vector<8x256xf32>
    %63 = arith.truncf %62 : vector<8x256xf32> to vector<8x256xbf16>
    %c5 = arith.constant 5 : index
    %c0_23 = arith.constant 0 : index
    %c0_24 = arith.constant 0 : index
    %64 = vector.load %arg31[%c5, %c0_23, %c0_24] : memref<8x8x256xbf16, #tpu.memory_space<vmem>>, vector<1x8x256xbf16>
    %65 = vector.shape_cast %64 : vector<1x8x256xbf16> to vector<8x256xbf16>
    %66 = vector.shape_cast %63 : vector<8x256xbf16> to vector<1x8x256xbf16>
    tpu.vector_store %arg31[%c5, %c0_23, %c0_24], %66 {strides = array<i32>} : memref<8x8x256xbf16, #tpu.memory_space<vmem>>, vector<1x8x256xbf16>,
    %67 = vector.extract_strided_slice %11 {offsets = [6, 0, 0], sizes = [1, 8, 256], strides = [1, 1, 1]} : vector<8x8x256xf32> to vector<1x8x256xf32>
    %68 = vector.shape_cast %67 : vector<1x8x256xf32> to vector<8x256xf32>
    %69 = vector.extract_strided_slice %12 {offsets = [1, 0, 0], sizes = [1, 8, 256], strides = [1, 1, 1]} : vector<8x8x256xf32> to vector<1x8x256xf32>
    %70 = vector.shape_cast %69 : vector<1x8x256xf32> to vector<8x256xf32>
    %71 = arith.addf %68, %70 : vector<8x256xf32>
    %72 = arith.truncf %71 : vector<8x256xf32> to vector<8x256xbf16>
    %c6 = arith.constant 6 : index
    %c0_25 = arith.constant 0 : index
    %c0_26 = arith.constant 0 : index
    %73 = vector.load %arg31[%c6, %c0_25, %c0_26] : memref<8x8x256xbf16, #tpu.memory_space<vmem>>, vector<1x8x256xbf16>
    %74 = vector.shape_cast %73 : vector<1x8x256xbf16> to vector<8x256xbf16>
    %75 = vector.shape_cast %72 : vector<8x256xbf16> to vector<1x8x256xbf16>
    tpu.vector_store %arg31[%c6, %c0_25, %c0_26], %75 {strides = array<i32>} : memref<8x8x256xbf16, #tpu.memory_space<vmem>>, vector<1x8x256xbf16>,
    %76 = vector.extract_strided_slice %11 {offsets = [7, 0, 0], sizes = [1, 8, 256], strides = [1, 1, 1]} : vector<8x8x256xf32> to vector<1x8x256xf32>
    %77 = vector.shape_cast %76 : vector<1x8x256xf32> to vector<8x256xf32>
    %78 = vector.extract_strided_slice %12 {offsets = [0, 0, 0], sizes = [1, 8, 256], strides = [1, 1, 1]} : vector<8x8x256xf32> to vector<1x8x256xf32>
    %79 = vector.shape_cast %78 : vector<1x8x256xf32> to vector<8x256xf32>
    %80 = arith.addf %77, %79 : vector<8x256xf32>
    %81 = arith.truncf %80 : vector<8x256xf32> to vector<8x256xbf16>
    %c7 = arith.constant 7 : index
    %c0_27 = arith.constant 0 : index
    %c0_28 = arith.constant 0 : index
    %82 = vector.load %arg31[%c7, %c0_27, %c0_28] : memref<8x8x256xbf16, #tpu.memory_space<vmem>>, vector<1x8x256xbf16>
    %83 = vector.shape_cast %82 : vector<1x8x256xbf16> to vector<8x256xbf16>
    %84 = vector.shape_cast %81 : vector<8x256xbf16> to vector<1x8x256xbf16>
    tpu.vector_store %arg31[%c7, %c0_27, %c0_28], %84 {strides = array<i32>} : memref<8x8x256xbf16, #tpu.memory_space<vmem>>, vector<1x8x256xbf16>,
    %cst_29 = arith.constant 0.000000e+00 : bf16
    %85 = vector.broadcast %cst_29 : bf16 to vector<8x64xbf16>
    %cst_30 = arith.constant 0.000000e+00 : f32
    %86 = vector.broadcast %cst_30 : f32 to vector<8x64xf32>
    %c0_i32 = arith.constant 0 : i32
    %87 = arith.index_cast %c0_i32 : i32 to index
    %c0_31 = arith.constant 0 : index
    %c0_32 = arith.constant 0 : index
    %88 = vector.load %arg31[%87, %c0_31, %c0_32] : memref<8x8x256xbf16, #tpu.memory_space<vmem>>, vector<1x8x256xbf16>
    %89 = vector.shape_cast %88 : vector<1x8x256xbf16> to vector<8x256xbf16>
    %c0_33 = arith.constant 0 : index
    %c0_34 = arith.constant 0 : index
    %90 = vector.load %arg5[%c0_33, %c0_34] : memref<64x256xbf16, #tpu.memory_space<vmem>>, vector<64x256xbf16>
    %cst_35 = arith.constant dense<0.000000e+00> : vector<8x256xf32>
    %91 = tpu.matmul %85, %90, %cst_35 {dimension_numbers = #tpu.dot_dimension_numbers<[1], [0], [0], [1], [0, 0, 1, 1], [], []>} : vector<8x64xbf16>, vector<64x256xbf16>, vector<8x256xf32> -> vector<8x256xf32>
    %92 = arith.extf %89 : vector<8x256xbf16> to vector<8x256xf32>
    %93 = arith.addf %92, %91 : vector<8x256xf32>
    %94 = vector.extract_strided_slice %93 {offsets = [0, 0], sizes = [8, 192], strides = [1, 1]} : vector<8x256xf32> to vector<8x192xf32>
    %95 = arith.negf %94 : vector<8x192xf32>
    %96 = math.exp %95 : vector<8x192xf32>
    %cst_36 = arith.constant 1.000000e+00 : f32
    %97 = vector.broadcast %cst_36 : f32 to vector<8x192xf32>
    %98 = arith.addf %97, %96 : vector<8x192xf32>
    %99 = arith.divf %97, %98 : vector<8x192xf32>
    %100 = vector.extract_strided_slice %99 {offsets = [0, 0], sizes = [8, 64], strides = [1, 1]} : vector<8x192xf32> to vector<8x64xf32>
    %101 = vector.extract_strided_slice %99 {offsets = [0, 64], sizes = [8, 64], strides = [1, 1]} : vector<8x192xf32> to vector<8x64xf32>
    %102 = vector.extract_strided_slice %99 {offsets = [0, 128], sizes = [8, 64], strides = [1, 1]} : vector<8x192xf32> to vector<8x64xf32>
    %103 = vector.extract_strided_slice %93 {offsets = [0, 192], sizes = [8, 64], strides = [1, 1]} : vector<8x256xf32> to vector<8x64xf32>
    %104 = math.tanh %103 : vector<8x64xf32>
    %105 = arith.mulf %101, %86 : vector<8x64xf32>
    %106 = arith.mulf %100, %104 : vector<8x64xf32>
    %107 = arith.addf %105, %106 : vector<8x64xf32>
    %108 = math.tanh %107 : vector<8x64xf32>
    %109 = arith.mulf %102, %108 : vector<8x64xf32>
    %110 = arith.truncf %109 : vector<8x64xf32> to vector<8x64xbf16>
    %111 = vector.extract_strided_slice %110 {offsets = [0, 0], sizes = [8, 32], strides = [1, 1]} : vector<8x64xbf16> to vector<8x32xbf16>
    %112 = arith.index_cast %c0_i32 : i32 to index
    %c0_37 = arith.constant 0 : index
    %c0_38 = arith.constant 0 : index
    %113 = vector.load %arg25[%112, %c0_37, %c0_38] : memref<8x8x32xbf16, #tpu.memory_space<vmem>>, vector<1x8x32xbf16>
    %114 = vector.shape_cast %113 : vector<1x8x32xbf16> to vector<8x32xbf16>
    %115 = vector.shape_cast %111 : vector<8x32xbf16> to vector<1x8x32xbf16>
    tpu.vector_store %arg25[%112, %c0_37, %c0_38], %115 {strides = array<i32>} : memref<8x8x32xbf16, #tpu.memory_space<vmem>>, vector<1x8x32xbf16>,
    %116 = vector.extract_strided_slice %110 {offsets = [0, 32], sizes = [8, 32], strides = [1, 1]} : vector<8x64xbf16> to vector<8x32xbf16>
    %c7_i32 = arith.constant 7 : i32
    %117 = arith.subi %c7_i32, %c0_i32 : i32
    %118 = arith.index_cast %117 : i32 to index
    %c0_39 = arith.constant 0 : index
    %c0_40 = arith.constant 0 : index
    %119 = vector.load %arg26[%118, %c0_39, %c0_40] : memref<8x8x32xbf16, #tpu.memory_space<vmem>>, vector<1x8x32xbf16>
    %120 = vector.shape_cast %119 : vector<1x8x32xbf16> to vector<8x32xbf16>
    %121 = vector.shape_cast %116 : vector<8x32xbf16> to vector<1x8x32xbf16>
    tpu.vector_store %arg26[%118, %c0_39, %c0_40], %121 {strides = array<i32>} : memref<8x8x32xbf16, #tpu.memory_space<vmem>>, vector<1x8x32xbf16>,
    %c1_i32 = arith.constant 1 : i32
    %122 = arith.index_cast %c1_i32 : i32 to index
    %c0_41 = arith.constant 0 : index
    %c0_42 = arith.constant 0 : index
    %123 = vector.load %arg31[%122, %c0_41, %c0_42] : memref<8x8x256xbf16, #tpu.memory_space<vmem>>, vector<1x8x256xbf16>
    %124 = vector.shape_cast %123 : vector<1x8x256xbf16> to vector<8x256xbf16>
    %c0_43 = arith.constant 0 : index
    %c0_44 = arith.constant 0 : index
    %125 = vector.load %arg5[%c0_43, %c0_44] : memref<64x256xbf16, #tpu.memory_space<vmem>>, vector<64x256xbf16>
    %cst_45 = arith.constant dense<0.000000e+00> : vector<8x256xf32>
    %126 = tpu.matmul %110, %125, %cst_45 {dimension_numbers = #tpu.dot_dimension_numbers<[1], [0], [0], [1], [0, 0, 1, 1], [], []>} : vector<8x64xbf16>, vector<64x256xbf16>, vector<8x256xf32> -> vector<8x256xf32>
    %127 = arith.extf %124 : vector<8x256xbf16> to vector<8x256xf32>
    %128 = arith.addf %127, %126 : vector<8x256xf32>
    %129 = vector.extract_strided_slice %128 {offsets = [0, 0], sizes = [8, 192], strides = [1, 1]} : vector<8x256xf32> to vector<8x192xf32>
    %130 = arith.negf %129 : vector<8x192xf32>
    %131 = math.exp %130 : vector<8x192xf32>
    %cst_46 = arith.constant 1.000000e+00 : f32
    %132 = vector.broadcast %cst_46 : f32 to vector<8x192xf32>
    %133 = arith.addf %132, %131 : vector<8x192xf32>
    %134 = arith.divf %132, %133 : vector<8x192xf32>
    %135 = vector.extract_strided_slice %134 {offsets = [0, 0], sizes = [8, 64], strides = [1, 1]} : vector<8x192xf32> to vector<8x64xf32>
    %136 = vector.extract_strided_slice %134 {offsets = [0, 64], sizes = [8, 64], strides = [1, 1]} : vector<8x192xf32> to vector<8x64xf32>
    %137 = vector.extract_strided_slice %134 {offsets = [0, 128], sizes = [8, 64], strides = [1, 1]} : vector<8x192xf32> to vector<8x64xf32>
    %138 = vector.extract_strided_slice %128 {offsets = [0, 192], sizes = [8, 64], strides = [1, 1]} : vector<8x256xf32> to vector<8x64xf32>
    %139 = math.tanh %138 : vector<8x64xf32>
    %140 = arith.mulf %136, %107 : vector<8x64xf32>
    %141 = arith.mulf %135, %139 : vector<8x64xf32>
    %142 = arith.addf %140, %141 : vector<8x64xf32>
    %143 = math.tanh %142 : vector<8x64xf32>
    %144 = arith.mulf %137, %143 : vector<8x64xf32>
    %145 = arith.truncf %144 : vector<8x64xf32> to vector<8x64xbf16>
    %146 = vector.extract_strided_slice %145 {offsets = [0, 0], sizes = [8, 32], strides = [1, 1]} : vector<8x64xbf16> to vector<8x32xbf16>
    %147 = arith.index_cast %c1_i32 : i32 to index
    %c0_47 = arith.constant 0 : index
    %c0_48 = arith.constant 0 : index
    %148 = vector.load %arg25[%147, %c0_47, %c0_48] : memref<8x8x32xbf16, #tpu.memory_space<vmem>>, vector<1x8x32xbf16>
    %149 = vector.shape_cast %148 : vector<1x8x32xbf16> to vector<8x32xbf16>
    %150 = vector.shape_cast %146 : vector<8x32xbf16> to vector<1x8x32xbf16>
    tpu.vector_store %arg25[%147, %c0_47, %c0_48], %150 {strides = array<i32>} : memref<8x8x32xbf16, #tpu.memory_space<vmem>>, vector<1x8x32xbf16>,
    %151 = vector.extract_strided_slice %145 {offsets = [0, 32], sizes = [8, 32], strides = [1, 1]} : vector<8x64xbf16> to vector<8x32xbf16>
    %c7_i32_49 = arith.constant 7 : i32
    %152 = arith.subi %c7_i32_49, %c1_i32 : i32
    %153 = arith.index_cast %152 : i32 to index
    %c0_50 = arith.constant 0 : index
    %c0_51 = arith.constant 0 : index
    %154 = vector.load %arg26[%153, %c0_50, %c0_51] : memref<8x8x32xbf16, #tpu.memory_space<vmem>>, vector<1x8x32xbf16>
    %155 = vector.shape_cast %154 : vector<1x8x32xbf16> to vector<8x32xbf16>
    %156 = vector.shape_cast %151 : vector<8x32xbf16> to vector<1x8x32xbf16>
    tpu.vector_store %arg26[%153, %c0_50, %c0_51], %156 {strides = array<i32>} : memref<8x8x32xbf16, #tpu.memory_space<vmem>>, vector<1x8x32xbf16>,
    %c2_i32 = arith.constant 2 : i32
    %157 = arith.index_cast %c2_i32 : i32 to index
    %c0_52 = arith.constant 0 : index
    %c0_53 = arith.constant 0 : index
    %158 = vector.load %arg31[%157, %c0_52, %c0_53] : memref<8x8x256xbf16, #tpu.memory_space<vmem>>, vector<1x8x256xbf16>
    %159 = vector.shape_cast %158 : vector<1x8x256xbf16> to vector<8x256xbf16>
    %c0_54 = arith.constant 0 : index
    %c0_55 = arith.constant 0 : index
    %160 = vector.load %arg5[%c0_54, %c0_55] : memref<64x256xbf16, #tpu.memory_space<vmem>>, vector<64x256xbf16>
    %cst_56 = arith.constant dense<0.000000e+00> : vector<8x256xf32>
    %161 = tpu.matmul %145, %160, %cst_56 {dimension_numbers = #tpu.dot_dimension_numbers<[1], [0], [0], [1], [0, 0, 1, 1], [], []>} : vector<8x64xbf16>, vector<64x256xbf16>, vector<8x256xf32> -> vector<8x256xf32>
    %162 = arith.extf %159 : vector<8x256xbf16> to vector<8x256xf32>
    %163 = arith.addf %162, %161 : vector<8x256xf32>
    %164 = vector.extract_strided_slice %163 {offsets = [0, 0], sizes = [8, 192], strides = [1, 1]} : vector<8x256xf32> to vector<8x192xf32>
    %165 = arith.negf %164 : vector<8x192xf32>
    %166 = math.exp %165 : vector<8x192xf32>
    %cst_57 = arith.constant 1.000000e+00 : f32
    %167 = vector.broadcast %cst_57 : f32 to vector<8x192xf32>
    %168 = arith.addf %167, %166 : vector<8x192xf32>
    %169 = arith.divf %167, %168 : vector<8x192xf32>
    %170 = vector.extract_strided_slice %169 {offsets = [0, 0], sizes = [8, 64], strides = [1, 1]} : vector<8x192xf32> to vector<8x64xf32>
    %171 = vector.extract_strided_slice %169 {offsets = [0, 64], sizes = [8, 64], strides = [1, 1]} : vector<8x192xf32> to vector<8x64xf32>
    %172 = vector.extract_strided_slice %169 {offsets = [0, 128], sizes = [8, 64], strides = [1, 1]} : vector<8x192xf32> to vector<8x64xf32>
    %173 = vector.extract_strided_slice %163 {offsets = [0, 192], sizes = [8, 64], strides = [1, 1]} : vector<8x256xf32> to vector<8x64xf32>
    %174 = math.tanh %173 : vector<8x64xf32>
    %175 = arith.mulf %171, %142 : vector<8x64xf32>
    %176 = arith.mulf %170, %174 : vector<8x64xf32>
    %177 = arith.addf %175, %176 : vector<8x64xf32>
    %178 = math.tanh %177 : vector<8x64xf32>
    %179 = arith.mulf %172, %178 : vector<8x64xf32>
    %180 = arith.truncf %179 : vector<8x64xf32> to vector<8x64xbf16>
    %181 = vector.extract_strided_slice %180 {offsets = [0, 0], sizes = [8, 32], strides = [1, 1]} : vector<8x64xbf16> to vector<8x32xbf16>
    %182 = arith.index_cast %c2_i32 : i32 to index
    %c0_58 = arith.constant 0 : index
    %c0_59 = arith.constant 0 : index
    %183 = vector.load %arg25[%182, %c0_58, %c0_59] : memref<8x8x32xbf16, #tpu.memory_space<vmem>>, vector<1x8x32xbf16>
    %184 = vector.shape_cast %183 : vector<1x8x32xbf16> to vector<8x32xbf16>
    %185 = vector.shape_cast %181 : vector<8x32xbf16> to vector<1x8x32xbf16>
    tpu.vector_store %arg25[%182, %c0_58, %c0_59], %185 {strides = array<i32>} : memref<8x8x32xbf16, #tpu.memory_space<vmem>>, vector<1x8x32xbf16>,
    %186 = vector.extract_strided_slice %180 {offsets = [0, 32], sizes = [8, 32], strides = [1, 1]} : vector<8x64xbf16> to vector<8x32xbf16>
    %c7_i32_60 = arith.constant 7 : i32
    %187 = arith.subi %c7_i32_60, %c2_i32 : i32
    %188 = arith.index_cast %187 : i32 to index
    %c0_61 = arith.constant 0 : index
    %c0_62 = arith.constant 0 : index
    %189 = vector.load %arg26[%188, %c0_61, %c0_62] : memref<8x8x32xbf16, #tpu.memory_space<vmem>>, vector<1x8x32xbf16>
    %190 = vector.shape_cast %189 : vector<1x8x32xbf16> to vector<8x32xbf16>
    %191 = vector.shape_cast %186 : vector<8x32xbf16> to vector<1x8x32xbf16>
    tpu.vector_store %arg26[%188, %c0_61, %c0_62], %191 {strides = array<i32>} : memref<8x8x32xbf16, #tpu.memory_space<vmem>>, vector<1x8x32xbf16>,
    %c3_i32 = arith.constant 3 : i32
    %192 = arith.index_cast %c3_i32 : i32 to index
    %c0_63 = arith.constant 0 : index
    %c0_64 = arith.constant 0 : index
    %193 = vector.load %arg31[%192, %c0_63, %c0_64] : memref<8x8x256xbf16, #tpu.memory_space<vmem>>, vector<1x8x256xbf16>
    %194 = vector.shape_cast %193 : vector<1x8x256xbf16> to vector<8x256xbf16>
    %c0_65 = arith.constant 0 : index
    %c0_66 = arith.constant 0 : index
    %195 = vector.load %arg5[%c0_65, %c0_66] : memref<64x256xbf16, #tpu.memory_space<vmem>>, vector<64x256xbf16>
    %cst_67 = arith.constant dense<0.000000e+00> : vector<8x256xf32>
    %196 = tpu.matmul %180, %195, %cst_67 {dimension_numbers = #tpu.dot_dimension_numbers<[1], [0], [0], [1], [0, 0, 1, 1], [], []>} : vector<8x64xbf16>, vector<64x256xbf16>, vector<8x256xf32> -> vector<8x256xf32>
    %197 = arith.extf %194 : vector<8x256xbf16> to vector<8x256xf32>
    %198 = arith.addf %197, %196 : vector<8x256xf32>
    %199 = vector.extract_strided_slice %198 {offsets = [0, 0], sizes = [8, 192], strides = [1, 1]} : vector<8x256xf32> to vector<8x192xf32>
    %200 = arith.negf %199 : vector<8x192xf32>
    %201 = math.exp %200 : vector<8x192xf32>
    %cst_68 = arith.constant 1.000000e+00 : f32
    %202 = vector.broadcast %cst_68 : f32 to vector<8x192xf32>
    %203 = arith.addf %202, %201 : vector<8x192xf32>
    %204 = arith.divf %202, %203 : vector<8x192xf32>
    %205 = vector.extract_strided_slice %204 {offsets = [0, 0], sizes = [8, 64], strides = [1, 1]} : vector<8x192xf32> to vector<8x64xf32>
    %206 = vector.extract_strided_slice %204 {offsets = [0, 64], sizes = [8, 64], strides = [1, 1]} : vector<8x192xf32> to vector<8x64xf32>
    %207 = vector.extract_strided_slice %204 {offsets = [0, 128], sizes = [8, 64], strides = [1, 1]} : vector<8x192xf32> to vector<8x64xf32>
    %208 = vector.extract_strided_slice %198 {offsets = [0, 192], sizes = [8, 64], strides = [1, 1]} : vector<8x256xf32> to vector<8x64xf32>
    %209 = math.tanh %208 : vector<8x64xf32>
    %210 = arith.mulf %206, %177 : vector<8x64xf32>
    %211 = arith.mulf %205, %209 : vector<8x64xf32>
    %212 = arith.addf %210, %211 : vector<8x64xf32>
    %213 = math.tanh %212 : vector<8x64xf32>
    %214 = arith.mulf %207, %213 : vector<8x64xf32>
    %215 = arith.truncf %214 : vector<8x64xf32> to vector<8x64xbf16>
    %216 = vector.extract_strided_slice %215 {offsets = [0, 0], sizes = [8, 32], strides = [1, 1]} : vector<8x64xbf16> to vector<8x32xbf16>
    %217 = arith.index_cast %c3_i32 : i32 to index
    %c0_69 = arith.constant 0 : index
    %c0_70 = arith.constant 0 : index
    %218 = vector.load %arg25[%217, %c0_69, %c0_70] : memref<8x8x32xbf16, #tpu.memory_space<vmem>>, vector<1x8x32xbf16>
    %219 = vector.shape_cast %218 : vector<1x8x32xbf16> to vector<8x32xbf16>
    %220 = vector.shape_cast %216 : vector<8x32xbf16> to vector<1x8x32xbf16>
    tpu.vector_store %arg25[%217, %c0_69, %c0_70], %220 {strides = array<i32>} : memref<8x8x32xbf16, #tpu.memory_space<vmem>>, vector<1x8x32xbf16>,
    %221 = vector.extract_strided_slice %215 {offsets = [0, 32], sizes = [8, 32], strides = [1, 1]} : vector<8x64xbf16> to vector<8x32xbf16>
    %c7_i32_71 = arith.constant 7 : i32
    %222 = arith.subi %c7_i32_71, %c3_i32 : i32
    %223 = arith.index_cast %222 : i32 to index
    %c0_72 = arith.constant 0 : index
    %c0_73 = arith.constant 0 : index
    %224 = vector.load %arg26[%223, %c0_72, %c0_73] : memref<8x8x32xbf16, #tpu.memory_space<vmem>>, vector<1x8x32xbf16>
    %225 = vector.shape_cast %224 : vector<1x8x32xbf16> to vector<8x32xbf16>
    %226 = vector.shape_cast %221 : vector<8x32xbf16> to vector<1x8x32xbf16>
    tpu.vector_store %arg26[%223, %c0_72, %c0_73], %226 {strides = array<i32>} : memref<8x8x32xbf16, #tpu.memory_space<vmem>>, vector<1x8x32xbf16>,
    %c4_i32 = arith.constant 4 : i32
    %227 = arith.index_cast %c4_i32 : i32 to index
    %c0_74 = arith.constant 0 : index
    %c0_75 = arith.constant 0 : index
    %228 = vector.load %arg31[%227, %c0_74, %c0_75] : memref<8x8x256xbf16, #tpu.memory_space<vmem>>, vector<1x8x256xbf16>
    %229 = vector.shape_cast %228 : vector<1x8x256xbf16> to vector<8x256xbf16>
    %c0_76 = arith.constant 0 : index
    %c0_77 = arith.constant 0 : index
    %230 = vector.load %arg5[%c0_76, %c0_77] : memref<64x256xbf16, #tpu.memory_space<vmem>>, vector<64x256xbf16>
    %cst_78 = arith.constant dense<0.000000e+00> : vector<8x256xf32>
    %231 = tpu.matmul %215, %230, %cst_78 {dimension_numbers = #tpu.dot_dimension_numbers<[1], [0], [0], [1], [0, 0, 1, 1], [], []>} : vector<8x64xbf16>, vector<64x256xbf16>, vector<8x256xf32> -> vector<8x256xf32>
    %232 = arith.extf %229 : vector<8x256xbf16> to vector<8x256xf32>
    %233 = arith.addf %232, %231 : vector<8x256xf32>
    %234 = vector.extract_strided_slice %233 {offsets = [0, 0], sizes = [8, 192], strides = [1, 1]} : vector<8x256xf32> to vector<8x192xf32>
    %235 = arith.negf %234 : vector<8x192xf32>
    %236 = math.exp %235 : vector<8x192xf32>
    %cst_79 = arith.constant 1.000000e+00 : f32
    %237 = vector.broadcast %cst_79 : f32 to vector<8x192xf32>
    %238 = arith.addf %237, %236 : vector<8x192xf32>
    %239 = arith.divf %237, %238 : vector<8x192xf32>
    %240 = vector.extract_strided_slice %239 {offsets = [0, 0], sizes = [8, 64], strides = [1, 1]} : vector<8x192xf32> to vector<8x64xf32>
    %241 = vector.extract_strided_slice %239 {offsets = [0, 64], sizes = [8, 64], strides = [1, 1]} : vector<8x192xf32> to vector<8x64xf32>
    %242 = vector.extract_strided_slice %239 {offsets = [0, 128], sizes = [8, 64], strides = [1, 1]} : vector<8x192xf32> to vector<8x64xf32>
    %243 = vector.extract_strided_slice %233 {offsets = [0, 192], sizes = [8, 64], strides = [1, 1]} : vector<8x256xf32> to vector<8x64xf32>
    %244 = math.tanh %243 : vector<8x64xf32>
    %245 = arith.mulf %241, %212 : vector<8x64xf32>
    %246 = arith.mulf %240, %244 : vector<8x64xf32>
    %247 = arith.addf %245, %246 : vector<8x64xf32>
    %248 = math.tanh %247 : vector<8x64xf32>
    %249 = arith.mulf %242, %248 : vector<8x64xf32>
    %250 = arith.truncf %249 : vector<8x64xf32> to vector<8x64xbf16>
    %251 = vector.extract_strided_slice %250 {offsets = [0, 0], sizes = [8, 32], strides = [1, 1]} : vector<8x64xbf16> to vector<8x32xbf16>
    %252 = arith.index_cast %c4_i32 : i32 to index
    %c0_80 = arith.constant 0 : index
    %c0_81 = arith.constant 0 : index
    %253 = vector.load %arg25[%252, %c0_80, %c0_81] : memref<8x8x32xbf16, #tpu.memory_space<vmem>>, vector<1x8x32xbf16>
    %254 = vector.shape_cast %253 : vector<1x8x32xbf16> to vector<8x32xbf16>
    %255 = vector.shape_cast %251 : vector<8x32xbf16> to vector<1x8x32xbf16>
    tpu.vector_store %arg25[%252, %c0_80, %c0_81], %255 {strides = array<i32>} : memref<8x8x32xbf16, #tpu.memory_space<vmem>>, vector<1x8x32xbf16>,
    %256 = vector.extract_strided_slice %250 {offsets = [0, 32], sizes = [8, 32], strides = [1, 1]} : vector<8x64xbf16> to vector<8x32xbf16>
    %c7_i32_82 = arith.constant 7 : i32
    %257 = arith.subi %c7_i32_82, %c4_i32 : i32
    %258 = arith.index_cast %257 : i32 to index
    %c0_83 = arith.constant 0 : index
    %c0_84 = arith.constant 0 : index
    %259 = vector.load %arg26[%258, %c0_83, %c0_84] : memref<8x8x32xbf16, #tpu.memory_space<vmem>>, vector<1x8x32xbf16>
    %260 = vector.shape_cast %259 : vector<1x8x32xbf16> to vector<8x32xbf16>
    %261 = vector.shape_cast %256 : vector<8x32xbf16> to vector<1x8x32xbf16>
    tpu.vector_store %arg26[%258, %c0_83, %c0_84], %261 {strides = array<i32>} : memref<8x8x32xbf16, #tpu.memory_space<vmem>>, vector<1x8x32xbf16>,
    %c5_i32 = arith.constant 5 : i32
    %262 = arith.index_cast %c5_i32 : i32 to index
    %c0_85 = arith.constant 0 : index
    %c0_86 = arith.constant 0 : index
    %263 = vector.load %arg31[%262, %c0_85, %c0_86] : memref<8x8x256xbf16, #tpu.memory_space<vmem>>, vector<1x8x256xbf16>
    %264 = vector.shape_cast %263 : vector<1x8x256xbf16> to vector<8x256xbf16>
    %c0_87 = arith.constant 0 : index
    %c0_88 = arith.constant 0 : index
    %265 = vector.load %arg5[%c0_87, %c0_88] : memref<64x256xbf16, #tpu.memory_space<vmem>>, vector<64x256xbf16>
    %cst_89 = arith.constant dense<0.000000e+00> : vector<8x256xf32>
    %266 = tpu.matmul %250, %265, %cst_89 {dimension_numbers = #tpu.dot_dimension_numbers<[1], [0], [0], [1], [0, 0, 1, 1], [], []>} : vector<8x64xbf16>, vector<64x256xbf16>, vector<8x256xf32> -> vector<8x256xf32>
    %267 = arith.extf %264 : vector<8x256xbf16> to vector<8x256xf32>
    %268 = arith.addf %267, %266 : vector<8x256xf32>
    %269 = vector.extract_strided_slice %268 {offsets = [0, 0], sizes = [8, 192], strides = [1, 1]} : vector<8x256xf32> to vector<8x192xf32>
    %270 = arith.negf %269 : vector<8x192xf32>
    %271 = math.exp %270 : vector<8x192xf32>
    %cst_90 = arith.constant 1.000000e+00 : f32
    %272 = vector.broadcast %cst_90 : f32 to vector<8x192xf32>
    %273 = arith.addf %272, %271 : vector<8x192xf32>
    %274 = arith.divf %272, %273 : vector<8x192xf32>
    %275 = vector.extract_strided_slice %274 {offsets = [0, 0], sizes = [8, 64], strides = [1, 1]} : vector<8x192xf32> to vector<8x64xf32>
    %276 = vector.extract_strided_slice %274 {offsets = [0, 64], sizes = [8, 64], strides = [1, 1]} : vector<8x192xf32> to vector<8x64xf32>
    %277 = vector.extract_strided_slice %274 {offsets = [0, 128], sizes = [8, 64], strides = [1, 1]} : vector<8x192xf32> to vector<8x64xf32>
    %278 = vector.extract_strided_slice %268 {offsets = [0, 192], sizes = [8, 64], strides = [1, 1]} : vector<8x256xf32> to vector<8x64xf32>
    %279 = math.tanh %278 : vector<8x64xf32>
    %280 = arith.mulf %276, %247 : vector<8x64xf32>
    %281 = arith.mulf %275, %279 : vector<8x64xf32>
    %282 = arith.addf %280, %281 : vector<8x64xf32>
    %283 = math.tanh %282 : vector<8x64xf32>
    %284 = arith.mulf %277, %283 : vector<8x64xf32>
    %285 = arith.truncf %284 : vector<8x64xf32> to vector<8x64xbf16>
    %286 = vector.extract_strided_slice %285 {offsets = [0, 0], sizes = [8, 32], strides = [1, 1]} : vector<8x64xbf16> to vector<8x32xbf16>
    %287 = arith.index_cast %c5_i32 : i32 to index
    %c0_91 = arith.constant 0 : index
    %c0_92 = arith.constant 0 : index
    %288 = vector.load %arg25[%287, %c0_91, %c0_92] : memref<8x8x32xbf16, #tpu.memory_space<vmem>>, vector<1x8x32xbf16>
    %289 = vector.shape_cast %288 : vector<1x8x32xbf16> to vector<8x32xbf16>
    %290 = vector.shape_cast %286 : vector<8x32xbf16> to vector<1x8x32xbf16>
    tpu.vector_store %arg25[%287, %c0_91, %c0_92], %290 {strides = array<i32>} : memref<8x8x32xbf16, #tpu.memory_space<vmem>>, vector<1x8x32xbf16>,
    %291 = vector.extract_strided_slice %285 {offsets = [0, 32], sizes = [8, 32], strides = [1, 1]} : vector<8x64xbf16> to vector<8x32xbf16>
    %c7_i32_93 = arith.constant 7 : i32
    %292 = arith.subi %c7_i32_93, %c5_i32 : i32
    %293 = arith.index_cast %292 : i32 to index
    %c0_94 = arith.constant 0 : index
    %c0_95 = arith.constant 0 : index
    %294 = vector.load %arg26[%293, %c0_94, %c0_95] : memref<8x8x32xbf16, #tpu.memory_space<vmem>>, vector<1x8x32xbf16>
    %295 = vector.shape_cast %294 : vector<1x8x32xbf16> to vector<8x32xbf16>
    %296 = vector.shape_cast %291 : vector<8x32xbf16> to vector<1x8x32xbf16>
    tpu.vector_store %arg26[%293, %c0_94, %c0_95], %296 {strides = array<i32>} : memref<8x8x32xbf16, #tpu.memory_space<vmem>>, vector<1x8x32xbf16>,
    %c6_i32 = arith.constant 6 : i32
    %297 = arith.index_cast %c6_i32 : i32 to index
    %c0_96 = arith.constant 0 : index
    %c0_97 = arith.constant 0 : index
    %298 = vector.load %arg31[%297, %c0_96, %c0_97] : memref<8x8x256xbf16, #tpu.memory_space<vmem>>, vector<1x8x256xbf16>
    %299 = vector.shape_cast %298 : vector<1x8x256xbf16> to vector<8x256xbf16>
    %c0_98 = arith.constant 0 : index
    %c0_99 = arith.constant 0 : index
    %300 = vector.load %arg5[%c0_98, %c0_99] : memref<64x256xbf16, #tpu.memory_space<vmem>>, vector<64x256xbf16>
    %cst_100 = arith.constant dense<0.000000e+00> : vector<8x256xf32>
    %301 = tpu.matmul %285, %300, %cst_100 {dimension_numbers = #tpu.dot_dimension_numbers<[1], [0], [0], [1], [0, 0, 1, 1], [], []>} : vector<8x64xbf16>, vector<64x256xbf16>, vector<8x256xf32> -> vector<8x256xf32>
    %302 = arith.extf %299 : vector<8x256xbf16> to vector<8x256xf32>
    %303 = arith.addf %302, %301 : vector<8x256xf32>
    %304 = vector.extract_strided_slice %303 {offsets = [0, 0], sizes = [8, 192], strides = [1, 1]} : vector<8x256xf32> to vector<8x192xf32>
    %305 = arith.negf %304 : vector<8x192xf32>
    %306 = math.exp %305 : vector<8x192xf32>
    %cst_101 = arith.constant 1.000000e+00 : f32
    %307 = vector.broadcast %cst_101 : f32 to vector<8x192xf32>
    %308 = arith.addf %307, %306 : vector<8x192xf32>
    %309 = arith.divf %307, %308 : vector<8x192xf32>
    %310 = vector.extract_strided_slice %309 {offsets = [0, 0], sizes = [8, 64], strides = [1, 1]} : vector<8x192xf32> to vector<8x64xf32>
    %311 = vector.extract_strided_slice %309 {offsets = [0, 64], sizes = [8, 64], strides = [1, 1]} : vector<8x192xf32> to vector<8x64xf32>
    %312 = vector.extract_strided_slice %309 {offsets = [0, 128], sizes = [8, 64], strides = [1, 1]} : vector<8x192xf32> to vector<8x64xf32>
    %313 = vector.extract_strided_slice %303 {offsets = [0, 192], sizes = [8, 64], strides = [1, 1]} : vector<8x256xf32> to vector<8x64xf32>
    %314 = math.tanh %313 : vector<8x64xf32>
    %315 = arith.mulf %311, %282 : vector<8x64xf32>
    %316 = arith.mulf %310, %314 : vector<8x64xf32>
    %317 = arith.addf %315, %316 : vector<8x64xf32>
    %318 = math.tanh %317 : vector<8x64xf32>
    %319 = arith.mulf %312, %318 : vector<8x64xf32>
    %320 = arith.truncf %319 : vector<8x64xf32> to vector<8x64xbf16>
    %321 = vector.extract_strided_slice %320 {offsets = [0, 0], sizes = [8, 32], strides = [1, 1]} : vector<8x64xbf16> to vector<8x32xbf16>
    %322 = arith.index_cast %c6_i32 : i32 to index
    %c0_102 = arith.constant 0 : index
    %c0_103 = arith.constant 0 : index
    %323 = vector.load %arg25[%322, %c0_102, %c0_103] : memref<8x8x32xbf16, #tpu.memory_space<vmem>>, vector<1x8x32xbf16>
    %324 = vector.shape_cast %323 : vector<1x8x32xbf16> to vector<8x32xbf16>
    %325 = vector.shape_cast %321 : vector<8x32xbf16> to vector<1x8x32xbf16>
    tpu.vector_store %arg25[%322, %c0_102, %c0_103], %325 {strides = array<i32>} : memref<8x8x32xbf16, #tpu.memory_space<vmem>>, vector<1x8x32xbf16>,
    %326 = vector.extract_strided_slice %320 {offsets = [0, 32], sizes = [8, 32], strides = [1, 1]} : vector<8x64xbf16> to vector<8x32xbf16>
    %c7_i32_104 = arith.constant 7 : i32
    %327 = arith.subi %c7_i32_104, %c6_i32 : i32
    %328 = arith.index_cast %327 : i32 to index
    %c0_105 = arith.constant 0 : index
    %c0_106 = arith.constant 0 : index
    %329 = vector.load %arg26[%328, %c0_105, %c0_106] : memref<8x8x32xbf16, #tpu.memory_space<vmem>>, vector<1x8x32xbf16>
    %330 = vector.shape_cast %329 : vector<1x8x32xbf16> to vector<8x32xbf16>
    %331 = vector.shape_cast %326 : vector<8x32xbf16> to vector<1x8x32xbf16>
    tpu.vector_store %arg26[%328, %c0_105, %c0_106], %331 {strides = array<i32>} : memref<8x8x32xbf16, #tpu.memory_space<vmem>>, vector<1x8x32xbf16>,
    %c7_i32_107 = arith.constant 7 : i32
    %332 = arith.index_cast %c7_i32_107 : i32 to index
    %c0_108 = arith.constant 0 : index
    %c0_109 = arith.constant 0 : index
    %333 = vector.load %arg31[%332, %c0_108, %c0_109] : memref<8x8x256xbf16, #tpu.memory_space<vmem>>, vector<1x8x256xbf16>
    %334 = vector.shape_cast %333 : vector<1x8x256xbf16> to vector<8x256xbf16>
    %c0_110 = arith.constant 0 : index
    %c0_111 = arith.constant 0 : index
    %335 = vector.load %arg5[%c0_110, %c0_111] : memref<64x256xbf16, #tpu.memory_space<vmem>>, vector<64x256xbf16>
    %cst_112 = arith.constant dense<0.000000e+00> : vector<8x256xf32>
    %336 = tpu.matmul %320, %335, %cst_112 {dimension_numbers = #tpu.dot_dimension_numbers<[1], [0], [0], [1], [0, 0, 1, 1], [], []>} : vector<8x64xbf16>, vector<64x256xbf16>, vector<8x256xf32> -> vector<8x256xf32>
    %337 = arith.extf %334 : vector<8x256xbf16> to vector<8x256xf32>
    %338 = arith.addf %337, %336 : vector<8x256xf32>
    %339 = vector.extract_strided_slice %338 {offsets = [0, 0], sizes = [8, 192], strides = [1, 1]} : vector<8x256xf32> to vector<8x192xf32>
    %340 = arith.negf %339 : vector<8x192xf32>
    %341 = math.exp %340 : vector<8x192xf32>
    %cst_113 = arith.constant 1.000000e+00 : f32
    %342 = vector.broadcast %cst_113 : f32 to vector<8x192xf32>
    %343 = arith.addf %342, %341 : vector<8x192xf32>
    %344 = arith.divf %342, %343 : vector<8x192xf32>
    %345 = vector.extract_strided_slice %344 {offsets = [0, 0], sizes = [8, 64], strides = [1, 1]} : vector<8x192xf32> to vector<8x64xf32>
    %346 = vector.extract_strided_slice %344 {offsets = [0, 64], sizes = [8, 64], strides = [1, 1]} : vector<8x192xf32> to vector<8x64xf32>
    %347 = vector.extract_strided_slice %344 {offsets = [0, 128], sizes = [8, 64], strides = [1, 1]} : vector<8x192xf32> to vector<8x64xf32>
    %348 = vector.extract_strided_slice %338 {offsets = [0, 192], sizes = [8, 64], strides = [1, 1]} : vector<8x256xf32> to vector<8x64xf32>
    %349 = math.tanh %348 : vector<8x64xf32>
    %350 = arith.mulf %346, %317 : vector<8x64xf32>
    %351 = arith.mulf %345, %349 : vector<8x64xf32>
    %352 = arith.addf %350, %351 : vector<8x64xf32>
    %353 = math.tanh %352 : vector<8x64xf32>
    %354 = arith.mulf %347, %353 : vector<8x64xf32>
    %355 = arith.truncf %354 : vector<8x64xf32> to vector<8x64xbf16>
    %356 = vector.extract_strided_slice %355 {offsets = [0, 0], sizes = [8, 32], strides = [1, 1]} : vector<8x64xbf16> to vector<8x32xbf16>
    %357 = arith.index_cast %c7_i32_107 : i32 to index
    %c0_114 = arith.constant 0 : index
    %c0_115 = arith.constant 0 : index
    %358 = vector.load %arg25[%357, %c0_114, %c0_115] : memref<8x8x32xbf16, #tpu.memory_space<vmem>>, vector<1x8x32xbf16>
    %359 = vector.shape_cast %358 : vector<1x8x32xbf16> to vector<8x32xbf16>
    %360 = vector.shape_cast %356 : vector<8x32xbf16> to vector<1x8x32xbf16>
    tpu.vector_store %arg25[%357, %c0_114, %c0_115], %360 {strides = array<i32>} : memref<8x8x32xbf16, #tpu.memory_space<vmem>>, vector<1x8x32xbf16>,
    %361 = vector.extract_strided_slice %355 {offsets = [0, 32], sizes = [8, 32], strides = [1, 1]} : vector<8x64xbf16> to vector<8x32xbf16>
    %c7_i32_116 = arith.constant 7 : i32
    %362 = arith.subi %c7_i32_116, %c7_i32_107 : i32
    %363 = arith.index_cast %362 : i32 to index
    %c0_117 = arith.constant 0 : index
    %c0_118 = arith.constant 0 : index
    %364 = vector.load %arg26[%363, %c0_117, %c0_118] : memref<8x8x32xbf16, #tpu.memory_space<vmem>>, vector<1x8x32xbf16>
    %365 = vector.shape_cast %364 : vector<1x8x32xbf16> to vector<8x32xbf16>
    %366 = vector.shape_cast %361 : vector<8x32xbf16> to vector<1x8x32xbf16>
    tpu.vector_store %arg26[%363, %c0_117, %c0_118], %366 {strides = array<i32>} : memref<8x8x32xbf16, #tpu.memory_space<vmem>>, vector<1x8x32xbf16>,
    %c8_i32 = arith.constant 8 : i32
    %c0_119 = arith.constant 0 : index
    %c0_120 = arith.constant 0 : index
    %c0_121 = arith.constant 0 : index
    %367 = vector.load %arg25[%c0_119, %c0_120, %c0_121] : memref<8x8x32xbf16, #tpu.memory_space<vmem>>, vector<8x8x32xbf16>
    %368 = vector.shape_cast %367 : vector<8x8x32xbf16> to vector<64x32xbf16>
    %c0_122 = arith.constant 0 : index
    %c0_123 = arith.constant 0 : index
    %369 = vector.load %arg6[%c0_122, %c0_123] : memref<32x256xbf16, #tpu.memory_space<vmem>>, vector<32x256xbf16>
    %cst_124 = arith.constant dense<0.000000e+00> : vector<64x256xf32>
    %370 = tpu.matmul %368, %369, %cst_124 {dimension_numbers = #tpu.dot_dimension_numbers<[1], [0], [0], [1], [0, 0, 1, 1], [], []>} : vector<64x32xbf16>, vector<32x256xbf16>, vector<64x256xf32> -> vector<64x256xf32>
    %c0_125 = arith.constant 0 : index
    %c0_126 = arith.constant 0 : index
    %c0_127 = arith.constant 0 : index
    %371 = vector.load %arg25[%c0_125, %c0_126, %c0_127] : memref<8x8x32xbf16, #tpu.memory_space<vmem>>, vector<8x8x32xbf16>
    %372 = vector.shape_cast %371 : vector<8x8x32xbf16> to vector<64x32xbf16>
    %c0_128 = arith.constant 0 : index
    %c0_129 = arith.constant 0 : index
    %373 = vector.load %arg8[%c0_128, %c0_129] : memref<32x256xbf16, #tpu.memory_space<vmem>>, vector<32x256xbf16>
    %cst_130 = arith.constant dense<0.000000e+00> : vector<64x256xf32>
    %374 = tpu.matmul %372, %373, %cst_130 {dimension_numbers = #tpu.dot_dimension_numbers<[1], [0], [0], [1], [0, 0, 1, 1], [], []>} : vector<64x32xbf16>, vector<32x256xbf16>, vector<64x256xf32> -> vector<64x256xf32>
    %c0_131 = arith.constant 0 : index
    %c0_132 = arith.constant 0 : index
    %c0_133 = arith.constant 0 : index
    %375 = vector.load %arg26[%c0_131, %c0_132, %c0_133] : memref<8x8x32xbf16, #tpu.memory_space<vmem>>, vector<8x8x32xbf16>
    %376 = vector.shape_cast %375 : vector<8x8x32xbf16> to vector<64x32xbf16>
    %c0_134 = arith.constant 0 : index
    %c0_135 = arith.constant 0 : index
    %377 = vector.load %arg7[%c0_134, %c0_135] : memref<32x256xbf16, #tpu.memory_space<vmem>>, vector<32x256xbf16>
    %cst_136 = arith.constant dense<0.000000e+00> : vector<64x256xf32>
    %378 = tpu.matmul %376, %377, %cst_136 {dimension_numbers = #tpu.dot_dimension_numbers<[1], [0], [0], [1], [0, 0, 1, 1], [], []>} : vector<64x32xbf16>, vector<32x256xbf16>, vector<64x256xf32> -> vector<64x256xf32>
    %379 = arith.addf %370, %378 : vector<64x256xf32>
    %c0_137 = arith.constant 0 : index
    %c0_138 = arith.constant 0 : index
    %c0_139 = arith.constant 0 : index
    %380 = vector.load %arg26[%c0_137, %c0_138, %c0_139] : memref<8x8x32xbf16, #tpu.memory_space<vmem>>, vector<8x8x32xbf16>
    %381 = vector.shape_cast %380 : vector<8x8x32xbf16> to vector<64x32xbf16>
    %c0_140 = arith.constant 0 : index
    %c0_141 = arith.constant 0 : index
    %382 = vector.load %arg9[%c0_140, %c0_141] : memref<32x256xbf16, #tpu.memory_space<vmem>>, vector<32x256xbf16>
    %cst_142 = arith.constant dense<0.000000e+00> : vector<64x256xf32>
    %383 = tpu.matmul %381, %382, %cst_142 {dimension_numbers = #tpu.dot_dimension_numbers<[1], [0], [0], [1], [0, 0, 1, 1], [], []>} : vector<64x32xbf16>, vector<32x256xbf16>, vector<64x256xf32> -> vector<64x256xf32>
    %384 = arith.addf %374, %383 : vector<64x256xf32>
    %c0_143 = arith.constant 0 : index
    %c0_144 = arith.constant 0 : index
    %385 = vector.load %arg10[%c0_143, %c0_144] : memref<1x256xf32, #tpu.memory_space<vmem>>, vector<1x256xf32>
    %386 = vector.broadcast %385 : vector<1x256xf32> to vector<64x256xf32>
    %387 = arith.addf %379, %386 : vector<64x256xf32>
    %388 = vector.shape_cast %387 : vector<64x256xf32> to vector<8x8x256xf32>
    %389 = vector.shape_cast %384 : vector<64x256xf32> to vector<8x8x256xf32>
    %390 = vector.extract_strided_slice %388 {offsets = [0, 0, 0], sizes = [1, 8, 256], strides = [1, 1, 1]} : vector<8x8x256xf32> to vector<1x8x256xf32>
    %391 = vector.shape_cast %390 : vector<1x8x256xf32> to vector<8x256xf32>
    %392 = vector.extract_strided_slice %389 {offsets = [7, 0, 0], sizes = [1, 8, 256], strides = [1, 1, 1]} : vector<8x8x256xf32> to vector<1x8x256xf32>
    %393 = vector.shape_cast %392 : vector<1x8x256xf32> to vector<8x256xf32>
    %394 = arith.addf %391, %393 : vector<8x256xf32>
    %395 = arith.truncf %394 : vector<8x256xf32> to vector<8x256xbf16>
    %c0_145 = arith.constant 0 : index
    %c0_146 = arith.constant 0 : index
    %c0_147 = arith.constant 0 : index
    %396 = vector.load %arg31[%c0_145, %c0_146, %c0_147] : memref<8x8x256xbf16, #tpu.memory_space<vmem>>, vector<1x8x256xbf16>
    %397 = vector.shape_cast %396 : vector<1x8x256xbf16> to vector<8x256xbf16>
    %398 = vector.shape_cast %395 : vector<8x256xbf16> to vector<1x8x256xbf16>
    tpu.vector_store %arg31[%c0_145, %c0_146, %c0_147], %398 {strides = array<i32>} : memref<8x8x256xbf16, #tpu.memory_space<vmem>>, vector<1x8x256xbf16>,
    %399 = vector.extract_strided_slice %388 {offsets = [1, 0, 0], sizes = [1, 8, 256], strides = [1, 1, 1]} : vector<8x8x256xf32> to vector<1x8x256xf32>
    %400 = vector.shape_cast %399 : vector<1x8x256xf32> to vector<8x256xf32>
    %401 = vector.extract_strided_slice %389 {offsets = [6, 0, 0], sizes = [1, 8, 256], strides = [1, 1, 1]} : vector<8x8x256xf32> to vector<1x8x256xf32>
    %402 = vector.shape_cast %401 : vector<1x8x256xf32> to vector<8x256xf32>
    %403 = arith.addf %400, %402 : vector<8x256xf32>
    %404 = arith.truncf %403 : vector<8x256xf32> to vector<8x256xbf16>
    %c1_148 = arith.constant 1 : index
    %c0_149 = arith.constant 0 : index
    %c0_150 = arith.constant 0 : index
    %405 = vector.load %arg31[%c1_148, %c0_149, %c0_150] : memref<8x8x256xbf16, #tpu.memory_space<vmem>>, vector<1x8x256xbf16>
    %406 = vector.shape_cast %405 : vector<1x8x256xbf16> to vector<8x256xbf16>
    %407 = vector.shape_cast %404 : vector<8x256xbf16> to vector<1x8x256xbf16>
    tpu.vector_store %arg31[%c1_148, %c0_149, %c0_150], %407 {strides = array<i32>} : memref<8x8x256xbf16, #tpu.memory_space<vmem>>, vector<1x8x256xbf16>,
    %408 = vector.extract_strided_slice %388 {offsets = [2, 0, 0], sizes = [1, 8, 256], strides = [1, 1, 1]} : vector<8x8x256xf32> to vector<1x8x256xf32>
    %409 = vector.shape_cast %408 : vector<1x8x256xf32> to vector<8x256xf32>
    %410 = vector.extract_strided_slice %389 {offsets = [5, 0, 0], sizes = [1, 8, 256], strides = [1, 1, 1]} : vector<8x8x256xf32> to vector<1x8x256xf32>
    %411 = vector.shape_cast %410 : vector<1x8x256xf32> to vector<8x256xf32>
    %412 = arith.addf %409, %411 : vector<8x256xf32>
    %413 = arith.truncf %412 : vector<8x256xf32> to vector<8x256xbf16>
    %c2_151 = arith.constant 2 : index
    %c0_152 = arith.constant 0 : index
    %c0_153 = arith.constant 0 : index
    %414 = vector.load %arg31[%c2_151, %c0_152, %c0_153] : memref<8x8x256xbf16, #tpu.memory_space<vmem>>, vector<1x8x256xbf16>
    %415 = vector.shape_cast %414 : vector<1x8x256xbf16> to vector<8x256xbf16>
    %416 = vector.shape_cast %413 : vector<8x256xbf16> to vector<1x8x256xbf16>
    tpu.vector_store %arg31[%c2_151, %c0_152, %c0_153], %416 {strides = array<i32>} : memref<8x8x256xbf16, #tpu.memory_space<vmem>>, vector<1x8x256xbf16>,
    %417 = vector.extract_strided_slice %388 {offsets = [3, 0, 0], sizes = [1, 8, 256], strides = [1, 1, 1]} : vector<8x8x256xf32> to vector<1x8x256xf32>
    %418 = vector.shape_cast %417 : vector<1x8x256xf32> to vector<8x256xf32>
    %419 = vector.extract_strided_slice %389 {offsets = [4, 0, 0], sizes = [1, 8, 256], strides = [1, 1, 1]} : vector<8x8x256xf32> to vector<1x8x256xf32>
    %420 = vector.shape_cast %419 : vector<1x8x256xf32> to vector<8x256xf32>
    %421 = arith.addf %418, %420 : vector<8x256xf32>
    %422 = arith.truncf %421 : vector<8x256xf32> to vector<8x256xbf16>
    %c3_154 = arith.constant 3 : index
    %c0_155 = arith.constant 0 : index
    %c0_156 = arith.constant 0 : index
    %423 = vector.load %arg31[%c3_154, %c0_155, %c0_156] : memref<8x8x256xbf16, #tpu.memory_space<vmem>>, vector<1x8x256xbf16>
    %424 = vector.shape_cast %423 : vector<1x8x256xbf16> to vector<8x256xbf16>
    %425 = vector.shape_cast %422 : vector<8x256xbf16> to vector<1x8x256xbf16>
    tpu.vector_store %arg31[%c3_154, %c0_155, %c0_156], %425 {strides = array<i32>} : memref<8x8x256xbf16, #tpu.memory_space<vmem>>, vector<1x8x256xbf16>,
    %426 = vector.extract_strided_slice %388 {offsets = [4, 0, 0], sizes = [1, 8, 256], strides = [1, 1, 1]} : vector<8x8x256xf32> to vector<1x8x256xf32>
    %427 = vector.shape_cast %426 : vector<1x8x256xf32> to vector<8x256xf32>
    %428 = vector.extract_strided_slice %389 {offsets = [3, 0, 0], sizes = [1, 8, 256], strides = [1, 1, 1]} : vector<8x8x256xf32> to vector<1x8x256xf32>
    %429 = vector.shape_cast %428 : vector<1x8x256xf32> to vector<8x256xf32>
    %430 = arith.addf %427, %429 : vector<8x256xf32>
    %431 = arith.truncf %430 : vector<8x256xf32> to vector<8x256xbf16>
    %c4_157 = arith.constant 4 : index
    %c0_158 = arith.constant 0 : index
    %c0_159 = arith.constant 0 : index
    %432 = vector.load %arg31[%c4_157, %c0_158, %c0_159] : memref<8x8x256xbf16, #tpu.memory_space<vmem>>, vector<1x8x256xbf16>
    %433 = vector.shape_cast %432 : vector<1x8x256xbf16> to vector<8x256xbf16>
    %434 = vector.shape_cast %431 : vector<8x256xbf16> to vector<1x8x256xbf16>
    tpu.vector_store %arg31[%c4_157, %c0_158, %c0_159], %434 {strides = array<i32>} : memref<8x8x256xbf16, #tpu.memory_space<vmem>>, vector<1x8x256xbf16>,
    %435 = vector.extract_strided_slice %388 {offsets = [5, 0, 0], sizes = [1, 8, 256], strides = [1, 1, 1]} : vector<8x8x256xf32> to vector<1x8x256xf32>
    %436 = vector.shape_cast %435 : vector<1x8x256xf32> to vector<8x256xf32>
    %437 = vector.extract_strided_slice %389 {offsets = [2, 0, 0], sizes = [1, 8, 256], strides = [1, 1, 1]} : vector<8x8x256xf32> to vector<1x8x256xf32>
    %438 = vector.shape_cast %437 : vector<1x8x256xf32> to vector<8x256xf32>
    %439 = arith.addf %436, %438 : vector<8x256xf32>
    %440 = arith.truncf %439 : vector<8x256xf32> to vector<8x256xbf16>
    %c5_160 = arith.constant 5 : index
    %c0_161 = arith.constant 0 : index
    %c0_162 = arith.constant 0 : index
    %441 = vector.load %arg31[%c5_160, %c0_161, %c0_162] : memref<8x8x256xbf16, #tpu.memory_space<vmem>>, vector<1x8x256xbf16>
    %442 = vector.shape_cast %441 : vector<1x8x256xbf16> to vector<8x256xbf16>
    %443 = vector.shape_cast %440 : vector<8x256xbf16> to vector<1x8x256xbf16>
    tpu.vector_store %arg31[%c5_160, %c0_161, %c0_162], %443 {strides = array<i32>} : memref<8x8x256xbf16, #tpu.memory_space<vmem>>, vector<1x8x256xbf16>,
    %444 = vector.extract_strided_slice %388 {offsets = [6, 0, 0], sizes = [1, 8, 256], strides = [1, 1, 1]} : vector<8x8x256xf32> to vector<1x8x256xf32>
    %445 = vector.shape_cast %444 : vector<1x8x256xf32> to vector<8x256xf32>
    %446 = vector.extract_strided_slice %389 {offsets = [1, 0, 0], sizes = [1, 8, 256], strides = [1, 1, 1]} : vector<8x8x256xf32> to vector<1x8x256xf32>
    %447 = vector.shape_cast %446 : vector<1x8x256xf32> to vector<8x256xf32>
    %448 = arith.addf %445, %447 : vector<8x256xf32>
    %449 = arith.truncf %448 : vector<8x256xf32> to vector<8x256xbf16>
    %c6_163 = arith.constant 6 : index
    %c0_164 = arith.constant 0 : index
    %c0_165 = arith.constant 0 : index
    %450 = vector.load %arg31[%c6_163, %c0_164, %c0_165] : memref<8x8x256xbf16, #tpu.memory_space<vmem>>, vector<1x8x256xbf16>
    %451 = vector.shape_cast %450 : vector<1x8x256xbf16> to vector<8x256xbf16>
    %452 = vector.shape_cast %449 : vector<8x256xbf16> to vector<1x8x256xbf16>
    tpu.vector_store %arg31[%c6_163, %c0_164, %c0_165], %452 {strides = array<i32>} : memref<8x8x256xbf16, #tpu.memory_space<vmem>>, vector<1x8x256xbf16>,
    %453 = vector.extract_strided_slice %388 {offsets = [7, 0, 0], sizes = [1, 8, 256], strides = [1, 1, 1]} : vector<8x8x256xf32> to vector<1x8x256xf32>
    %454 = vector.shape_cast %453 : vector<1x8x256xf32> to vector<8x256xf32>
    %455 = vector.extract_strided_slice %389 {offsets = [0, 0, 0], sizes = [1, 8, 256], strides = [1, 1, 1]} : vector<8x8x256xf32> to vector<1x8x256xf32>
    %456 = vector.shape_cast %455 : vector<1x8x256xf32> to vector<8x256xf32>
    %457 = arith.addf %454, %456 : vector<8x256xf32>
    %458 = arith.truncf %457 : vector<8x256xf32> to vector<8x256xbf16>
    %c7_166 = arith.constant 7 : index
    %c0_167 = arith.constant 0 : index
    %c0_168 = arith.constant 0 : index
    %459 = vector.load %arg31[%c7_166, %c0_167, %c0_168] : memref<8x8x256xbf16, #tpu.memory_space<vmem>>, vector<1x8x256xbf16>
    %460 = vector.shape_cast %459 : vector<1x8x256xbf16> to vector<8x256xbf16>
    %461 = vector.shape_cast %458 : vector<8x256xbf16> to vector<1x8x256xbf16>
    tpu.vector_store %arg31[%c7_166, %c0_167, %c0_168], %461 {strides = array<i32>} : memref<8x8x256xbf16, #tpu.memory_space<vmem>>, vector<1x8x256xbf16>,
    %cst_169 = arith.constant 0.000000e+00 : bf16
    %462 = vector.broadcast %cst_169 : bf16 to vector<8x64xbf16>
    %cst_170 = arith.constant 0.000000e+00 : f32
    %463 = vector.broadcast %cst_170 : f32 to vector<8x64xf32>
    %c0_i32_171 = arith.constant 0 : i32
    %464 = arith.index_cast %c0_i32_171 : i32 to index
    %c0_172 = arith.constant 0 : index
    %c0_173 = arith.constant 0 : index
    %465 = vector.load %arg31[%464, %c0_172, %c0_173] : memref<8x8x256xbf16, #tpu.memory_space<vmem>>, vector<1x8x256xbf16>
    %466 = vector.shape_cast %465 : vector<1x8x256xbf16> to vector<8x256xbf16>
    %c0_174 = arith.constant 0 : index
    %c0_175 = arith.constant 0 : index
    %467 = vector.load %arg11[%c0_174, %c0_175] : memref<64x256xbf16, #tpu.memory_space<vmem>>, vector<64x256xbf16>
    %cst_176 = arith.constant dense<0.000000e+00> : vector<8x256xf32>
    %468 = tpu.matmul %462, %467, %cst_176 {dimension_numbers = #tpu.dot_dimension_numbers<[1], [0], [0], [1], [0, 0, 1, 1], [], []>} : vector<8x64xbf16>, vector<64x256xbf16>, vector<8x256xf32> -> vector<8x256xf32>
    %469 = arith.extf %466 : vector<8x256xbf16> to vector<8x256xf32>
    %470 = arith.addf %469, %468 : vector<8x256xf32>
    %471 = vector.extract_strided_slice %470 {offsets = [0, 0], sizes = [8, 192], strides = [1, 1]} : vector<8x256xf32> to vector<8x192xf32>
    %472 = arith.negf %471 : vector<8x192xf32>
    %473 = math.exp %472 : vector<8x192xf32>
    %cst_177 = arith.constant 1.000000e+00 : f32
    %474 = vector.broadcast %cst_177 : f32 to vector<8x192xf32>
    %475 = arith.addf %474, %473 : vector<8x192xf32>
    %476 = arith.divf %474, %475 : vector<8x192xf32>
    %477 = vector.extract_strided_slice %476 {offsets = [0, 0], sizes = [8, 64], strides = [1, 1]} : vector<8x192xf32> to vector<8x64xf32>
    %478 = vector.extract_strided_slice %476 {offsets = [0, 64], sizes = [8, 64], strides = [1, 1]} : vector<8x192xf32> to vector<8x64xf32>
    %479 = vector.extract_strided_slice %476 {offsets = [0, 128], sizes = [8, 64], strides = [1, 1]} : vector<8x192xf32> to vector<8x64xf32>
    %480 = vector.extract_strided_slice %470 {offsets = [0, 192], sizes = [8, 64], strides = [1, 1]} : vector<8x256xf32> to vector<8x64xf32>
    %481 = math.tanh %480 : vector<8x64xf32>
    %482 = arith.mulf %478, %463 : vector<8x64xf32>
    %483 = arith.mulf %477, %481 : vector<8x64xf32>
    %484 = arith.addf %482, %483 : vector<8x64xf32>
    %485 = math.tanh %484 : vector<8x64xf32>
    %486 = arith.mulf %479, %485 : vector<8x64xf32>
    %487 = arith.truncf %486 : vector<8x64xf32> to vector<8x64xbf16>
    %488 = vector.extract_strided_slice %487 {offsets = [0, 0], sizes = [8, 32], strides = [1, 1]} : vector<8x64xbf16> to vector<8x32xbf16>
    %489 = arith.index_cast %c0_i32_171 : i32 to index
    %c0_178 = arith.constant 0 : index
    %c0_179 = arith.constant 0 : index
    %490 = vector.load %arg27[%489, %c0_178, %c0_179] : memref<8x8x32xbf16, #tpu.memory_space<vmem>>, vector<1x8x32xbf16>
    %491 = vector.shape_cast %490 : vector<1x8x32xbf16> to vector<8x32xbf16>
    %492 = vector.shape_cast %488 : vector<8x32xbf16> to vector<1x8x32xbf16>
    tpu.vector_store %arg27[%489, %c0_178, %c0_179], %492 {strides = array<i32>} : memref<8x8x32xbf16, #tpu.memory_space<vmem>>, vector<1x8x32xbf16>,
    %493 = vector.extract_strided_slice %487 {offsets = [0, 32], sizes = [8, 32], strides = [1, 1]} : vector<8x64xbf16> to vector<8x32xbf16>
    %c7_i32_180 = arith.constant 7 : i32
    %494 = arith.subi %c7_i32_180, %c0_i32_171 : i32
    %495 = arith.index_cast %494 : i32 to index
    %c0_181 = arith.constant 0 : index
    %c0_182 = arith.constant 0 : index
    %496 = vector.load %arg28[%495, %c0_181, %c0_182] : memref<8x8x32xbf16, #tpu.memory_space<vmem>>, vector<1x8x32xbf16>
    %497 = vector.shape_cast %496 : vector<1x8x32xbf16> to vector<8x32xbf16>
    %498 = vector.shape_cast %493 : vector<8x32xbf16> to vector<1x8x32xbf16>
    tpu.vector_store %arg28[%495, %c0_181, %c0_182], %498 {strides = array<i32>} : memref<8x8x32xbf16, #tpu.memory_space<vmem>>, vector<1x8x32xbf16>,
    %c1_i32_183 = arith.constant 1 : i32
    %499 = arith.index_cast %c1_i32_183 : i32 to index
    %c0_184 = arith.constant 0 : index
    %c0_185 = arith.constant 0 : index
    %500 = vector.load %arg31[%499, %c0_184, %c0_185] : memref<8x8x256xbf16, #tpu.memory_space<vmem>>, vector<1x8x256xbf16>
    %501 = vector.shape_cast %500 : vector<1x8x256xbf16> to vector<8x256xbf16>
    %c0_186 = arith.constant 0 : index
    %c0_187 = arith.constant 0 : index
    %502 = vector.load %arg11[%c0_186, %c0_187] : memref<64x256xbf16, #tpu.memory_space<vmem>>, vector<64x256xbf16>
    %cst_188 = arith.constant dense<0.000000e+00> : vector<8x256xf32>
    %503 = tpu.matmul %487, %502, %cst_188 {dimension_numbers = #tpu.dot_dimension_numbers<[1], [0], [0], [1], [0, 0, 1, 1], [], []>} : vector<8x64xbf16>, vector<64x256xbf16>, vector<8x256xf32> -> vector<8x256xf32>
    %504 = arith.extf %501 : vector<8x256xbf16> to vector<8x256xf32>
    %505 = arith.addf %504, %503 : vector<8x256xf32>
    %506 = vector.extract_strided_slice %505 {offsets = [0, 0], sizes = [8, 192], strides = [1, 1]} : vector<8x256xf32> to vector<8x192xf32>
    %507 = arith.negf %506 : vector<8x192xf32>
    %508 = math.exp %507 : vector<8x192xf32>
    %cst_189 = arith.constant 1.000000e+00 : f32
    %509 = vector.broadcast %cst_189 : f32 to vector<8x192xf32>
    %510 = arith.addf %509, %508 : vector<8x192xf32>
    %511 = arith.divf %509, %510 : vector<8x192xf32>
    %512 = vector.extract_strided_slice %511 {offsets = [0, 0], sizes = [8, 64], strides = [1, 1]} : vector<8x192xf32> to vector<8x64xf32>
    %513 = vector.extract_strided_slice %511 {offsets = [0, 64], sizes = [8, 64], strides = [1, 1]} : vector<8x192xf32> to vector<8x64xf32>
    %514 = vector.extract_strided_slice %511 {offsets = [0, 128], sizes = [8, 64], strides = [1, 1]} : vector<8x192xf32> to vector<8x64xf32>
    %515 = vector.extract_strided_slice %505 {offsets = [0, 192], sizes = [8, 64], strides = [1, 1]} : vector<8x256xf32> to vector<8x64xf32>
    %516 = math.tanh %515 : vector<8x64xf32>
    %517 = arith.mulf %513, %484 : vector<8x64xf32>
    %518 = arith.mulf %512, %516 : vector<8x64xf32>
    %519 = arith.addf %517, %518 : vector<8x64xf32>
    %520 = math.tanh %519 : vector<8x64xf32>
    %521 = arith.mulf %514, %520 : vector<8x64xf32>
    %522 = arith.truncf %521 : vector<8x64xf32> to vector<8x64xbf16>
    %523 = vector.extract_strided_slice %522 {offsets = [0, 0], sizes = [8, 32], strides = [1, 1]} : vector<8x64xbf16> to vector<8x32xbf16>
    %524 = arith.index_cast %c1_i32_183 : i32 to index
    %c0_190 = arith.constant 0 : index
    %c0_191 = arith.constant 0 : index
    %525 = vector.load %arg27[%524, %c0_190, %c0_191] : memref<8x8x32xbf16, #tpu.memory_space<vmem>>, vector<1x8x32xbf16>
    %526 = vector.shape_cast %525 : vector<1x8x32xbf16> to vector<8x32xbf16>
    %527 = vector.shape_cast %523 : vector<8x32xbf16> to vector<1x8x32xbf16>
    tpu.vector_store %arg27[%524, %c0_190, %c0_191], %527 {strides = array<i32>} : memref<8x8x32xbf16, #tpu.memory_space<vmem>>, vector<1x8x32xbf16>,
    %528 = vector.extract_strided_slice %522 {offsets = [0, 32], sizes = [8, 32], strides = [1, 1]} : vector<8x64xbf16> to vector<8x32xbf16>
    %c7_i32_192 = arith.constant 7 : i32
    %529 = arith.subi %c7_i32_192, %c1_i32_183 : i32
    %530 = arith.index_cast %529 : i32 to index
    %c0_193 = arith.constant 0 : index
    %c0_194 = arith.constant 0 : index
    %531 = vector.load %arg28[%530, %c0_193, %c0_194] : memref<8x8x32xbf16, #tpu.memory_space<vmem>>, vector<1x8x32xbf16>
    %532 = vector.shape_cast %531 : vector<1x8x32xbf16> to vector<8x32xbf16>
    %533 = vector.shape_cast %528 : vector<8x32xbf16> to vector<1x8x32xbf16>
    tpu.vector_store %arg28[%530, %c0_193, %c0_194], %533 {strides = array<i32>} : memref<8x8x32xbf16, #tpu.memory_space<vmem>>, vector<1x8x32xbf16>,
    %c2_i32_195 = arith.constant 2 : i32
    %534 = arith.index_cast %c2_i32_195 : i32 to index
    %c0_196 = arith.constant 0 : index
    %c0_197 = arith.constant 0 : index
    %535 = vector.load %arg31[%534, %c0_196, %c0_197] : memref<8x8x256xbf16, #tpu.memory_space<vmem>>, vector<1x8x256xbf16>
    %536 = vector.shape_cast %535 : vector<1x8x256xbf16> to vector<8x256xbf16>
    %c0_198 = arith.constant 0 : index
    %c0_199 = arith.constant 0 : index
    %537 = vector.load %arg11[%c0_198, %c0_199] : memref<64x256xbf16, #tpu.memory_space<vmem>>, vector<64x256xbf16>
    %cst_200 = arith.constant dense<0.000000e+00> : vector<8x256xf32>
    %538 = tpu.matmul %522, %537, %cst_200 {dimension_numbers = #tpu.dot_dimension_numbers<[1], [0], [0], [1], [0, 0, 1, 1], [], []>} : vector<8x64xbf16>, vector<64x256xbf16>, vector<8x256xf32> -> vector<8x256xf32>
    %539 = arith.extf %536 : vector<8x256xbf16> to vector<8x256xf32>
    %540 = arith.addf %539, %538 : vector<8x256xf32>
    %541 = vector.extract_strided_slice %540 {offsets = [0, 0], sizes = [8, 192], strides = [1, 1]} : vector<8x256xf32> to vector<8x192xf32>
    %542 = arith.negf %541 : vector<8x192xf32>
    %543 = math.exp %542 : vector<8x192xf32>
    %cst_201 = arith.constant 1.000000e+00 : f32
    %544 = vector.broadcast %cst_201 : f32 to vector<8x192xf32>
    %545 = arith.addf %544, %543 : vector<8x192xf32>
    %546 = arith.divf %544, %545 : vector<8x192xf32>
    %547 = vector.extract_strided_slice %546 {offsets = [0, 0], sizes = [8, 64], strides = [1, 1]} : vector<8x192xf32> to vector<8x64xf32>
    %548 = vector.extract_strided_slice %546 {offsets = [0, 64], sizes = [8, 64], strides = [1, 1]} : vector<8x192xf32> to vector<8x64xf32>
    %549 = vector.extract_strided_slice %546 {offsets = [0, 128], sizes = [8, 64], strides = [1, 1]} : vector<8x192xf32> to vector<8x64xf32>
    %550 = vector.extract_strided_slice %540 {offsets = [0, 192], sizes = [8, 64], strides = [1, 1]} : vector<8x256xf32> to vector<8x64xf32>
    %551 = math.tanh %550 : vector<8x64xf32>
    %552 = arith.mulf %548, %519 : vector<8x64xf32>
    %553 = arith.mulf %547, %551 : vector<8x64xf32>
    %554 = arith.addf %552, %553 : vector<8x64xf32>
    %555 = math.tanh %554 : vector<8x64xf32>
    %556 = arith.mulf %549, %555 : vector<8x64xf32>
    %557 = arith.truncf %556 : vector<8x64xf32> to vector<8x64xbf16>
    %558 = vector.extract_strided_slice %557 {offsets = [0, 0], sizes = [8, 32], strides = [1, 1]} : vector<8x64xbf16> to vector<8x32xbf16>
    %559 = arith.index_cast %c2_i32_195 : i32 to index
    %c0_202 = arith.constant 0 : index
    %c0_203 = arith.constant 0 : index
    %560 = vector.load %arg27[%559, %c0_202, %c0_203] : memref<8x8x32xbf16, #tpu.memory_space<vmem>>, vector<1x8x32xbf16>
    %561 = vector.shape_cast %560 : vector<1x8x32xbf16> to vector<8x32xbf16>
    %562 = vector.shape_cast %558 : vector<8x32xbf16> to vector<1x8x32xbf16>
    tpu.vector_store %arg27[%559, %c0_202, %c0_203], %562 {strides = array<i32>} : memref<8x8x32xbf16, #tpu.memory_space<vmem>>, vector<1x8x32xbf16>,
    %563 = vector.extract_strided_slice %557 {offsets = [0, 32], sizes = [8, 32], strides = [1, 1]} : vector<8x64xbf16> to vector<8x32xbf16>
    %c7_i32_204 = arith.constant 7 : i32
    %564 = arith.subi %c7_i32_204, %c2_i32_195 : i32
    %565 = arith.index_cast %564 : i32 to index
    %c0_205 = arith.constant 0 : index
    %c0_206 = arith.constant 0 : index
    %566 = vector.load %arg28[%565, %c0_205, %c0_206] : memref<8x8x32xbf16, #tpu.memory_space<vmem>>, vector<1x8x32xbf16>
    %567 = vector.shape_cast %566 : vector<1x8x32xbf16> to vector<8x32xbf16>
    %568 = vector.shape_cast %563 : vector<8x32xbf16> to vector<1x8x32xbf16>
    tpu.vector_store %arg28[%565, %c0_205, %c0_206], %568 {strides = array<i32>} : memref<8x8x32xbf16, #tpu.memory_space<vmem>>, vector<1x8x32xbf16>,
    %c3_i32_207 = arith.constant 3 : i32
    %569 = arith.index_cast %c3_i32_207 : i32 to index
    %c0_208 = arith.constant 0 : index
    %c0_209 = arith.constant 0 : index
    %570 = vector.load %arg31[%569, %c0_208, %c0_209] : memref<8x8x256xbf16, #tpu.memory_space<vmem>>, vector<1x8x256xbf16>
    %571 = vector.shape_cast %570 : vector<1x8x256xbf16> to vector<8x256xbf16>
    %c0_210 = arith.constant 0 : index
    %c0_211 = arith.constant 0 : index
    %572 = vector.load %arg11[%c0_210, %c0_211] : memref<64x256xbf16, #tpu.memory_space<vmem>>, vector<64x256xbf16>
    %cst_212 = arith.constant dense<0.000000e+00> : vector<8x256xf32>
    %573 = tpu.matmul %557, %572, %cst_212 {dimension_numbers = #tpu.dot_dimension_numbers<[1], [0], [0], [1], [0, 0, 1, 1], [], []>} : vector<8x64xbf16>, vector<64x256xbf16>, vector<8x256xf32> -> vector<8x256xf32>
    %574 = arith.extf %571 : vector<8x256xbf16> to vector<8x256xf32>
    %575 = arith.addf %574, %573 : vector<8x256xf32>
    %576 = vector.extract_strided_slice %575 {offsets = [0, 0], sizes = [8, 192], strides = [1, 1]} : vector<8x256xf32> to vector<8x192xf32>
    %577 = arith.negf %576 : vector<8x192xf32>
    %578 = math.exp %577 : vector<8x192xf32>
    %cst_213 = arith.constant 1.000000e+00 : f32
    %579 = vector.broadcast %cst_213 : f32 to vector<8x192xf32>
    %580 = arith.addf %579, %578 : vector<8x192xf32>
    %581 = arith.divf %579, %580 : vector<8x192xf32>
    %582 = vector.extract_strided_slice %581 {offsets = [0, 0], sizes = [8, 64], strides = [1, 1]} : vector<8x192xf32> to vector<8x64xf32>
    %583 = vector.extract_strided_slice %581 {offsets = [0, 64], sizes = [8, 64], strides = [1, 1]} : vector<8x192xf32> to vector<8x64xf32>
    %584 = vector.extract_strided_slice %581 {offsets = [0, 128], sizes = [8, 64], strides = [1, 1]} : vector<8x192xf32> to vector<8x64xf32>
    %585 = vector.extract_strided_slice %575 {offsets = [0, 192], sizes = [8, 64], strides = [1, 1]} : vector<8x256xf32> to vector<8x64xf32>
    %586 = math.tanh %585 : vector<8x64xf32>
    %587 = arith.mulf %583, %554 : vector<8x64xf32>
    %588 = arith.mulf %582, %586 : vector<8x64xf32>
    %589 = arith.addf %587, %588 : vector<8x64xf32>
    %590 = math.tanh %589 : vector<8x64xf32>
    %591 = arith.mulf %584, %590 : vector<8x64xf32>
    %592 = arith.truncf %591 : vector<8x64xf32> to vector<8x64xbf16>
    %593 = vector.extract_strided_slice %592 {offsets = [0, 0], sizes = [8, 32], strides = [1, 1]} : vector<8x64xbf16> to vector<8x32xbf16>
    %594 = arith.index_cast %c3_i32_207 : i32 to index
    %c0_214 = arith.constant 0 : index
    %c0_215 = arith.constant 0 : index
    %595 = vector.load %arg27[%594, %c0_214, %c0_215] : memref<8x8x32xbf16, #tpu.memory_space<vmem>>, vector<1x8x32xbf16>
    %596 = vector.shape_cast %595 : vector<1x8x32xbf16> to vector<8x32xbf16>
    %597 = vector.shape_cast %593 : vector<8x32xbf16> to vector<1x8x32xbf16>
    tpu.vector_store %arg27[%594, %c0_214, %c0_215], %597 {strides = array<i32>} : memref<8x8x32xbf16, #tpu.memory_space<vmem>>, vector<1x8x32xbf16>,
    %598 = vector.extract_strided_slice %592 {offsets = [0, 32], sizes = [8, 32], strides = [1, 1]} : vector<8x64xbf16> to vector<8x32xbf16>
    %c7_i32_216 = arith.constant 7 : i32
    %599 = arith.subi %c7_i32_216, %c3_i32_207 : i32
    %600 = arith.index_cast %599 : i32 to index
    %c0_217 = arith.constant 0 : index
    %c0_218 = arith.constant 0 : index
    %601 = vector.load %arg28[%600, %c0_217, %c0_218] : memref<8x8x32xbf16, #tpu.memory_space<vmem>>, vector<1x8x32xbf16>
    %602 = vector.shape_cast %601 : vector<1x8x32xbf16> to vector<8x32xbf16>
    %603 = vector.shape_cast %598 : vector<8x32xbf16> to vector<1x8x32xbf16>
    tpu.vector_store %arg28[%600, %c0_217, %c0_218], %603 {strides = array<i32>} : memref<8x8x32xbf16, #tpu.memory_space<vmem>>, vector<1x8x32xbf16>,
    %c4_i32_219 = arith.constant 4 : i32
    %604 = arith.index_cast %c4_i32_219 : i32 to index
    %c0_220 = arith.constant 0 : index
    %c0_221 = arith.constant 0 : index
    %605 = vector.load %arg31[%604, %c0_220, %c0_221] : memref<8x8x256xbf16, #tpu.memory_space<vmem>>, vector<1x8x256xbf16>
    %606 = vector.shape_cast %605 : vector<1x8x256xbf16> to vector<8x256xbf16>
    %c0_222 = arith.constant 0 : index
    %c0_223 = arith.constant 0 : index
    %607 = vector.load %arg11[%c0_222, %c0_223] : memref<64x256xbf16, #tpu.memory_space<vmem>>, vector<64x256xbf16>
    %cst_224 = arith.constant dense<0.000000e+00> : vector<8x256xf32>
    %608 = tpu.matmul %592, %607, %cst_224 {dimension_numbers = #tpu.dot_dimension_numbers<[1], [0], [0], [1], [0, 0, 1, 1], [], []>} : vector<8x64xbf16>, vector<64x256xbf16>, vector<8x256xf32> -> vector<8x256xf32>
    %609 = arith.extf %606 : vector<8x256xbf16> to vector<8x256xf32>
    %610 = arith.addf %609, %608 : vector<8x256xf32>
    %611 = vector.extract_strided_slice %610 {offsets = [0, 0], sizes = [8, 192], strides = [1, 1]} : vector<8x256xf32> to vector<8x192xf32>
    %612 = arith.negf %611 : vector<8x192xf32>
    %613 = math.exp %612 : vector<8x192xf32>
    %cst_225 = arith.constant 1.000000e+00 : f32
    %614 = vector.broadcast %cst_225 : f32 to vector<8x192xf32>
    %615 = arith.addf %614, %613 : vector<8x192xf32>
    %616 = arith.divf %614, %615 : vector<8x192xf32>
    %617 = vector.extract_strided_slice %616 {offsets = [0, 0], sizes = [8, 64], strides = [1, 1]} : vector<8x192xf32> to vector<8x64xf32>
    %618 = vector.extract_strided_slice %616 {offsets = [0, 64], sizes = [8, 64], strides = [1, 1]} : vector<8x192xf32> to vector<8x64xf32>
    %619 = vector.extract_strided_slice %616 {offsets = [0, 128], sizes = [8, 64], strides = [1, 1]} : vector<8x192xf32> to vector<8x64xf32>
    %620 = vector.extract_strided_slice %610 {offsets = [0, 192], sizes = [8, 64], strides = [1, 1]} : vector<8x256xf32> to vector<8x64xf32>
    %621 = math.tanh %620 : vector<8x64xf32>
    %622 = arith.mulf %618, %589 : vector<8x64xf32>
    %623 = arith.mulf %617, %621 : vector<8x64xf32>
    %624 = arith.addf %622, %623 : vector<8x64xf32>
    %625 = math.tanh %624 : vector<8x64xf32>
    %626 = arith.mulf %619, %625 : vector<8x64xf32>
    %627 = arith.truncf %626 : vector<8x64xf32> to vector<8x64xbf16>
    %628 = vector.extract_strided_slice %627 {offsets = [0, 0], sizes = [8, 32], strides = [1, 1]} : vector<8x64xbf16> to vector<8x32xbf16>
    %629 = arith.index_cast %c4_i32_219 : i32 to index
    %c0_226 = arith.constant 0 : index
    %c0_227 = arith.constant 0 : index
    %630 = vector.load %arg27[%629, %c0_226, %c0_227] : memref<8x8x32xbf16, #tpu.memory_space<vmem>>, vector<1x8x32xbf16>
    %631 = vector.shape_cast %630 : vector<1x8x32xbf16> to vector<8x32xbf16>
    %632 = vector.shape_cast %628 : vector<8x32xbf16> to vector<1x8x32xbf16>
    tpu.vector_store %arg27[%629, %c0_226, %c0_227], %632 {strides = array<i32>} : memref<8x8x32xbf16, #tpu.memory_space<vmem>>, vector<1x8x32xbf16>,
    %633 = vector.extract_strided_slice %627 {offsets = [0, 32], sizes = [8, 32], strides = [1, 1]} : vector<8x64xbf16> to vector<8x32xbf16>
    %c7_i32_228 = arith.constant 7 : i32
    %634 = arith.subi %c7_i32_228, %c4_i32_219 : i32
    %635 = arith.index_cast %634 : i32 to index
    %c0_229 = arith.constant 0 : index
    %c0_230 = arith.constant 0 : index
    %636 = vector.load %arg28[%635, %c0_229, %c0_230] : memref<8x8x32xbf16, #tpu.memory_space<vmem>>, vector<1x8x32xbf16>
    %637 = vector.shape_cast %636 : vector<1x8x32xbf16> to vector<8x32xbf16>
    %638 = vector.shape_cast %633 : vector<8x32xbf16> to vector<1x8x32xbf16>
    tpu.vector_store %arg28[%635, %c0_229, %c0_230], %638 {strides = array<i32>} : memref<8x8x32xbf16, #tpu.memory_space<vmem>>, vector<1x8x32xbf16>,
    %c5_i32_231 = arith.constant 5 : i32
    %639 = arith.index_cast %c5_i32_231 : i32 to index
    %c0_232 = arith.constant 0 : index
    %c0_233 = arith.constant 0 : index
    %640 = vector.load %arg31[%639, %c0_232, %c0_233] : memref<8x8x256xbf16, #tpu.memory_space<vmem>>, vector<1x8x256xbf16>
    %641 = vector.shape_cast %640 : vector<1x8x256xbf16> to vector<8x256xbf16>
    %c0_234 = arith.constant 0 : index
    %c0_235 = arith.constant 0 : index
    %642 = vector.load %arg11[%c0_234, %c0_235] : memref<64x256xbf16, #tpu.memory_space<vmem>>, vector<64x256xbf16>
    %cst_236 = arith.constant dense<0.000000e+00> : vector<8x256xf32>
    %643 = tpu.matmul %627, %642, %cst_236 {dimension_numbers = #tpu.dot_dimension_numbers<[1], [0], [0], [1], [0, 0, 1, 1], [], []>} : vector<8x64xbf16>, vector<64x256xbf16>, vector<8x256xf32> -> vector<8x256xf32>
    %644 = arith.extf %641 : vector<8x256xbf16> to vector<8x256xf32>
    %645 = arith.addf %644, %643 : vector<8x256xf32>
    %646 = vector.extract_strided_slice %645 {offsets = [0, 0], sizes = [8, 192], strides = [1, 1]} : vector<8x256xf32> to vector<8x192xf32>
    %647 = arith.negf %646 : vector<8x192xf32>
    %648 = math.exp %647 : vector<8x192xf32>
    %cst_237 = arith.constant 1.000000e+00 : f32
    %649 = vector.broadcast %cst_237 : f32 to vector<8x192xf32>
    %650 = arith.addf %649, %648 : vector<8x192xf32>
    %651 = arith.divf %649, %650 : vector<8x192xf32>
    %652 = vector.extract_strided_slice %651 {offsets = [0, 0], sizes = [8, 64], strides = [1, 1]} : vector<8x192xf32> to vector<8x64xf32>
    %653 = vector.extract_strided_slice %651 {offsets = [0, 64], sizes = [8, 64], strides = [1, 1]} : vector<8x192xf32> to vector<8x64xf32>
    %654 = vector.extract_strided_slice %651 {offsets = [0, 128], sizes = [8, 64], strides = [1, 1]} : vector<8x192xf32> to vector<8x64xf32>
    %655 = vector.extract_strided_slice %645 {offsets = [0, 192], sizes = [8, 64], strides = [1, 1]} : vector<8x256xf32> to vector<8x64xf32>
    %656 = math.tanh %655 : vector<8x64xf32>
    %657 = arith.mulf %653, %624 : vector<8x64xf32>
    %658 = arith.mulf %652, %656 : vector<8x64xf32>
    %659 = arith.addf %657, %658 : vector<8x64xf32>
    %660 = math.tanh %659 : vector<8x64xf32>
    %661 = arith.mulf %654, %660 : vector<8x64xf32>
    %662 = arith.truncf %661 : vector<8x64xf32> to vector<8x64xbf16>
    %663 = vector.extract_strided_slice %662 {offsets = [0, 0], sizes = [8, 32], strides = [1, 1]} : vector<8x64xbf16> to vector<8x32xbf16>
    %664 = arith.index_cast %c5_i32_231 : i32 to index
    %c0_238 = arith.constant 0 : index
    %c0_239 = arith.constant 0 : index
    %665 = vector.load %arg27[%664, %c0_238, %c0_239] : memref<8x8x32xbf16, #tpu.memory_space<vmem>>, vector<1x8x32xbf16>
    %666 = vector.shape_cast %665 : vector<1x8x32xbf16> to vector<8x32xbf16>
    %667 = vector.shape_cast %663 : vector<8x32xbf16> to vector<1x8x32xbf16>
    tpu.vector_store %arg27[%664, %c0_238, %c0_239], %667 {strides = array<i32>} : memref<8x8x32xbf16, #tpu.memory_space<vmem>>, vector<1x8x32xbf16>,
    %668 = vector.extract_strided_slice %662 {offsets = [0, 32], sizes = [8, 32], strides = [1, 1]} : vector<8x64xbf16> to vector<8x32xbf16>
    %c7_i32_240 = arith.constant 7 : i32
    %669 = arith.subi %c7_i32_240, %c5_i32_231 : i32
    %670 = arith.index_cast %669 : i32 to index
    %c0_241 = arith.constant 0 : index
    %c0_242 = arith.constant 0 : index
    %671 = vector.load %arg28[%670, %c0_241, %c0_242] : memref<8x8x32xbf16, #tpu.memory_space<vmem>>, vector<1x8x32xbf16>
    %672 = vector.shape_cast %671 : vector<1x8x32xbf16> to vector<8x32xbf16>
    %673 = vector.shape_cast %668 : vector<8x32xbf16> to vector<1x8x32xbf16>
    tpu.vector_store %arg28[%670, %c0_241, %c0_242], %673 {strides = array<i32>} : memref<8x8x32xbf16, #tpu.memory_space<vmem>>, vector<1x8x32xbf16>,
    %c6_i32_243 = arith.constant 6 : i32
    %674 = arith.index_cast %c6_i32_243 : i32 to index
    %c0_244 = arith.constant 0 : index
    %c0_245 = arith.constant 0 : index
    %675 = vector.load %arg31[%674, %c0_244, %c0_245] : memref<8x8x256xbf16, #tpu.memory_space<vmem>>, vector<1x8x256xbf16>
    %676 = vector.shape_cast %675 : vector<1x8x256xbf16> to vector<8x256xbf16>
    %c0_246 = arith.constant 0 : index
    %c0_247 = arith.constant 0 : index
    %677 = vector.load %arg11[%c0_246, %c0_247] : memref<64x256xbf16, #tpu.memory_space<vmem>>, vector<64x256xbf16>
    %cst_248 = arith.constant dense<0.000000e+00> : vector<8x256xf32>
    %678 = tpu.matmul %662, %677, %cst_248 {dimension_numbers = #tpu.dot_dimension_numbers<[1], [0], [0], [1], [0, 0, 1, 1], [], []>} : vector<8x64xbf16>, vector<64x256xbf16>, vector<8x256xf32> -> vector<8x256xf32>
    %679 = arith.extf %676 : vector<8x256xbf16> to vector<8x256xf32>
    %680 = arith.addf %679, %678 : vector<8x256xf32>
    %681 = vector.extract_strided_slice %680 {offsets = [0, 0], sizes = [8, 192], strides = [1, 1]} : vector<8x256xf32> to vector<8x192xf32>
    %682 = arith.negf %681 : vector<8x192xf32>
    %683 = math.exp %682 : vector<8x192xf32>
    %cst_249 = arith.constant 1.000000e+00 : f32
    %684 = vector.broadcast %cst_249 : f32 to vector<8x192xf32>
    %685 = arith.addf %684, %683 : vector<8x192xf32>
    %686 = arith.divf %684, %685 : vector<8x192xf32>
    %687 = vector.extract_strided_slice %686 {offsets = [0, 0], sizes = [8, 64], strides = [1, 1]} : vector<8x192xf32> to vector<8x64xf32>
    %688 = vector.extract_strided_slice %686 {offsets = [0, 64], sizes = [8, 64], strides = [1, 1]} : vector<8x192xf32> to vector<8x64xf32>
    %689 = vector.extract_strided_slice %686 {offsets = [0, 128], sizes = [8, 64], strides = [1, 1]} : vector<8x192xf32> to vector<8x64xf32>
    %690 = vector.extract_strided_slice %680 {offsets = [0, 192], sizes = [8, 64], strides = [1, 1]} : vector<8x256xf32> to vector<8x64xf32>
    %691 = math.tanh %690 : vector<8x64xf32>
    %692 = arith.mulf %688, %659 : vector<8x64xf32>
    %693 = arith.mulf %687, %691 : vector<8x64xf32>
    %694 = arith.addf %692, %693 : vector<8x64xf32>
    %695 = math.tanh %694 : vector<8x64xf32>
    %696 = arith.mulf %689, %695 : vector<8x64xf32>
    %697 = arith.truncf %696 : vector<8x64xf32> to vector<8x64xbf16>
    %698 = vector.extract_strided_slice %697 {offsets = [0, 0], sizes = [8, 32], strides = [1, 1]} : vector<8x64xbf16> to vector<8x32xbf16>
    %699 = arith.index_cast %c6_i32_243 : i32 to index
    %c0_250 = arith.constant 0 : index
    %c0_251 = arith.constant 0 : index
    %700 = vector.load %arg27[%699, %c0_250, %c0_251] : memref<8x8x32xbf16, #tpu.memory_space<vmem>>, vector<1x8x32xbf16>
    %701 = vector.shape_cast %700 : vector<1x8x32xbf16> to vector<8x32xbf16>
    %702 = vector.shape_cast %698 : vector<8x32xbf16> to vector<1x8x32xbf16>
    tpu.vector_store %arg27[%699, %c0_250, %c0_251], %702 {strides = array<i32>} : memref<8x8x32xbf16, #tpu.memory_space<vmem>>, vector<1x8x32xbf16>,
    %703 = vector.extract_strided_slice %697 {offsets = [0, 32], sizes = [8, 32], strides = [1, 1]} : vector<8x64xbf16> to vector<8x32xbf16>
    %c7_i32_252 = arith.constant 7 : i32
    %704 = arith.subi %c7_i32_252, %c6_i32_243 : i32
    %705 = arith.index_cast %704 : i32 to index
    %c0_253 = arith.constant 0 : index
    %c0_254 = arith.constant 0 : index
    %706 = vector.load %arg28[%705, %c0_253, %c0_254] : memref<8x8x32xbf16, #tpu.memory_space<vmem>>, vector<1x8x32xbf16>
    %707 = vector.shape_cast %706 : vector<1x8x32xbf16> to vector<8x32xbf16>
    %708 = vector.shape_cast %703 : vector<8x32xbf16> to vector<1x8x32xbf16>
    tpu.vector_store %arg28[%705, %c0_253, %c0_254], %708 {strides = array<i32>} : memref<8x8x32xbf16, #tpu.memory_space<vmem>>, vector<1x8x32xbf16>,
    %c7_i32_255 = arith.constant 7 : i32
    %709 = arith.index_cast %c7_i32_255 : i32 to index
    %c0_256 = arith.constant 0 : index
    %c0_257 = arith.constant 0 : index
    %710 = vector.load %arg31[%709, %c0_256, %c0_257] : memref<8x8x256xbf16, #tpu.memory_space<vmem>>, vector<1x8x256xbf16>
    %711 = vector.shape_cast %710 : vector<1x8x256xbf16> to vector<8x256xbf16>
    %c0_258 = arith.constant 0 : index
    %c0_259 = arith.constant 0 : index
    %712 = vector.load %arg11[%c0_258, %c0_259] : memref<64x256xbf16, #tpu.memory_space<vmem>>, vector<64x256xbf16>
    %cst_260 = arith.constant dense<0.000000e+00> : vector<8x256xf32>
    %713 = tpu.matmul %697, %712, %cst_260 {dimension_numbers = #tpu.dot_dimension_numbers<[1], [0], [0], [1], [0, 0, 1, 1], [], []>} : vector<8x64xbf16>, vector<64x256xbf16>, vector<8x256xf32> -> vector<8x256xf32>
    %714 = arith.extf %711 : vector<8x256xbf16> to vector<8x256xf32>
    %715 = arith.addf %714, %713 : vector<8x256xf32>
    %716 = vector.extract_strided_slice %715 {offsets = [0, 0], sizes = [8, 192], strides = [1, 1]} : vector<8x256xf32> to vector<8x192xf32>
    %717 = arith.negf %716 : vector<8x192xf32>
    %718 = math.exp %717 : vector<8x192xf32>
    %cst_261 = arith.constant 1.000000e+00 : f32
    %719 = vector.broadcast %cst_261 : f32 to vector<8x192xf32>
    %720 = arith.addf %719, %718 : vector<8x192xf32>
    %721 = arith.divf %719, %720 : vector<8x192xf32>
    %722 = vector.extract_strided_slice %721 {offsets = [0, 0], sizes = [8, 64], strides = [1, 1]} : vector<8x192xf32> to vector<8x64xf32>
    %723 = vector.extract_strided_slice %721 {offsets = [0, 64], sizes = [8, 64], strides = [1, 1]} : vector<8x192xf32> to vector<8x64xf32>
    %724 = vector.extract_strided_slice %721 {offsets = [0, 128], sizes = [8, 64], strides = [1, 1]} : vector<8x192xf32> to vector<8x64xf32>
    %725 = vector.extract_strided_slice %715 {offsets = [0, 192], sizes = [8, 64], strides = [1, 1]} : vector<8x256xf32> to vector<8x64xf32>
    %726 = math.tanh %725 : vector<8x64xf32>
    %727 = arith.mulf %723, %694 : vector<8x64xf32>
    %728 = arith.mulf %722, %726 : vector<8x64xf32>
    %729 = arith.addf %727, %728 : vector<8x64xf32>
    %730 = math.tanh %729 : vector<8x64xf32>
    %731 = arith.mulf %724, %730 : vector<8x64xf32>
    %732 = arith.truncf %731 : vector<8x64xf32> to vector<8x64xbf16>
    %733 = vector.extract_strided_slice %732 {offsets = [0, 0], sizes = [8, 32], strides = [1, 1]} : vector<8x64xbf16> to vector<8x32xbf16>
    %734 = arith.index_cast %c7_i32_255 : i32 to index
    %c0_262 = arith.constant 0 : index
    %c0_263 = arith.constant 0 : index
    %735 = vector.load %arg27[%734, %c0_262, %c0_263] : memref<8x8x32xbf16, #tpu.memory_space<vmem>>, vector<1x8x32xbf16>
    %736 = vector.shape_cast %735 : vector<1x8x32xbf16> to vector<8x32xbf16>
    %737 = vector.shape_cast %733 : vector<8x32xbf16> to vector<1x8x32xbf16>
    tpu.vector_store %arg27[%734, %c0_262, %c0_263], %737 {strides = array<i32>} : memref<8x8x32xbf16, #tpu.memory_space<vmem>>, vector<1x8x32xbf16>,
    %738 = vector.extract_strided_slice %732 {offsets = [0, 32], sizes = [8, 32], strides = [1, 1]} : vector<8x64xbf16> to vector<8x32xbf16>
    %c7_i32_264 = arith.constant 7 : i32
    %739 = arith.subi %c7_i32_264, %c7_i32_255 : i32
    %740 = arith.index_cast %739 : i32 to index
    %c0_265 = arith.constant 0 : index
    %c0_266 = arith.constant 0 : index
    %741 = vector.load %arg28[%740, %c0_265, %c0_266] : memref<8x8x32xbf16, #tpu.memory_space<vmem>>, vector<1x8x32xbf16>
    %742 = vector.shape_cast %741 : vector<1x8x32xbf16> to vector<8x32xbf16>
    %743 = vector.shape_cast %738 : vector<8x32xbf16> to vector<1x8x32xbf16>
    tpu.vector_store %arg28[%740, %c0_265, %c0_266], %743 {strides = array<i32>} : memref<8x8x32xbf16, #tpu.memory_space<vmem>>, vector<1x8x32xbf16>,
    %c8_i32_267 = arith.constant 8 : i32
    %c0_268 = arith.constant 0 : index
    %c0_269 = arith.constant 0 : index
    %c0_270 = arith.constant 0 : index
    %744 = vector.load %arg25[%c0_268, %c0_269, %c0_270] : memref<8x8x32xbf16, #tpu.memory_space<vmem>>, vector<8x8x32xbf16>
    %745 = vector.shape_cast %744 : vector<8x8x32xbf16> to vector<64x32xbf16>
    %c0_271 = arith.constant 0 : index
    %c0_272 = arith.constant 0 : index
    %746 = vector.load %arg12[%c0_271, %c0_272] : memref<32x256xbf16, #tpu.memory_space<vmem>>, vector<32x256xbf16>
    %cst_273 = arith.constant dense<0.000000e+00> : vector<64x256xf32>
    %747 = tpu.matmul %745, %746, %cst_273 {dimension_numbers = #tpu.dot_dimension_numbers<[1], [0], [0], [1], [0, 0, 1, 1], [], []>} : vector<64x32xbf16>, vector<32x256xbf16>, vector<64x256xf32> -> vector<64x256xf32>
    %c0_274 = arith.constant 0 : index
    %c0_275 = arith.constant 0 : index
    %c0_276 = arith.constant 0 : index
    %748 = vector.load %arg25[%c0_274, %c0_275, %c0_276] : memref<8x8x32xbf16, #tpu.memory_space<vmem>>, vector<8x8x32xbf16>
    %749 = vector.shape_cast %748 : vector<8x8x32xbf16> to vector<64x32xbf16>
    %c0_277 = arith.constant 0 : index
    %c0_278 = arith.constant 0 : index
    %750 = vector.load %arg16[%c0_277, %c0_278] : memref<32x256xbf16, #tpu.memory_space<vmem>>, vector<32x256xbf16>
    %cst_279 = arith.constant dense<0.000000e+00> : vector<64x256xf32>
    %751 = tpu.matmul %749, %750, %cst_279 {dimension_numbers = #tpu.dot_dimension_numbers<[1], [0], [0], [1], [0, 0, 1, 1], [], []>} : vector<64x32xbf16>, vector<32x256xbf16>, vector<64x256xf32> -> vector<64x256xf32>
    %c0_280 = arith.constant 0 : index
    %c0_281 = arith.constant 0 : index
    %c0_282 = arith.constant 0 : index
    %752 = vector.load %arg26[%c0_280, %c0_281, %c0_282] : memref<8x8x32xbf16, #tpu.memory_space<vmem>>, vector<8x8x32xbf16>
    %753 = vector.shape_cast %752 : vector<8x8x32xbf16> to vector<64x32xbf16>
    %c0_283 = arith.constant 0 : index
    %c0_284 = arith.constant 0 : index
    %754 = vector.load %arg13[%c0_283, %c0_284] : memref<32x256xbf16, #tpu.memory_space<vmem>>, vector<32x256xbf16>
    %cst_285 = arith.constant dense<0.000000e+00> : vector<64x256xf32>
    %755 = tpu.matmul %753, %754, %cst_285 {dimension_numbers = #tpu.dot_dimension_numbers<[1], [0], [0], [1], [0, 0, 1, 1], [], []>} : vector<64x32xbf16>, vector<32x256xbf16>, vector<64x256xf32> -> vector<64x256xf32>
    %756 = arith.addf %747, %755 : vector<64x256xf32>
    %c0_286 = arith.constant 0 : index
    %c0_287 = arith.constant 0 : index
    %c0_288 = arith.constant 0 : index
    %757 = vector.load %arg26[%c0_286, %c0_287, %c0_288] : memref<8x8x32xbf16, #tpu.memory_space<vmem>>, vector<8x8x32xbf16>
    %758 = vector.shape_cast %757 : vector<8x8x32xbf16> to vector<64x32xbf16>
    %c0_289 = arith.constant 0 : index
    %c0_290 = arith.constant 0 : index
    %759 = vector.load %arg17[%c0_289, %c0_290] : memref<32x256xbf16, #tpu.memory_space<vmem>>, vector<32x256xbf16>
    %cst_291 = arith.constant dense<0.000000e+00> : vector<64x256xf32>
    %760 = tpu.matmul %758, %759, %cst_291 {dimension_numbers = #tpu.dot_dimension_numbers<[1], [0], [0], [1], [0, 0, 1, 1], [], []>} : vector<64x32xbf16>, vector<32x256xbf16>, vector<64x256xf32> -> vector<64x256xf32>
    %761 = arith.addf %751, %760 : vector<64x256xf32>
    %c0_292 = arith.constant 0 : index
    %c0_293 = arith.constant 0 : index
    %c0_294 = arith.constant 0 : index
    %762 = vector.load %arg27[%c0_292, %c0_293, %c0_294] : memref<8x8x32xbf16, #tpu.memory_space<vmem>>, vector<8x8x32xbf16>
    %763 = vector.shape_cast %762 : vector<8x8x32xbf16> to vector<64x32xbf16>
    %c0_295 = arith.constant 0 : index
    %c0_296 = arith.constant 0 : index
    %764 = vector.load %arg14[%c0_295, %c0_296] : memref<32x256xbf16, #tpu.memory_space<vmem>>, vector<32x256xbf16>
    %cst_297 = arith.constant dense<0.000000e+00> : vector<64x256xf32>
    %765 = tpu.matmul %763, %764, %cst_297 {dimension_numbers = #tpu.dot_dimension_numbers<[1], [0], [0], [1], [0, 0, 1, 1], [], []>} : vector<64x32xbf16>, vector<32x256xbf16>, vector<64x256xf32> -> vector<64x256xf32>
    %766 = arith.addf %756, %765 : vector<64x256xf32>
    %c0_298 = arith.constant 0 : index
    %c0_299 = arith.constant 0 : index
    %c0_300 = arith.constant 0 : index
    %767 = vector.load %arg27[%c0_298, %c0_299, %c0_300] : memref<8x8x32xbf16, #tpu.memory_space<vmem>>, vector<8x8x32xbf16>
    %768 = vector.shape_cast %767 : vector<8x8x32xbf16> to vector<64x32xbf16>
    %c0_301 = arith.constant 0 : index
    %c0_302 = arith.constant 0 : index
    %769 = vector.load %arg18[%c0_301, %c0_302] : memref<32x256xbf16, #tpu.memory_space<vmem>>, vector<32x256xbf16>
    %cst_303 = arith.constant dense<0.000000e+00> : vector<64x256xf32>
    %770 = tpu.matmul %768, %769, %cst_303 {dimension_numbers = #tpu.dot_dimension_numbers<[1], [0], [0], [1], [0, 0, 1, 1], [], []>} : vector<64x32xbf16>, vector<32x256xbf16>, vector<64x256xf32> -> vector<64x256xf32>
    %771 = arith.addf %761, %770 : vector<64x256xf32>
    %c0_304 = arith.constant 0 : index
    %c0_305 = arith.constant 0 : index
    %c0_306 = arith.constant 0 : index
    %772 = vector.load %arg28[%c0_304, %c0_305, %c0_306] : memref<8x8x32xbf16, #tpu.memory_space<vmem>>, vector<8x8x32xbf16>
    %773 = vector.shape_cast %772 : vector<8x8x32xbf16> to vector<64x32xbf16>
    %c0_307 = arith.constant 0 : index
    %c0_308 = arith.constant 0 : index
    %774 = vector.load %arg15[%c0_307, %c0_308] : memref<32x256xbf16, #tpu.memory_space<vmem>>, vector<32x256xbf16>
    %cst_309 = arith.constant dense<0.000000e+00> : vector<64x256xf32>
    %775 = tpu.matmul %773, %774, %cst_309 {dimension_numbers = #tpu.dot_dimension_numbers<[1], [0], [0], [1], [0, 0, 1, 1], [], []>} : vector<64x32xbf16>, vector<32x256xbf16>, vector<64x256xf32> -> vector<64x256xf32>
    %776 = arith.addf %766, %775 : vector<64x256xf32>
    %c0_310 = arith.constant 0 : index
    %c0_311 = arith.constant 0 : index
    %c0_312 = arith.constant 0 : index
    %777 = vector.load %arg28[%c0_310, %c0_311, %c0_312] : memref<8x8x32xbf16, #tpu.memory_space<vmem>>, vector<8x8x32xbf16>
    %778 = vector.shape_cast %777 : vector<8x8x32xbf16> to vector<64x32xbf16>
    %c0_313 = arith.constant 0 : index
    %c0_314 = arith.constant 0 : index
    %779 = vector.load %arg19[%c0_313, %c0_314] : memref<32x256xbf16, #tpu.memory_space<vmem>>, vector<32x256xbf16>
    %cst_315 = arith.constant dense<0.000000e+00> : vector<64x256xf32>
    %780 = tpu.matmul %778, %779, %cst_315 {dimension_numbers = #tpu.dot_dimension_numbers<[1], [0], [0], [1], [0, 0, 1, 1], [], []>} : vector<64x32xbf16>, vector<32x256xbf16>, vector<64x256xf32> -> vector<64x256xf32>
    %781 = arith.addf %771, %780 : vector<64x256xf32>
    %c0_316 = arith.constant 0 : index
    %c0_317 = arith.constant 0 : index
    %782 = vector.load %arg20[%c0_316, %c0_317] : memref<1x256xf32, #tpu.memory_space<vmem>>, vector<1x256xf32>
    %783 = vector.broadcast %782 : vector<1x256xf32> to vector<64x256xf32>
    %784 = arith.addf %776, %783 : vector<64x256xf32>
    %785 = vector.shape_cast %784 : vector<64x256xf32> to vector<8x8x256xf32>
    %786 = vector.shape_cast %781 : vector<64x256xf32> to vector<8x8x256xf32>
    %787 = vector.extract_strided_slice %785 {offsets = [0, 0, 0], sizes = [1, 8, 256], strides = [1, 1, 1]} : vector<8x8x256xf32> to vector<1x8x256xf32>
    %788 = vector.shape_cast %787 : vector<1x8x256xf32> to vector<8x256xf32>
    %789 = vector.extract_strided_slice %786 {offsets = [7, 0, 0], sizes = [1, 8, 256], strides = [1, 1, 1]} : vector<8x8x256xf32> to vector<1x8x256xf32>
    %790 = vector.shape_cast %789 : vector<1x8x256xf32> to vector<8x256xf32>
    %791 = arith.addf %788, %790 : vector<8x256xf32>
    %792 = arith.truncf %791 : vector<8x256xf32> to vector<8x256xbf16>
    %c0_318 = arith.constant 0 : index
    %c0_319 = arith.constant 0 : index
    %c0_320 = arith.constant 0 : index
    %793 = vector.load %arg31[%c0_318, %c0_319, %c0_320] : memref<8x8x256xbf16, #tpu.memory_space<vmem>>, vector<1x8x256xbf16>
    %794 = vector.shape_cast %793 : vector<1x8x256xbf16> to vector<8x256xbf16>
    %795 = vector.shape_cast %792 : vector<8x256xbf16> to vector<1x8x256xbf16>
    tpu.vector_store %arg31[%c0_318, %c0_319, %c0_320], %795 {strides = array<i32>} : memref<8x8x256xbf16, #tpu.memory_space<vmem>>, vector<1x8x256xbf16>,
    %796 = vector.extract_strided_slice %785 {offsets = [1, 0, 0], sizes = [1, 8, 256], strides = [1, 1, 1]} : vector<8x8x256xf32> to vector<1x8x256xf32>
    %797 = vector.shape_cast %796 : vector<1x8x256xf32> to vector<8x256xf32>
    %798 = vector.extract_strided_slice %786 {offsets = [6, 0, 0], sizes = [1, 8, 256], strides = [1, 1, 1]} : vector<8x8x256xf32> to vector<1x8x256xf32>
    %799 = vector.shape_cast %798 : vector<1x8x256xf32> to vector<8x256xf32>
    %800 = arith.addf %797, %799 : vector<8x256xf32>
    %801 = arith.truncf %800 : vector<8x256xf32> to vector<8x256xbf16>
    %c1_321 = arith.constant 1 : index
    %c0_322 = arith.constant 0 : index
    %c0_323 = arith.constant 0 : index
    %802 = vector.load %arg31[%c1_321, %c0_322, %c0_323] : memref<8x8x256xbf16, #tpu.memory_space<vmem>>, vector<1x8x256xbf16>
    %803 = vector.shape_cast %802 : vector<1x8x256xbf16> to vector<8x256xbf16>
    %804 = vector.shape_cast %801 : vector<8x256xbf16> to vector<1x8x256xbf16>
    tpu.vector_store %arg31[%c1_321, %c0_322, %c0_323], %804 {strides = array<i32>} : memref<8x8x256xbf16, #tpu.memory_space<vmem>>, vector<1x8x256xbf16>,
    %805 = vector.extract_strided_slice %785 {offsets = [2, 0, 0], sizes = [1, 8, 256], strides = [1, 1, 1]} : vector<8x8x256xf32> to vector<1x8x256xf32>
    %806 = vector.shape_cast %805 : vector<1x8x256xf32> to vector<8x256xf32>
    %807 = vector.extract_strided_slice %786 {offsets = [5, 0, 0], sizes = [1, 8, 256], strides = [1, 1, 1]} : vector<8x8x256xf32> to vector<1x8x256xf32>
    %808 = vector.shape_cast %807 : vector<1x8x256xf32> to vector<8x256xf32>
    %809 = arith.addf %806, %808 : vector<8x256xf32>
    %810 = arith.truncf %809 : vector<8x256xf32> to vector<8x256xbf16>
    %c2_324 = arith.constant 2 : index
    %c0_325 = arith.constant 0 : index
    %c0_326 = arith.constant 0 : index
    %811 = vector.load %arg31[%c2_324, %c0_325, %c0_326] : memref<8x8x256xbf16, #tpu.memory_space<vmem>>, vector<1x8x256xbf16>
    %812 = vector.shape_cast %811 : vector<1x8x256xbf16> to vector<8x256xbf16>
    %813 = vector.shape_cast %810 : vector<8x256xbf16> to vector<1x8x256xbf16>
    tpu.vector_store %arg31[%c2_324, %c0_325, %c0_326], %813 {strides = array<i32>} : memref<8x8x256xbf16, #tpu.memory_space<vmem>>, vector<1x8x256xbf16>,
    %814 = vector.extract_strided_slice %785 {offsets = [3, 0, 0], sizes = [1, 8, 256], strides = [1, 1, 1]} : vector<8x8x256xf32> to vector<1x8x256xf32>
    %815 = vector.shape_cast %814 : vector<1x8x256xf32> to vector<8x256xf32>
    %816 = vector.extract_strided_slice %786 {offsets = [4, 0, 0], sizes = [1, 8, 256], strides = [1, 1, 1]} : vector<8x8x256xf32> to vector<1x8x256xf32>
    %817 = vector.shape_cast %816 : vector<1x8x256xf32> to vector<8x256xf32>
    %818 = arith.addf %815, %817 : vector<8x256xf32>
    %819 = arith.truncf %818 : vector<8x256xf32> to vector<8x256xbf16>
    %c3_327 = arith.constant 3 : index
    %c0_328 = arith.constant 0 : index
    %c0_329 = arith.constant 0 : index
    %820 = vector.load %arg31[%c3_327, %c0_328, %c0_329] : memref<8x8x256xbf16, #tpu.memory_space<vmem>>, vector<1x8x256xbf16>
    %821 = vector.shape_cast %820 : vector<1x8x256xbf16> to vector<8x256xbf16>
    %822 = vector.shape_cast %819 : vector<8x256xbf16> to vector<1x8x256xbf16>
    tpu.vector_store %arg31[%c3_327, %c0_328, %c0_329], %822 {strides = array<i32>} : memref<8x8x256xbf16, #tpu.memory_space<vmem>>, vector<1x8x256xbf16>,
    %823 = vector.extract_strided_slice %785 {offsets = [4, 0, 0], sizes = [1, 8, 256], strides = [1, 1, 1]} : vector<8x8x256xf32> to vector<1x8x256xf32>
    %824 = vector.shape_cast %823 : vector<1x8x256xf32> to vector<8x256xf32>
    %825 = vector.extract_strided_slice %786 {offsets = [3, 0, 0], sizes = [1, 8, 256], strides = [1, 1, 1]} : vector<8x8x256xf32> to vector<1x8x256xf32>
    %826 = vector.shape_cast %825 : vector<1x8x256xf32> to vector<8x256xf32>
    %827 = arith.addf %824, %826 : vector<8x256xf32>
    %828 = arith.truncf %827 : vector<8x256xf32> to vector<8x256xbf16>
    %c4_330 = arith.constant 4 : index
    %c0_331 = arith.constant 0 : index
    %c0_332 = arith.constant 0 : index
    %829 = vector.load %arg31[%c4_330, %c0_331, %c0_332] : memref<8x8x256xbf16, #tpu.memory_space<vmem>>, vector<1x8x256xbf16>
    %830 = vector.shape_cast %829 : vector<1x8x256xbf16> to vector<8x256xbf16>
    %831 = vector.shape_cast %828 : vector<8x256xbf16> to vector<1x8x256xbf16>
    tpu.vector_store %arg31[%c4_330, %c0_331, %c0_332], %831 {strides = array<i32>} : memref<8x8x256xbf16, #tpu.memory_space<vmem>>, vector<1x8x256xbf16>,
    %832 = vector.extract_strided_slice %785 {offsets = [5, 0, 0], sizes = [1, 8, 256], strides = [1, 1, 1]} : vector<8x8x256xf32> to vector<1x8x256xf32>
    %833 = vector.shape_cast %832 : vector<1x8x256xf32> to vector<8x256xf32>
    %834 = vector.extract_strided_slice %786 {offsets = [2, 0, 0], sizes = [1, 8, 256], strides = [1, 1, 1]} : vector<8x8x256xf32> to vector<1x8x256xf32>
    %835 = vector.shape_cast %834 : vector<1x8x256xf32> to vector<8x256xf32>
    %836 = arith.addf %833, %835 : vector<8x256xf32>
    %837 = arith.truncf %836 : vector<8x256xf32> to vector<8x256xbf16>
    %c5_333 = arith.constant 5 : index
    %c0_334 = arith.constant 0 : index
    %c0_335 = arith.constant 0 : index
    %838 = vector.load %arg31[%c5_333, %c0_334, %c0_335] : memref<8x8x256xbf16, #tpu.memory_space<vmem>>, vector<1x8x256xbf16>
    %839 = vector.shape_cast %838 : vector<1x8x256xbf16> to vector<8x256xbf16>
    %840 = vector.shape_cast %837 : vector<8x256xbf16> to vector<1x8x256xbf16>
    tpu.vector_store %arg31[%c5_333, %c0_334, %c0_335], %840 {strides = array<i32>} : memref<8x8x256xbf16, #tpu.memory_space<vmem>>, vector<1x8x256xbf16>,
    %841 = vector.extract_strided_slice %785 {offsets = [6, 0, 0], sizes = [1, 8, 256], strides = [1, 1, 1]} : vector<8x8x256xf32> to vector<1x8x256xf32>
    %842 = vector.shape_cast %841 : vector<1x8x256xf32> to vector<8x256xf32>
    %843 = vector.extract_strided_slice %786 {offsets = [1, 0, 0], sizes = [1, 8, 256], strides = [1, 1, 1]} : vector<8x8x256xf32> to vector<1x8x256xf32>
    %844 = vector.shape_cast %843 : vector<1x8x256xf32> to vector<8x256xf32>
    %845 = arith.addf %842, %844 : vector<8x256xf32>
    %846 = arith.truncf %845 : vector<8x256xf32> to vector<8x256xbf16>
    %c6_336 = arith.constant 6 : index
    %c0_337 = arith.constant 0 : index
    %c0_338 = arith.constant 0 : index
    %847 = vector.load %arg31[%c6_336, %c0_337, %c0_338] : memref<8x8x256xbf16, #tpu.memory_space<vmem>>, vector<1x8x256xbf16>
    %848 = vector.shape_cast %847 : vector<1x8x256xbf16> to vector<8x256xbf16>
    %849 = vector.shape_cast %846 : vector<8x256xbf16> to vector<1x8x256xbf16>
    tpu.vector_store %arg31[%c6_336, %c0_337, %c0_338], %849 {strides = array<i32>} : memref<8x8x256xbf16, #tpu.memory_space<vmem>>, vector<1x8x256xbf16>,
    %850 = vector.extract_strided_slice %785 {offsets = [7, 0, 0], sizes = [1, 8, 256], strides = [1, 1, 1]} : vector<8x8x256xf32> to vector<1x8x256xf32>
    %851 = vector.shape_cast %850 : vector<1x8x256xf32> to vector<8x256xf32>
    %852 = vector.extract_strided_slice %786 {offsets = [0, 0, 0], sizes = [1, 8, 256], strides = [1, 1, 1]} : vector<8x8x256xf32> to vector<1x8x256xf32>
    %853 = vector.shape_cast %852 : vector<1x8x256xf32> to vector<8x256xf32>
    %854 = arith.addf %851, %853 : vector<8x256xf32>
    %855 = arith.truncf %854 : vector<8x256xf32> to vector<8x256xbf16>
    %c7_339 = arith.constant 7 : index
    %c0_340 = arith.constant 0 : index
    %c0_341 = arith.constant 0 : index
    %856 = vector.load %arg31[%c7_339, %c0_340, %c0_341] : memref<8x8x256xbf16, #tpu.memory_space<vmem>>, vector<1x8x256xbf16>
    %857 = vector.shape_cast %856 : vector<1x8x256xbf16> to vector<8x256xbf16>
    %858 = vector.shape_cast %855 : vector<8x256xbf16> to vector<1x8x256xbf16>
    tpu.vector_store %arg31[%c7_339, %c0_340, %c0_341], %858 {strides = array<i32>} : memref<8x8x256xbf16, #tpu.memory_space<vmem>>, vector<1x8x256xbf16>,
    %cst_342 = arith.constant 0.000000e+00 : bf16
    %859 = vector.broadcast %cst_342 : bf16 to vector<8x64xbf16>
    %cst_343 = arith.constant 0.000000e+00 : f32
    %860 = vector.broadcast %cst_343 : f32 to vector<8x64xf32>
    %c0_i32_344 = arith.constant 0 : i32
    %861 = arith.index_cast %c0_i32_344 : i32 to index
    %c0_345 = arith.constant 0 : index
    %c0_346 = arith.constant 0 : index
    %862 = vector.load %arg31[%861, %c0_345, %c0_346] : memref<8x8x256xbf16, #tpu.memory_space<vmem>>, vector<1x8x256xbf16>
    %863 = vector.shape_cast %862 : vector<1x8x256xbf16> to vector<8x256xbf16>
    %c0_347 = arith.constant 0 : index
    %c0_348 = arith.constant 0 : index
    %864 = vector.load %arg21[%c0_347, %c0_348] : memref<64x256xbf16, #tpu.memory_space<vmem>>, vector<64x256xbf16>
    %cst_349 = arith.constant dense<0.000000e+00> : vector<8x256xf32>
    %865 = tpu.matmul %859, %864, %cst_349 {dimension_numbers = #tpu.dot_dimension_numbers<[1], [0], [0], [1], [0, 0, 1, 1], [], []>} : vector<8x64xbf16>, vector<64x256xbf16>, vector<8x256xf32> -> vector<8x256xf32>
    %866 = arith.extf %863 : vector<8x256xbf16> to vector<8x256xf32>
    %867 = arith.addf %866, %865 : vector<8x256xf32>
    %868 = vector.extract_strided_slice %867 {offsets = [0, 0], sizes = [8, 192], strides = [1, 1]} : vector<8x256xf32> to vector<8x192xf32>
    %869 = arith.negf %868 : vector<8x192xf32>
    %870 = math.exp %869 : vector<8x192xf32>
    %cst_350 = arith.constant 1.000000e+00 : f32
    %871 = vector.broadcast %cst_350 : f32 to vector<8x192xf32>
    %872 = arith.addf %871, %870 : vector<8x192xf32>
    %873 = arith.divf %871, %872 : vector<8x192xf32>
    %874 = vector.extract_strided_slice %873 {offsets = [0, 0], sizes = [8, 64], strides = [1, 1]} : vector<8x192xf32> to vector<8x64xf32>
    %875 = vector.extract_strided_slice %873 {offsets = [0, 64], sizes = [8, 64], strides = [1, 1]} : vector<8x192xf32> to vector<8x64xf32>
    %876 = vector.extract_strided_slice %873 {offsets = [0, 128], sizes = [8, 64], strides = [1, 1]} : vector<8x192xf32> to vector<8x64xf32>
    %877 = vector.extract_strided_slice %867 {offsets = [0, 192], sizes = [8, 64], strides = [1, 1]} : vector<8x256xf32> to vector<8x64xf32>
    %878 = math.tanh %877 : vector<8x64xf32>
    %879 = arith.mulf %875, %860 : vector<8x64xf32>
    %880 = arith.mulf %874, %878 : vector<8x64xf32>
    %881 = arith.addf %879, %880 : vector<8x64xf32>
    %882 = math.tanh %881 : vector<8x64xf32>
    %883 = arith.mulf %876, %882 : vector<8x64xf32>
    %884 = arith.truncf %883 : vector<8x64xf32> to vector<8x64xbf16>
    %885 = vector.extract_strided_slice %884 {offsets = [0, 0], sizes = [8, 32], strides = [1, 1]} : vector<8x64xbf16> to vector<8x32xbf16>
    %886 = arith.index_cast %c0_i32_344 : i32 to index
    %c0_351 = arith.constant 0 : index
    %c0_352 = arith.constant 0 : index
    %887 = vector.load %arg29[%886, %c0_351, %c0_352] : memref<8x8x32xbf16, #tpu.memory_space<vmem>>, vector<1x8x32xbf16>
    %888 = vector.shape_cast %887 : vector<1x8x32xbf16> to vector<8x32xbf16>
    %889 = vector.shape_cast %885 : vector<8x32xbf16> to vector<1x8x32xbf16>
    tpu.vector_store %arg29[%886, %c0_351, %c0_352], %889 {strides = array<i32>} : memref<8x8x32xbf16, #tpu.memory_space<vmem>>, vector<1x8x32xbf16>,
    %890 = vector.extract_strided_slice %884 {offsets = [0, 32], sizes = [8, 32], strides = [1, 1]} : vector<8x64xbf16> to vector<8x32xbf16>
    %c7_i32_353 = arith.constant 7 : i32
    %891 = arith.subi %c7_i32_353, %c0_i32_344 : i32
    %892 = arith.index_cast %891 : i32 to index
    %c0_354 = arith.constant 0 : index
    %c0_355 = arith.constant 0 : index
    %893 = vector.load %arg30[%892, %c0_354, %c0_355] : memref<8x8x32xbf16, #tpu.memory_space<vmem>>, vector<1x8x32xbf16>
    %894 = vector.shape_cast %893 : vector<1x8x32xbf16> to vector<8x32xbf16>
    %895 = vector.shape_cast %890 : vector<8x32xbf16> to vector<1x8x32xbf16>
    tpu.vector_store %arg30[%892, %c0_354, %c0_355], %895 {strides = array<i32>} : memref<8x8x32xbf16, #tpu.memory_space<vmem>>, vector<1x8x32xbf16>,
    %c1_i32_356 = arith.constant 1 : i32
    %896 = arith.index_cast %c1_i32_356 : i32 to index
    %c0_357 = arith.constant 0 : index
    %c0_358 = arith.constant 0 : index
    %897 = vector.load %arg31[%896, %c0_357, %c0_358] : memref<8x8x256xbf16, #tpu.memory_space<vmem>>, vector<1x8x256xbf16>
    %898 = vector.shape_cast %897 : vector<1x8x256xbf16> to vector<8x256xbf16>
    %c0_359 = arith.constant 0 : index
    %c0_360 = arith.constant 0 : index
    %899 = vector.load %arg21[%c0_359, %c0_360] : memref<64x256xbf16, #tpu.memory_space<vmem>>, vector<64x256xbf16>
    %cst_361 = arith.constant dense<0.000000e+00> : vector<8x256xf32>
    %900 = tpu.matmul %884, %899, %cst_361 {dimension_numbers = #tpu.dot_dimension_numbers<[1], [0], [0], [1], [0, 0, 1, 1], [], []>} : vector<8x64xbf16>, vector<64x256xbf16>, vector<8x256xf32> -> vector<8x256xf32>
    %901 = arith.extf %898 : vector<8x256xbf16> to vector<8x256xf32>
    %902 = arith.addf %901, %900 : vector<8x256xf32>
    %903 = vector.extract_strided_slice %902 {offsets = [0, 0], sizes = [8, 192], strides = [1, 1]} : vector<8x256xf32> to vector<8x192xf32>
    %904 = arith.negf %903 : vector<8x192xf32>
    %905 = math.exp %904 : vector<8x192xf32>
    %cst_362 = arith.constant 1.000000e+00 : f32
    %906 = vector.broadcast %cst_362 : f32 to vector<8x192xf32>
    %907 = arith.addf %906, %905 : vector<8x192xf32>
    %908 = arith.divf %906, %907 : vector<8x192xf32>
    %909 = vector.extract_strided_slice %908 {offsets = [0, 0], sizes = [8, 64], strides = [1, 1]} : vector<8x192xf32> to vector<8x64xf32>
    %910 = vector.extract_strided_slice %908 {offsets = [0, 64], sizes = [8, 64], strides = [1, 1]} : vector<8x192xf32> to vector<8x64xf32>
    %911 = vector.extract_strided_slice %908 {offsets = [0, 128], sizes = [8, 64], strides = [1, 1]} : vector<8x192xf32> to vector<8x64xf32>
    %912 = vector.extract_strided_slice %902 {offsets = [0, 192], sizes = [8, 64], strides = [1, 1]} : vector<8x256xf32> to vector<8x64xf32>
    %913 = math.tanh %912 : vector<8x64xf32>
    %914 = arith.mulf %910, %881 : vector<8x64xf32>
    %915 = arith.mulf %909, %913 : vector<8x64xf32>
    %916 = arith.addf %914, %915 : vector<8x64xf32>
    %917 = math.tanh %916 : vector<8x64xf32>
    %918 = arith.mulf %911, %917 : vector<8x64xf32>
    %919 = arith.truncf %918 : vector<8x64xf32> to vector<8x64xbf16>
    %920 = vector.extract_strided_slice %919 {offsets = [0, 0], sizes = [8, 32], strides = [1, 1]} : vector<8x64xbf16> to vector<8x32xbf16>
    %921 = arith.index_cast %c1_i32_356 : i32 to index
    %c0_363 = arith.constant 0 : index
    %c0_364 = arith.constant 0 : index
    %922 = vector.load %arg29[%921, %c0_363, %c0_364] : memref<8x8x32xbf16, #tpu.memory_space<vmem>>, vector<1x8x32xbf16>
    %923 = vector.shape_cast %922 : vector<1x8x32xbf16> to vector<8x32xbf16>
    %924 = vector.shape_cast %920 : vector<8x32xbf16> to vector<1x8x32xbf16>
    tpu.vector_store %arg29[%921, %c0_363, %c0_364], %924 {strides = array<i32>} : memref<8x8x32xbf16, #tpu.memory_space<vmem>>, vector<1x8x32xbf16>,
    %925 = vector.extract_strided_slice %919 {offsets = [0, 32], sizes = [8, 32], strides = [1, 1]} : vector<8x64xbf16> to vector<8x32xbf16>
    %c7_i32_365 = arith.constant 7 : i32
    %926 = arith.subi %c7_i32_365, %c1_i32_356 : i32
    %927 = arith.index_cast %926 : i32 to index
    %c0_366 = arith.constant 0 : index
    %c0_367 = arith.constant 0 : index
    %928 = vector.load %arg30[%927, %c0_366, %c0_367] : memref<8x8x32xbf16, #tpu.memory_space<vmem>>, vector<1x8x32xbf16>
    %929 = vector.shape_cast %928 : vector<1x8x32xbf16> to vector<8x32xbf16>
    %930 = vector.shape_cast %925 : vector<8x32xbf16> to vector<1x8x32xbf16>
    tpu.vector_store %arg30[%927, %c0_366, %c0_367], %930 {strides = array<i32>} : memref<8x8x32xbf16, #tpu.memory_space<vmem>>, vector<1x8x32xbf16>,
    %c2_i32_368 = arith.constant 2 : i32
    %931 = arith.index_cast %c2_i32_368 : i32 to index
    %c0_369 = arith.constant 0 : index
    %c0_370 = arith.constant 0 : index
    %932 = vector.load %arg31[%931, %c0_369, %c0_370] : memref<8x8x256xbf16, #tpu.memory_space<vmem>>, vector<1x8x256xbf16>
    %933 = vector.shape_cast %932 : vector<1x8x256xbf16> to vector<8x256xbf16>
    %c0_371 = arith.constant 0 : index
    %c0_372 = arith.constant 0 : index
    %934 = vector.load %arg21[%c0_371, %c0_372] : memref<64x256xbf16, #tpu.memory_space<vmem>>, vector<64x256xbf16>
    %cst_373 = arith.constant dense<0.000000e+00> : vector<8x256xf32>
    %935 = tpu.matmul %919, %934, %cst_373 {dimension_numbers = #tpu.dot_dimension_numbers<[1], [0], [0], [1], [0, 0, 1, 1], [], []>} : vector<8x64xbf16>, vector<64x256xbf16>, vector<8x256xf32> -> vector<8x256xf32>
    %936 = arith.extf %933 : vector<8x256xbf16> to vector<8x256xf32>
    %937 = arith.addf %936, %935 : vector<8x256xf32>
    %938 = vector.extract_strided_slice %937 {offsets = [0, 0], sizes = [8, 192], strides = [1, 1]} : vector<8x256xf32> to vector<8x192xf32>
    %939 = arith.negf %938 : vector<8x192xf32>
    %940 = math.exp %939 : vector<8x192xf32>
    %cst_374 = arith.constant 1.000000e+00 : f32
    %941 = vector.broadcast %cst_374 : f32 to vector<8x192xf32>
    %942 = arith.addf %941, %940 : vector<8x192xf32>
    %943 = arith.divf %941, %942 : vector<8x192xf32>
    %944 = vector.extract_strided_slice %943 {offsets = [0, 0], sizes = [8, 64], strides = [1, 1]} : vector<8x192xf32> to vector<8x64xf32>
    %945 = vector.extract_strided_slice %943 {offsets = [0, 64], sizes = [8, 64], strides = [1, 1]} : vector<8x192xf32> to vector<8x64xf32>
    %946 = vector.extract_strided_slice %943 {offsets = [0, 128], sizes = [8, 64], strides = [1, 1]} : vector<8x192xf32> to vector<8x64xf32>
    %947 = vector.extract_strided_slice %937 {offsets = [0, 192], sizes = [8, 64], strides = [1, 1]} : vector<8x256xf32> to vector<8x64xf32>
    %948 = math.tanh %947 : vector<8x64xf32>
    %949 = arith.mulf %945, %916 : vector<8x64xf32>
    %950 = arith.mulf %944, %948 : vector<8x64xf32>
    %951 = arith.addf %949, %950 : vector<8x64xf32>
    %952 = math.tanh %951 : vector<8x64xf32>
    %953 = arith.mulf %946, %952 : vector<8x64xf32>
    %954 = arith.truncf %953 : vector<8x64xf32> to vector<8x64xbf16>
    %955 = vector.extract_strided_slice %954 {offsets = [0, 0], sizes = [8, 32], strides = [1, 1]} : vector<8x64xbf16> to vector<8x32xbf16>
    %956 = arith.index_cast %c2_i32_368 : i32 to index
    %c0_375 = arith.constant 0 : index
    %c0_376 = arith.constant 0 : index
    %957 = vector.load %arg29[%956, %c0_375, %c0_376] : memref<8x8x32xbf16, #tpu.memory_space<vmem>>, vector<1x8x32xbf16>
    %958 = vector.shape_cast %957 : vector<1x8x32xbf16> to vector<8x32xbf16>
    %959 = vector.shape_cast %955 : vector<8x32xbf16> to vector<1x8x32xbf16>
    tpu.vector_store %arg29[%956, %c0_375, %c0_376], %959 {strides = array<i32>} : memref<8x8x32xbf16, #tpu.memory_space<vmem>>, vector<1x8x32xbf16>,
    %960 = vector.extract_strided_slice %954 {offsets = [0, 32], sizes = [8, 32], strides = [1, 1]} : vector<8x64xbf16> to vector<8x32xbf16>
    %c7_i32_377 = arith.constant 7 : i32
    %961 = arith.subi %c7_i32_377, %c2_i32_368 : i32
    %962 = arith.index_cast %961 : i32 to index
    %c0_378 = arith.constant 0 : index
    %c0_379 = arith.constant 0 : index
    %963 = vector.load %arg30[%962, %c0_378, %c0_379] : memref<8x8x32xbf16, #tpu.memory_space<vmem>>, vector<1x8x32xbf16>
    %964 = vector.shape_cast %963 : vector<1x8x32xbf16> to vector<8x32xbf16>
    %965 = vector.shape_cast %960 : vector<8x32xbf16> to vector<1x8x32xbf16>
    tpu.vector_store %arg30[%962, %c0_378, %c0_379], %965 {strides = array<i32>} : memref<8x8x32xbf16, #tpu.memory_space<vmem>>, vector<1x8x32xbf16>,
    %c3_i32_380 = arith.constant 3 : i32
    %966 = arith.index_cast %c3_i32_380 : i32 to index
    %c0_381 = arith.constant 0 : index
    %c0_382 = arith.constant 0 : index
    %967 = vector.load %arg31[%966, %c0_381, %c0_382] : memref<8x8x256xbf16, #tpu.memory_space<vmem>>, vector<1x8x256xbf16>
    %968 = vector.shape_cast %967 : vector<1x8x256xbf16> to vector<8x256xbf16>
    %c0_383 = arith.constant 0 : index
    %c0_384 = arith.constant 0 : index
    %969 = vector.load %arg21[%c0_383, %c0_384] : memref<64x256xbf16, #tpu.memory_space<vmem>>, vector<64x256xbf16>
    %cst_385 = arith.constant dense<0.000000e+00> : vector<8x256xf32>
    %970 = tpu.matmul %954, %969, %cst_385 {dimension_numbers = #tpu.dot_dimension_numbers<[1], [0], [0], [1], [0, 0, 1, 1], [], []>} : vector<8x64xbf16>, vector<64x256xbf16>, vector<8x256xf32> -> vector<8x256xf32>
    %971 = arith.extf %968 : vector<8x256xbf16> to vector<8x256xf32>
    %972 = arith.addf %971, %970 : vector<8x256xf32>
    %973 = vector.extract_strided_slice %972 {offsets = [0, 0], sizes = [8, 192], strides = [1, 1]} : vector<8x256xf32> to vector<8x192xf32>
    %974 = arith.negf %973 : vector<8x192xf32>
    %975 = math.exp %974 : vector<8x192xf32>
    %cst_386 = arith.constant 1.000000e+00 : f32
    %976 = vector.broadcast %cst_386 : f32 to vector<8x192xf32>
    %977 = arith.addf %976, %975 : vector<8x192xf32>
    %978 = arith.divf %976, %977 : vector<8x192xf32>
    %979 = vector.extract_strided_slice %978 {offsets = [0, 0], sizes = [8, 64], strides = [1, 1]} : vector<8x192xf32> to vector<8x64xf32>
    %980 = vector.extract_strided_slice %978 {offsets = [0, 64], sizes = [8, 64], strides = [1, 1]} : vector<8x192xf32> to vector<8x64xf32>
    %981 = vector.extract_strided_slice %978 {offsets = [0, 128], sizes = [8, 64], strides = [1, 1]} : vector<8x192xf32> to vector<8x64xf32>
    %982 = vector.extract_strided_slice %972 {offsets = [0, 192], sizes = [8, 64], strides = [1, 1]} : vector<8x256xf32> to vector<8x64xf32>
    %983 = math.tanh %982 : vector<8x64xf32>
    %984 = arith.mulf %980, %951 : vector<8x64xf32>
    %985 = arith.mulf %979, %983 : vector<8x64xf32>
    %986 = arith.addf %984, %985 : vector<8x64xf32>
    %987 = math.tanh %986 : vector<8x64xf32>
    %988 = arith.mulf %981, %987 : vector<8x64xf32>
    %989 = arith.truncf %988 : vector<8x64xf32> to vector<8x64xbf16>
    %990 = vector.extract_strided_slice %989 {offsets = [0, 0], sizes = [8, 32], strides = [1, 1]} : vector<8x64xbf16> to vector<8x32xbf16>
    %991 = arith.index_cast %c3_i32_380 : i32 to index
    %c0_387 = arith.constant 0 : index
    %c0_388 = arith.constant 0 : index
    %992 = vector.load %arg29[%991, %c0_387, %c0_388] : memref<8x8x32xbf16, #tpu.memory_space<vmem>>, vector<1x8x32xbf16>
    %993 = vector.shape_cast %992 : vector<1x8x32xbf16> to vector<8x32xbf16>
    %994 = vector.shape_cast %990 : vector<8x32xbf16> to vector<1x8x32xbf16>
    tpu.vector_store %arg29[%991, %c0_387, %c0_388], %994 {strides = array<i32>} : memref<8x8x32xbf16, #tpu.memory_space<vmem>>, vector<1x8x32xbf16>,
    %995 = vector.extract_strided_slice %989 {offsets = [0, 32], sizes = [8, 32], strides = [1, 1]} : vector<8x64xbf16> to vector<8x32xbf16>
    %c7_i32_389 = arith.constant 7 : i32
    %996 = arith.subi %c7_i32_389, %c3_i32_380 : i32
    %997 = arith.index_cast %996 : i32 to index
    %c0_390 = arith.constant 0 : index
    %c0_391 = arith.constant 0 : index
    %998 = vector.load %arg30[%997, %c0_390, %c0_391] : memref<8x8x32xbf16, #tpu.memory_space<vmem>>, vector<1x8x32xbf16>
    %999 = vector.shape_cast %998 : vector<1x8x32xbf16> to vector<8x32xbf16>
    %1000 = vector.shape_cast %995 : vector<8x32xbf16> to vector<1x8x32xbf16>
    tpu.vector_store %arg30[%997, %c0_390, %c0_391], %1000 {strides = array<i32>} : memref<8x8x32xbf16, #tpu.memory_space<vmem>>, vector<1x8x32xbf16>,
    %c4_i32_392 = arith.constant 4 : i32
    %1001 = arith.index_cast %c4_i32_392 : i32 to index
    %c0_393 = arith.constant 0 : index
    %c0_394 = arith.constant 0 : index
    %1002 = vector.load %arg31[%1001, %c0_393, %c0_394] : memref<8x8x256xbf16, #tpu.memory_space<vmem>>, vector<1x8x256xbf16>
    %1003 = vector.shape_cast %1002 : vector<1x8x256xbf16> to vector<8x256xbf16>
    %c0_395 = arith.constant 0 : index
    %c0_396 = arith.constant 0 : index
    %1004 = vector.load %arg21[%c0_395, %c0_396] : memref<64x256xbf16, #tpu.memory_space<vmem>>, vector<64x256xbf16>
    %cst_397 = arith.constant dense<0.000000e+00> : vector<8x256xf32>
    %1005 = tpu.matmul %989, %1004, %cst_397 {dimension_numbers = #tpu.dot_dimension_numbers<[1], [0], [0], [1], [0, 0, 1, 1], [], []>} : vector<8x64xbf16>, vector<64x256xbf16>, vector<8x256xf32> -> vector<8x256xf32>
    %1006 = arith.extf %1003 : vector<8x256xbf16> to vector<8x256xf32>
    %1007 = arith.addf %1006, %1005 : vector<8x256xf32>
    %1008 = vector.extract_strided_slice %1007 {offsets = [0, 0], sizes = [8, 192], strides = [1, 1]} : vector<8x256xf32> to vector<8x192xf32>
    %1009 = arith.negf %1008 : vector<8x192xf32>
    %1010 = math.exp %1009 : vector<8x192xf32>
    %cst_398 = arith.constant 1.000000e+00 : f32
    %1011 = vector.broadcast %cst_398 : f32 to vector<8x192xf32>
    %1012 = arith.addf %1011, %1010 : vector<8x192xf32>
    %1013 = arith.divf %1011, %1012 : vector<8x192xf32>
    %1014 = vector.extract_strided_slice %1013 {offsets = [0, 0], sizes = [8, 64], strides = [1, 1]} : vector<8x192xf32> to vector<8x64xf32>
    %1015 = vector.extract_strided_slice %1013 {offsets = [0, 64], sizes = [8, 64], strides = [1, 1]} : vector<8x192xf32> to vector<8x64xf32>
    %1016 = vector.extract_strided_slice %1013 {offsets = [0, 128], sizes = [8, 64], strides = [1, 1]} : vector<8x192xf32> to vector<8x64xf32>
    %1017 = vector.extract_strided_slice %1007 {offsets = [0, 192], sizes = [8, 64], strides = [1, 1]} : vector<8x256xf32> to vector<8x64xf32>
    %1018 = math.tanh %1017 : vector<8x64xf32>
    %1019 = arith.mulf %1015, %986 : vector<8x64xf32>
    %1020 = arith.mulf %1014, %1018 : vector<8x64xf32>
    %1021 = arith.addf %1019, %1020 : vector<8x64xf32>
    %1022 = math.tanh %1021 : vector<8x64xf32>
    %1023 = arith.mulf %1016, %1022 : vector<8x64xf32>
    %1024 = arith.truncf %1023 : vector<8x64xf32> to vector<8x64xbf16>
    %1025 = vector.extract_strided_slice %1024 {offsets = [0, 0], sizes = [8, 32], strides = [1, 1]} : vector<8x64xbf16> to vector<8x32xbf16>
    %1026 = arith.index_cast %c4_i32_392 : i32 to index
    %c0_399 = arith.constant 0 : index
    %c0_400 = arith.constant 0 : index
    %1027 = vector.load %arg29[%1026, %c0_399, %c0_400] : memref<8x8x32xbf16, #tpu.memory_space<vmem>>, vector<1x8x32xbf16>
    %1028 = vector.shape_cast %1027 : vector<1x8x32xbf16> to vector<8x32xbf16>
    %1029 = vector.shape_cast %1025 : vector<8x32xbf16> to vector<1x8x32xbf16>
    tpu.vector_store %arg29[%1026, %c0_399, %c0_400], %1029 {strides = array<i32>} : memref<8x8x32xbf16, #tpu.memory_space<vmem>>, vector<1x8x32xbf16>,
    %1030 = vector.extract_strided_slice %1024 {offsets = [0, 32], sizes = [8, 32], strides = [1, 1]} : vector<8x64xbf16> to vector<8x32xbf16>
    %c7_i32_401 = arith.constant 7 : i32
    %1031 = arith.subi %c7_i32_401, %c4_i32_392 : i32
    %1032 = arith.index_cast %1031 : i32 to index
    %c0_402 = arith.constant 0 : index
    %c0_403 = arith.constant 0 : index
    %1033 = vector.load %arg30[%1032, %c0_402, %c0_403] : memref<8x8x32xbf16, #tpu.memory_space<vmem>>, vector<1x8x32xbf16>
    %1034 = vector.shape_cast %1033 : vector<1x8x32xbf16> to vector<8x32xbf16>
    %1035 = vector.shape_cast %1030 : vector<8x32xbf16> to vector<1x8x32xbf16>
    tpu.vector_store %arg30[%1032, %c0_402, %c0_403], %1035 {strides = array<i32>} : memref<8x8x32xbf16, #tpu.memory_space<vmem>>, vector<1x8x32xbf16>,
    %c5_i32_404 = arith.constant 5 : i32
    %1036 = arith.index_cast %c5_i32_404 : i32 to index
    %c0_405 = arith.constant 0 : index
    %c0_406 = arith.constant 0 : index
    %1037 = vector.load %arg31[%1036, %c0_405, %c0_406] : memref<8x8x256xbf16, #tpu.memory_space<vmem>>, vector<1x8x256xbf16>
    %1038 = vector.shape_cast %1037 : vector<1x8x256xbf16> to vector<8x256xbf16>
    %c0_407 = arith.constant 0 : index
    %c0_408 = arith.constant 0 : index
    %1039 = vector.load %arg21[%c0_407, %c0_408] : memref<64x256xbf16, #tpu.memory_space<vmem>>, vector<64x256xbf16>
    %cst_409 = arith.constant dense<0.000000e+00> : vector<8x256xf32>
    %1040 = tpu.matmul %1024, %1039, %cst_409 {dimension_numbers = #tpu.dot_dimension_numbers<[1], [0], [0], [1], [0, 0, 1, 1], [], []>} : vector<8x64xbf16>, vector<64x256xbf16>, vector<8x256xf32> -> vector<8x256xf32>
    %1041 = arith.extf %1038 : vector<8x256xbf16> to vector<8x256xf32>
    %1042 = arith.addf %1041, %1040 : vector<8x256xf32>
    %1043 = vector.extract_strided_slice %1042 {offsets = [0, 0], sizes = [8, 192], strides = [1, 1]} : vector<8x256xf32> to vector<8x192xf32>
    %1044 = arith.negf %1043 : vector<8x192xf32>
    %1045 = math.exp %1044 : vector<8x192xf32>
    %cst_410 = arith.constant 1.000000e+00 : f32
    %1046 = vector.broadcast %cst_410 : f32 to vector<8x192xf32>
    %1047 = arith.addf %1046, %1045 : vector<8x192xf32>
    %1048 = arith.divf %1046, %1047 : vector<8x192xf32>
    %1049 = vector.extract_strided_slice %1048 {offsets = [0, 0], sizes = [8, 64], strides = [1, 1]} : vector<8x192xf32> to vector<8x64xf32>
    %1050 = vector.extract_strided_slice %1048 {offsets = [0, 64], sizes = [8, 64], strides = [1, 1]} : vector<8x192xf32> to vector<8x64xf32>
    %1051 = vector.extract_strided_slice %1048 {offsets = [0, 128], sizes = [8, 64], strides = [1, 1]} : vector<8x192xf32> to vector<8x64xf32>
    %1052 = vector.extract_strided_slice %1042 {offsets = [0, 192], sizes = [8, 64], strides = [1, 1]} : vector<8x256xf32> to vector<8x64xf32>
    %1053 = math.tanh %1052 : vector<8x64xf32>
    %1054 = arith.mulf %1050, %1021 : vector<8x64xf32>
    %1055 = arith.mulf %1049, %1053 : vector<8x64xf32>
    %1056 = arith.addf %1054, %1055 : vector<8x64xf32>
    %1057 = math.tanh %1056 : vector<8x64xf32>
    %1058 = arith.mulf %1051, %1057 : vector<8x64xf32>
    %1059 = arith.truncf %1058 : vector<8x64xf32> to vector<8x64xbf16>
    %1060 = vector.extract_strided_slice %1059 {offsets = [0, 0], sizes = [8, 32], strides = [1, 1]} : vector<8x64xbf16> to vector<8x32xbf16>
    %1061 = arith.index_cast %c5_i32_404 : i32 to index
    %c0_411 = arith.constant 0 : index
    %c0_412 = arith.constant 0 : index
    %1062 = vector.load %arg29[%1061, %c0_411, %c0_412] : memref<8x8x32xbf16, #tpu.memory_space<vmem>>, vector<1x8x32xbf16>
    %1063 = vector.shape_cast %1062 : vector<1x8x32xbf16> to vector<8x32xbf16>
    %1064 = vector.shape_cast %1060 : vector<8x32xbf16> to vector<1x8x32xbf16>
    tpu.vector_store %arg29[%1061, %c0_411, %c0_412], %1064 {strides = array<i32>} : memref<8x8x32xbf16, #tpu.memory_space<vmem>>, vector<1x8x32xbf16>,
    %1065 = vector.extract_strided_slice %1059 {offsets = [0, 32], sizes = [8, 32], strides = [1, 1]} : vector<8x64xbf16> to vector<8x32xbf16>
    %c7_i32_413 = arith.constant 7 : i32
    %1066 = arith.subi %c7_i32_413, %c5_i32_404 : i32
    %1067 = arith.index_cast %1066 : i32 to index
    %c0_414 = arith.constant 0 : index
    %c0_415 = arith.constant 0 : index
    %1068 = vector.load %arg30[%1067, %c0_414, %c0_415] : memref<8x8x32xbf16, #tpu.memory_space<vmem>>, vector<1x8x32xbf16>
    %1069 = vector.shape_cast %1068 : vector<1x8x32xbf16> to vector<8x32xbf16>
    %1070 = vector.shape_cast %1065 : vector<8x32xbf16> to vector<1x8x32xbf16>
    tpu.vector_store %arg30[%1067, %c0_414, %c0_415], %1070 {strides = array<i32>} : memref<8x8x32xbf16, #tpu.memory_space<vmem>>, vector<1x8x32xbf16>,
    %c6_i32_416 = arith.constant 6 : i32
    %1071 = arith.index_cast %c6_i32_416 : i32 to index
    %c0_417 = arith.constant 0 : index
    %c0_418 = arith.constant 0 : index
    %1072 = vector.load %arg31[%1071, %c0_417, %c0_418] : memref<8x8x256xbf16, #tpu.memory_space<vmem>>, vector<1x8x256xbf16>
    %1073 = vector.shape_cast %1072 : vector<1x8x256xbf16> to vector<8x256xbf16>
    %c0_419 = arith.constant 0 : index
    %c0_420 = arith.constant 0 : index
    %1074 = vector.load %arg21[%c0_419, %c0_420] : memref<64x256xbf16, #tpu.memory_space<vmem>>, vector<64x256xbf16>
    %cst_421 = arith.constant dense<0.000000e+00> : vector<8x256xf32>
    %1075 = tpu.matmul %1059, %1074, %cst_421 {dimension_numbers = #tpu.dot_dimension_numbers<[1], [0], [0], [1], [0, 0, 1, 1], [], []>} : vector<8x64xbf16>, vector<64x256xbf16>, vector<8x256xf32> -> vector<8x256xf32>
    %1076 = arith.extf %1073 : vector<8x256xbf16> to vector<8x256xf32>
    %1077 = arith.addf %1076, %1075 : vector<8x256xf32>
    %1078 = vector.extract_strided_slice %1077 {offsets = [0, 0], sizes = [8, 192], strides = [1, 1]} : vector<8x256xf32> to vector<8x192xf32>
    %1079 = arith.negf %1078 : vector<8x192xf32>
    %1080 = math.exp %1079 : vector<8x192xf32>
    %cst_422 = arith.constant 1.000000e+00 : f32
    %1081 = vector.broadcast %cst_422 : f32 to vector<8x192xf32>
    %1082 = arith.addf %1081, %1080 : vector<8x192xf32>
    %1083 = arith.divf %1081, %1082 : vector<8x192xf32>
    %1084 = vector.extract_strided_slice %1083 {offsets = [0, 0], sizes = [8, 64], strides = [1, 1]} : vector<8x192xf32> to vector<8x64xf32>
    %1085 = vector.extract_strided_slice %1083 {offsets = [0, 64], sizes = [8, 64], strides = [1, 1]} : vector<8x192xf32> to vector<8x64xf32>
    %1086 = vector.extract_strided_slice %1083 {offsets = [0, 128], sizes = [8, 64], strides = [1, 1]} : vector<8x192xf32> to vector<8x64xf32>
    %1087 = vector.extract_strided_slice %1077 {offsets = [0, 192], sizes = [8, 64], strides = [1, 1]} : vector<8x256xf32> to vector<8x64xf32>
    %1088 = math.tanh %1087 : vector<8x64xf32>
    %1089 = arith.mulf %1085, %1056 : vector<8x64xf32>
    %1090 = arith.mulf %1084, %1088 : vector<8x64xf32>
    %1091 = arith.addf %1089, %1090 : vector<8x64xf32>
    %1092 = math.tanh %1091 : vector<8x64xf32>
    %1093 = arith.mulf %1086, %1092 : vector<8x64xf32>
    %1094 = arith.truncf %1093 : vector<8x64xf32> to vector<8x64xbf16>
    %1095 = vector.extract_strided_slice %1094 {offsets = [0, 0], sizes = [8, 32], strides = [1, 1]} : vector<8x64xbf16> to vector<8x32xbf16>
    %1096 = arith.index_cast %c6_i32_416 : i32 to index
    %c0_423 = arith.constant 0 : index
    %c0_424 = arith.constant 0 : index
    %1097 = vector.load %arg29[%1096, %c0_423, %c0_424] : memref<8x8x32xbf16, #tpu.memory_space<vmem>>, vector<1x8x32xbf16>
    %1098 = vector.shape_cast %1097 : vector<1x8x32xbf16> to vector<8x32xbf16>
    %1099 = vector.shape_cast %1095 : vector<8x32xbf16> to vector<1x8x32xbf16>
    tpu.vector_store %arg29[%1096, %c0_423, %c0_424], %1099 {strides = array<i32>} : memref<8x8x32xbf16, #tpu.memory_space<vmem>>, vector<1x8x32xbf16>,
    %1100 = vector.extract_strided_slice %1094 {offsets = [0, 32], sizes = [8, 32], strides = [1, 1]} : vector<8x64xbf16> to vector<8x32xbf16>
    %c7_i32_425 = arith.constant 7 : i32
    %1101 = arith.subi %c7_i32_425, %c6_i32_416 : i32
    %1102 = arith.index_cast %1101 : i32 to index
    %c0_426 = arith.constant 0 : index
    %c0_427 = arith.constant 0 : index
    %1103 = vector.load %arg30[%1102, %c0_426, %c0_427] : memref<8x8x32xbf16, #tpu.memory_space<vmem>>, vector<1x8x32xbf16>
    %1104 = vector.shape_cast %1103 : vector<1x8x32xbf16> to vector<8x32xbf16>
    %1105 = vector.shape_cast %1100 : vector<8x32xbf16> to vector<1x8x32xbf16>
    tpu.vector_store %arg30[%1102, %c0_426, %c0_427], %1105 {strides = array<i32>} : memref<8x8x32xbf16, #tpu.memory_space<vmem>>, vector<1x8x32xbf16>,
    %c7_i32_428 = arith.constant 7 : i32
    %1106 = arith.index_cast %c7_i32_428 : i32 to index
    %c0_429 = arith.constant 0 : index
    %c0_430 = arith.constant 0 : index
    %1107 = vector.load %arg31[%1106, %c0_429, %c0_430] : memref<8x8x256xbf16, #tpu.memory_space<vmem>>, vector<1x8x256xbf16>
    %1108 = vector.shape_cast %1107 : vector<1x8x256xbf16> to vector<8x256xbf16>
    %c0_431 = arith.constant 0 : index
    %c0_432 = arith.constant 0 : index
    %1109 = vector.load %arg21[%c0_431, %c0_432] : memref<64x256xbf16, #tpu.memory_space<vmem>>, vector<64x256xbf16>
    %cst_433 = arith.constant dense<0.000000e+00> : vector<8x256xf32>
    %1110 = tpu.matmul %1094, %1109, %cst_433 {dimension_numbers = #tpu.dot_dimension_numbers<[1], [0], [0], [1], [0, 0, 1, 1], [], []>} : vector<8x64xbf16>, vector<64x256xbf16>, vector<8x256xf32> -> vector<8x256xf32>
    %1111 = arith.extf %1108 : vector<8x256xbf16> to vector<8x256xf32>
    %1112 = arith.addf %1111, %1110 : vector<8x256xf32>
    %1113 = vector.extract_strided_slice %1112 {offsets = [0, 0], sizes = [8, 192], strides = [1, 1]} : vector<8x256xf32> to vector<8x192xf32>
    %1114 = arith.negf %1113 : vector<8x192xf32>
    %1115 = math.exp %1114 : vector<8x192xf32>
    %cst_434 = arith.constant 1.000000e+00 : f32
    %1116 = vector.broadcast %cst_434 : f32 to vector<8x192xf32>
    %1117 = arith.addf %1116, %1115 : vector<8x192xf32>
    %1118 = arith.divf %1116, %1117 : vector<8x192xf32>
    %1119 = vector.extract_strided_slice %1118 {offsets = [0, 0], sizes = [8, 64], strides = [1, 1]} : vector<8x192xf32> to vector<8x64xf32>
    %1120 = vector.extract_strided_slice %1118 {offsets = [0, 64], sizes = [8, 64], strides = [1, 1]} : vector<8x192xf32> to vector<8x64xf32>
    %1121 = vector.extract_strided_slice %1118 {offsets = [0, 128], sizes = [8, 64], strides = [1, 1]} : vector<8x192xf32> to vector<8x64xf32>
    %1122 = vector.extract_strided_slice %1112 {offsets = [0, 192], sizes = [8, 64], strides = [1, 1]} : vector<8x256xf32> to vector<8x64xf32>
    %1123 = math.tanh %1122 : vector<8x64xf32>
    %1124 = arith.mulf %1120, %1091 : vector<8x64xf32>
    %1125 = arith.mulf %1119, %1123 : vector<8x64xf32>
    %1126 = arith.addf %1124, %1125 : vector<8x64xf32>
    %1127 = math.tanh %1126 : vector<8x64xf32>
    %1128 = arith.mulf %1121, %1127 : vector<8x64xf32>
    %1129 = arith.truncf %1128 : vector<8x64xf32> to vector<8x64xbf16>
    %1130 = vector.extract_strided_slice %1129 {offsets = [0, 0], sizes = [8, 32], strides = [1, 1]} : vector<8x64xbf16> to vector<8x32xbf16>
    %1131 = arith.index_cast %c7_i32_428 : i32 to index
    %c0_435 = arith.constant 0 : index
    %c0_436 = arith.constant 0 : index
    %1132 = vector.load %arg29[%1131, %c0_435, %c0_436] : memref<8x8x32xbf16, #tpu.memory_space<vmem>>, vector<1x8x32xbf16>
    %1133 = vector.shape_cast %1132 : vector<1x8x32xbf16> to vector<8x32xbf16>
    %1134 = vector.shape_cast %1130 : vector<8x32xbf16> to vector<1x8x32xbf16>
    tpu.vector_store %arg29[%1131, %c0_435, %c0_436], %1134 {strides = array<i32>} : memref<8x8x32xbf16, #tpu.memory_space<vmem>>, vector<1x8x32xbf16>,
    %1135 = vector.extract_strided_slice %1129 {offsets = [0, 32], sizes = [8, 32], strides = [1, 1]} : vector<8x64xbf16> to vector<8x32xbf16>
    %c7_i32_437 = arith.constant 7 : i32
    %1136 = arith.subi %c7_i32_437, %c7_i32_428 : i32
    %1137 = arith.index_cast %1136 : i32 to index
    %c0_438 = arith.constant 0 : index
    %c0_439 = arith.constant 0 : index
    %1138 = vector.load %arg30[%1137, %c0_438, %c0_439] : memref<8x8x32xbf16, #tpu.memory_space<vmem>>, vector<1x8x32xbf16>
    %1139 = vector.shape_cast %1138 : vector<1x8x32xbf16> to vector<8x32xbf16>
    %1140 = vector.shape_cast %1135 : vector<8x32xbf16> to vector<1x8x32xbf16>
    tpu.vector_store %arg30[%1137, %c0_438, %c0_439], %1140 {strides = array<i32>} : memref<8x8x32xbf16, #tpu.memory_space<vmem>>, vector<1x8x32xbf16>,
    %c8_i32_440 = arith.constant 8 : i32
    %c7_441 = arith.constant 7 : index
    %c0_442 = arith.constant 0 : index
    %c0_443 = arith.constant 0 : index
    %1141 = vector.load %arg25[%c7_441, %c0_442, %c0_443] : memref<8x8x32xbf16, #tpu.memory_space<vmem>>, vector<1x8x32xbf16>
    %1142 = vector.shape_cast %1141 : vector<1x8x32xbf16> to vector<8x32xbf16>
    %1143 = arith.extf %1142 : vector<8x32xbf16> to vector<8x32xf32>
    %c7_444 = arith.constant 7 : index
    %c0_445 = arith.constant 0 : index
    %c0_446 = arith.constant 0 : index
    %1144 = vector.load %arg26[%c7_444, %c0_445, %c0_446] : memref<8x8x32xbf16, #tpu.memory_space<vmem>>, vector<1x8x32xbf16>
    %1145 = vector.shape_cast %1144 : vector<1x8x32xbf16> to vector<8x32xbf16>
    %1146 = arith.extf %1145 : vector<8x32xbf16> to vector<8x32xf32>
    %c7_447 = arith.constant 7 : index
    %c0_448 = arith.constant 0 : index
    %c0_449 = arith.constant 0 : index
    %1147 = vector.load %arg27[%c7_447, %c0_448, %c0_449] : memref<8x8x32xbf16, #tpu.memory_space<vmem>>, vector<1x8x32xbf16>
    %1148 = vector.shape_cast %1147 : vector<1x8x32xbf16> to vector<8x32xbf16>
    %1149 = arith.extf %1148 : vector<8x32xbf16> to vector<8x32xf32>
    %c7_450 = arith.constant 7 : index
    %c0_451 = arith.constant 0 : index
    %c0_452 = arith.constant 0 : index
    %1150 = vector.load %arg28[%c7_450, %c0_451, %c0_452] : memref<8x8x32xbf16, #tpu.memory_space<vmem>>, vector<1x8x32xbf16>
    %1151 = vector.shape_cast %1150 : vector<1x8x32xbf16> to vector<8x32xbf16>
    %1152 = arith.extf %1151 : vector<8x32xbf16> to vector<8x32xf32>
    %1153 = arith.addf %1143, %1149 : vector<8x32xf32>
    %1154 = arith.addf %1146, %1152 : vector<8x32xf32>
    %c7_453 = arith.constant 7 : index
    %c0_454 = arith.constant 0 : index
    %c0_455 = arith.constant 0 : index
    %1155 = vector.load %arg29[%c7_453, %c0_454, %c0_455] : memref<8x8x32xbf16, #tpu.memory_space<vmem>>, vector<1x8x32xbf16>
    %1156 = vector.shape_cast %1155 : vector<1x8x32xbf16> to vector<8x32xbf16>
    %1157 = arith.extf %1156 : vector<8x32xbf16> to vector<8x32xf32>
    %c7_456 = arith.constant 7 : index
    %c0_457 = arith.constant 0 : index
    %c0_458 = arith.constant 0 : index
    %1158 = vector.load %arg30[%c7_456, %c0_457, %c0_458] : memref<8x8x32xbf16, #tpu.memory_space<vmem>>, vector<1x8x32xbf16>
    %1159 = vector.shape_cast %1158 : vector<1x8x32xbf16> to vector<8x32xbf16>
    %1160 = arith.extf %1159 : vector<8x32xbf16> to vector<8x32xf32>
    %1161 = arith.addf %1153, %1157 : vector<8x32xf32>
    %1162 = arith.addf %1154, %1160 : vector<8x32xf32>
    %1163 = arith.truncf %1161 : vector<8x32xf32> to vector<8x32xbf16>
    %c0_459 = arith.constant 0 : index
    %c0_460 = arith.constant 0 : index
    %1164 = vector.load %arg22[%c0_459, %c0_460] : memref<64x4xbf16, #tpu.memory_space<vmem>>, vector<32x4xbf16>
    %cst_461 = arith.constant dense<0.000000e+00> : vector<8x4xf32>
    %1165 = tpu.matmul %1163, %1164, %cst_461 {dimension_numbers = #tpu.dot_dimension_numbers<[1], [0], [0], [1], [0, 0, 1, 1], [], []>} : vector<8x32xbf16>, vector<32x4xbf16>, vector<8x4xf32> -> vector<8x4xf32>
    %1166 = arith.truncf %1162 : vector<8x32xf32> to vector<8x32xbf16>
    %c32 = arith.constant 32 : index
    %c0_462 = arith.constant 0 : index
    %1167 = vector.load %arg22[%c32, %c0_462] : memref<64x4xbf16, #tpu.memory_space<vmem>>, vector<32x4xbf16>
    %cst_463 = arith.constant dense<0.000000e+00> : vector<8x4xf32>
    %1168 = tpu.matmul %1166, %1167, %cst_463 {dimension_numbers = #tpu.dot_dimension_numbers<[1], [0], [0], [1], [0, 0, 1, 1], [], []>} : vector<8x32xbf16>, vector<32x4xbf16>, vector<8x4xf32> -> vector<8x4xf32>
    %1169 = arith.addf %1165, %1168 : vector<8x4xf32>
    %c0_464 = arith.constant 0 : index
    %c0_465 = arith.constant 0 : index
    %1170 = vector.load %arg23[%c0_464, %c0_465] : memref<1x4xf32, #tpu.memory_space<vmem>>, vector<1x4xf32>
    %1171 = vector.broadcast %1170 : vector<1x4xf32> to vector<8x4xf32>
    %1172 = arith.addf %1169, %1171 : vector<8x4xf32>
    %c0_466 = arith.constant 0 : index
    %c0_467 = arith.constant 0 : index
    %1173 = vector.load %arg24[%c0_466, %c0_467] : memref<8x4xf32, #tpu.memory_space<vmem>>, vector<8x4xf32>
    tpu.vector_store %arg24[%c0_466, %c0_467], %1172 {strides = array<i32>} : memref<8x4xf32, #tpu.memory_space<vmem>>, vector<8x4xf32>,
    return
  }
  func.func @transform_0(%arg0: i32) -> (i32, i32, i32) {
    %c0_i32 = arith.constant 0 : i32
    %c0_i32_0 = arith.constant 0 : i32
    %c0_i32_1 = arith.constant 0 : i32
    return %c0_i32, %arg0, %c0_i32_0 : i32, i32, i32
  }
  func.func @transform_1(%arg0: i32) -> (i32, i32) {
    %c0_i32 = arith.constant 0 : i32
    %c0_i32_0 = arith.constant 0 : i32
    %c0_i32_1 = arith.constant 0 : i32
    return %c0_i32, %c0_i32_0 : i32, i32
  }
  func.func @transform_2(%arg0: i32) -> (i32, i32) {
    %c0_i32 = arith.constant 0 : i32
    %c0_i32_0 = arith.constant 0 : i32
    %c0_i32_1 = arith.constant 0 : i32
    return %c0_i32, %c0_i32_0 : i32, i32
  }
  func.func @transform_3(%arg0: i32) -> (i32, i32) {
    %c0_i32 = arith.constant 0 : i32
    %c0_i32_0 = arith.constant 0 : i32
    %c0_i32_1 = arith.constant 0 : i32
    return %c0_i32, %c0_i32_0 : i32, i32
  }
  func.func @transform_4(%arg0: i32) -> (i32, i32) {
    %c0_i32 = arith.constant 0 : i32
    %c0_i32_0 = arith.constant 0 : i32
    %c0_i32_1 = arith.constant 0 : i32
    return %c0_i32, %c0_i32_0 : i32, i32
  }
  func.func @transform_5(%arg0: i32) -> (i32, i32) {
    %c0_i32 = arith.constant 0 : i32
    %c0_i32_0 = arith.constant 0 : i32
    %c0_i32_1 = arith.constant 0 : i32
    return %c0_i32, %c0_i32_0 : i32, i32
  }
  func.func @transform_6(%arg0: i32) -> (i32, i32) {
    %c0_i32 = arith.constant 0 : i32
    %c0_i32_0 = arith.constant 0 : i32
    %c0_i32_1 = arith.constant 0 : i32
    return %c0_i32, %c0_i32_0 : i32, i32
  }
  func.func @transform_7(%arg0: i32) -> (i32, i32) {
    %c0_i32 = arith.constant 0 : i32
    %c0_i32_0 = arith.constant 0 : i32
    %c0_i32_1 = arith.constant 0 : i32
    return %c0_i32, %c0_i32_0 : i32, i32
  }
  func.func @transform_8(%arg0: i32) -> (i32, i32) {
    %c0_i32 = arith.constant 0 : i32
    %c0_i32_0 = arith.constant 0 : i32
    %c0_i32_1 = arith.constant 0 : i32
    return %c0_i32, %c0_i32_0 : i32, i32
  }
  func.func @transform_9(%arg0: i32) -> (i32, i32) {
    %c0_i32 = arith.constant 0 : i32
    %c0_i32_0 = arith.constant 0 : i32
    %c0_i32_1 = arith.constant 0 : i32
    return %c0_i32, %c0_i32_0 : i32, i32
  }
  func.func @transform_10(%arg0: i32) -> (i32, i32) {
    %c0_i32 = arith.constant 0 : i32
    %c0_i32_0 = arith.constant 0 : i32
    %c0_i32_1 = arith.constant 0 : i32
    return %c0_i32, %c0_i32_0 : i32, i32
  }
  func.func @transform_11(%arg0: i32) -> (i32, i32) {
    %c0_i32 = arith.constant 0 : i32
    %c0_i32_0 = arith.constant 0 : i32
    %c0_i32_1 = arith.constant 0 : i32
    return %c0_i32, %c0_i32_0 : i32, i32
  }
  func.func @transform_12(%arg0: i32) -> (i32, i32) {
    %c0_i32 = arith.constant 0 : i32
    %c0_i32_0 = arith.constant 0 : i32
    %c0_i32_1 = arith.constant 0 : i32
    return %c0_i32, %c0_i32_0 : i32, i32
  }
  func.func @transform_13(%arg0: i32) -> (i32, i32) {
    %c0_i32 = arith.constant 0 : i32
    %c0_i32_0 = arith.constant 0 : i32
    %c0_i32_1 = arith.constant 0 : i32
    return %c0_i32, %c0_i32_0 : i32, i32
  }
  func.func @transform_14(%arg0: i32) -> (i32, i32) {
    %c0_i32 = arith.constant 0 : i32
    %c0_i32_0 = arith.constant 0 : i32
    %c0_i32_1 = arith.constant 0 : i32
    return %c0_i32, %c0_i32_0 : i32, i32
  }
  func.func @transform_15(%arg0: i32) -> (i32, i32) {
    %c0_i32 = arith.constant 0 : i32
    %c0_i32_0 = arith.constant 0 : i32
    %c0_i32_1 = arith.constant 0 : i32
    return %c0_i32, %c0_i32_0 : i32, i32
  }
  func.func @transform_16(%arg0: i32) -> (i32, i32) {
    %c0_i32 = arith.constant 0 : i32
    %c0_i32_0 = arith.constant 0 : i32
    %c0_i32_1 = arith.constant 0 : i32
    return %c0_i32, %c0_i32_0 : i32, i32
  }
  func.func @transform_17(%arg0: i32) -> (i32, i32) {
    %c0_i32 = arith.constant 0 : i32
    %c0_i32_0 = arith.constant 0 : i32
    %c0_i32_1 = arith.constant 0 : i32
    return %c0_i32, %c0_i32_0 : i32, i32
  }
  func.func @transform_18(%arg0: i32) -> (i32, i32) {
    %c0_i32 = arith.constant 0 : i32
    %c0_i32_0 = arith.constant 0 : i32
    %c0_i32_1 = arith.constant 0 : i32
    return %c0_i32, %c0_i32_0 : i32, i32
  }
  func.func @transform_19(%arg0: i32) -> (i32, i32) {
    %c0_i32 = arith.constant 0 : i32
    %c0_i32_0 = arith.constant 0 : i32
    %c0_i32_1 = arith.constant 0 : i32
    return %c0_i32, %c0_i32_0 : i32, i32
  }
  func.func @transform_20(%arg0: i32) -> (i32, i32) {
    %c0_i32 = arith.constant 0 : i32
    %c0_i32_0 = arith.constant 0 : i32
    %c0_i32_1 = arith.constant 0 : i32
    return %c0_i32, %c0_i32_0 : i32, i32
  }
  func.func @transform_21(%arg0: i32) -> (i32, i32) {
    %c0_i32 = arith.constant 0 : i32
    %c0_i32_0 = arith.constant 0 : i32
    %c0_i32_1 = arith.constant 0 : i32
    return %c0_i32, %c0_i32_0 : i32, i32
  }
  func.func @transform_22(%arg0: i32) -> (i32, i32) {
    %c0_i32 = arith.constant 0 : i32
    %c0_i32_0 = arith.constant 0 : i32
    %c0_i32_1 = arith.constant 0 : i32
    return %c0_i32, %c0_i32_0 : i32, i32
  }
  func.func @transform_23(%arg0: i32) -> (i32, i32) {
    %c0_i32 = arith.constant 0 : i32
    %c0_i32_0 = arith.constant 0 : i32
    return %arg0, %c0_i32 : i32, i32
  }
}

</mosaic_0001>

<bundles_post_ra>
// kernel: _forward_impl.1
= control target key start
LH: loop header
LB: loop body
LE: loop exit
PB: predicated region body
PF: predicated region fallthrough
CT: control target
= control target key end

     0   :  { %s8521_s0 = inlined_call_operand.vmem [shape: bf16[8,8,16], index: 0, kind: input, shape index: {}]   ;;  %s8522_s1 = inlined_call_operand.hbm [shape: bf16[16,256], index: 1, kind: input, shape index: {}]   ;;  %s8523_s2 = inlined_call_operand.hbm [shape: bf16[16,256], index: 2, kind: input, shape index: {}]   ;;  %s8524_s3 = inlined_call_operand.hbm [shape: f32[1,256], index: 3, kind: input, shape index: {}]   ;;  %s8525_s4 = inlined_call_operand.vmem [shape: bf16[64,256], index: 4, kind: input, shape index: {}]   ;;  %s8526_s5 = inlined_call_operand.hbm [shape: bf16[32,256], index: 5, kind: input, shape index: {}]   ;;  %s8527_s6 = inlined_call_operand.hbm [shape: bf16[32,256], index: 6, kind: input, shape index: {}]   ;;  %s8528_s7 = inlined_call_operand.hbm [shape: bf16[32,256], index: 7, kind: input, shape index: {}]   ;;  %s8529_s8 = inlined_call_operand.hbm [shape: bf16[32,256], index: 8, kind: input, shape index: {}]   ;;  %s8530_s9 = inlined_call_operand.vmem [shape: f32[1,256], index: 9, kind: input, shape index: {}]   ;;  %s8531_s10 = inlined_call_operand.vmem [shape: bf16[64,256], index: 10, kind: input, shape index: {}]   ;;  %s8532_s11 = inlined_call_operand.hbm [shape: bf16[32,256], index: 11, kind: input, shape index: {}]   ;;  %s8533_s12 = inlined_call_operand.hbm [shape: bf16[32,256], index: 12, kind: input, shape index: {}]   ;;  %s8534_s13 = inlined_call_operand.hbm [shape: bf16[32,256], index: 13, kind: input, shape index: {}]   ;;  %s8535_s14 = inlined_call_operand.hbm [shape: bf16[32,256], index: 14, kind: input, shape index: {}]   ;;  %s8536_s15 = inlined_call_operand.hbm [shape: bf16[32,256], index: 15, kind: input, shape index: {}]   ;;  %s8537_s16 = inlined_call_operand.hbm [shape: bf16[32,256], index: 16, kind: input, shape index: {}]   ;;  %s8538_s17 = inlined_call_operand.vmem [shape: bf16[32,256], index: 17, kind: input, shape index: {}]   ;;  %s8539_s18 = inlined_call_operand.hbm [shape: bf16[32,256], index: 18, kind: input, shape index: {}]   ;;  %s8540_s19 = inlined_call_operand.vmem [shape: f32[1,256], index: 19, kind: input, shape index: {}]   ;;  %s8541_s20 = inlined_call_operand.hbm [shape: bf16[64,256], index: 20, kind: input, shape index: {}]   ;;  %s8542_s21 = inlined_call_operand.vmem [shape: bf16[64,4], index: 21, kind: input, shape index: {}]   ;;  %s8543_s22 = inlined_call_operand.vmem [shape: f32[1,4], index: 22, kind: input, shape index: {}]   ;;  %s8544_s23 = inlined_call_operand.vmem [shape: f32[8,4], index: 23, kind: output, shape index: {}]  }
   0x1   :  { %8554 = sst [smem:[#allocation40_spill]] %s8521_s0 }
   0x2   :  { %8555 = sst [smem:[#allocation41_spill]] %s8522_s1 }
   0x3   :  { %8556 = sst [smem:[#allocation42_spill]] %s8523_s2 }
   0x4   :  { %8557 = sst [smem:[#allocation43_spill]] %s8524_s3 }
   0x5   :  { %8558 = sst [smem:[#allocation44_spill]] %s8525_s4 }
   0x6   :  { %8559 = sst [smem:[#allocation45_spill]] %s8526_s5 }
   0x7   :  { %8560 = sst [smem:[#allocation46_spill]] %s8527_s6 }
   0x8   :  { %8561 = sst [smem:[#allocation47_spill]] %s8528_s7 }
   0x9   :  { %8562 = sst [smem:[#allocation48_spill]] %s8542_s21 }
   0xa   :  { %8563 = sst [smem:[#allocation49_spill]] %s8543_s22 }
   0xb   :  { %8564 = sst [smem:[#allocation50_spill]] %s8544_s23 }
   0xc   :  { %28 = vsyncpa [#allocation10], 0 }
   0xd   :  { %29 = vsyncpa [#allocation12], 0 }
   0xe   :  { %30 = vsyncpa [#allocation15], 0 }
   0xf   :  { %31 = vsyncpa [#allocation18], 0 }
  0x10   :  { %32 = vsyncpa [#allocation21], 0 }
  0x11   :  { %33 = vsyncpa [#allocation24], 0 }
  0x12   :  { %34 = vsyncpa [#allocation27], 0 }
  0x13   :  { %35 = vsyncpa [#allocation30], 0  ;;  %s7219_s4 = smov [#allocation11]   ;;  %s7220_s24 = smov [#allocation14]  }
  0x14   :  { %s55_s30 = sshll.u32 %s7219_s4, 4  ;;  %s79_s25 = sshll.u32 %s7220_s24, 4  ;;  %s56_s30 = int_to_ptr.vmem [resolvable:$true] %s55_s30  ;;  %s7361_s25 = int_to_ptr.vmem [resolvable:$true] %s79_s25 }
  0x15   :  { %s8565_s26 = sld [smem:[#allocation42_spill]] }
  0x1b   :  { %s6873_s2 = scalar_lea.hbm %s8565_s26, 256 }
  0x1c   :  { %p6874_p0 = scmp.ne.s32.totalorder %s8565_s26, %s6873_s2  ;;  %p6877_p1 = scmp.lt.u32.totalorder %s6873_s2, %s8565_s26 }
  0x1e   :  { %p6879_p2 = pnand %p6877_p1, %p6874_p0 }
  0x20   :  { %6882 = shalt.err (!%p6879_p2)
}
  0x21   :  { %s6883_s29 = scalar_lea.vmem %s56_s30, 256  ;;  %p6888_p4 = scmp.lt.s32.totalorder %s56_s30, %s56_s30 }
  0x22   :  { %p6884_p3 = scmp.ne.s32.totalorder %s56_s30, %s6883_s29  ;;  %p6889_p5 = scmp.lt.s32.totalorder %s6883_s29, %s6883_s29 }
  0x24   :  { %p6890_p6 = por %p6889_p5, %p6888_p4 }
  0x26   :  { %p6891_p7 = pnand %p6890_p6, %p6884_p3 }
  0x28   :  { %6894 = shalt.err (!%p6891_p7)
}
  0x29   :  { %s7221_s3 = smov 128   ;;  %s7222_s0 = smov 8  }
  0x2a   :  { %61 = dma.hbm_to_vmem [thread:$0]  %s8565_s26, 256, %s56_s30, [#allocation12], %s7221_s3, %s7221_s3, %s7222_s0  }
  0x2b   :  { %s8566_s2 = sld [smem:[#allocation45_spill]] }
  0x31   :  { %s6895_s6 = scalar_lea.hbm %s8566_s2, 512 }
  0x32   :  { %p6896_p8 = scmp.ne.s32.totalorder %s8566_s2, %s6895_s6  ;;  %p6899_p9 = scmp.lt.u32.totalorder %s6895_s6, %s8566_s2 }
  0x34   :  { %p6901_p10 = pnand %p6899_p9, %p6896_p8 }
  0x36   :  { %6904 = shalt.err (!%p6901_p10)
}
  0x37   :  { %s6905_s23 = scalar_lea.vmem %s7361_s25, 512  ;;  %p6910_p12 = scmp.lt.s32.totalorder %s7361_s25, %s7361_s25 }
  0x38   :  { %p6906_p11 = scmp.ne.s32.totalorder %s7361_s25, %s6905_s23  ;;  %p6911_p13 = scmp.lt.s32.totalorder %s6905_s23, %s6905_s23 }
  0x3a   :  { %p6912_p0 = por %p6911_p13, %p6910_p12 }
  0x3c   :  { %p6913_p1 = pnand %p6912_p0, %p6906_p11 }
  0x3e   :  { %6916 = shalt.err (!%p6913_p1)
}
  0x3f   :  { %85 = dma.hbm_to_vmem [thread:$0]  %s8566_s2, 512, %s7361_s25, [#allocation15], %s7221_s3, %s7221_s3, %s7222_s0  }
  0x40   :  { %s7223_s4 = smov [#allocation17]   ;;  %s7224_s5 = smov [#allocation20]  }
  0x41   :  { %s103_s24 = sshll.u32 %s7223_s4, 4  ;;  %s131_s1 = sshll.u32 %s7224_s5, 4  ;;  %s104_s24 = int_to_ptr.vmem [resolvable:$true] %s103_s24  ;;  %s7398_s1 = int_to_ptr.vmem [resolvable:$true] %s131_s1 }
  0x42   :  { %s8567_s27 = sld [smem:[#allocation47_spill]] }
  0x48   :  { %s6917_s7 = scalar_lea.hbm %s8567_s27, 512 }
  0x49   :  { %p6918_p2 = scmp.ne.s32.totalorder %s8567_s27, %s6917_s7  ;;  %p6921_p3 = scmp.lt.u32.totalorder %s6917_s7, %s8567_s27 }
  0x4b   :  { %p6923_p4 = pnand %p6921_p3, %p6918_p2 }
  0x4d   :  { %6926 = shalt.err (!%p6923_p4)
}
  0x4e   :  { %s6927_s25 = scalar_lea.vmem %s104_s24, 512  ;;  %p6932_p6 = scmp.lt.s32.totalorder %s104_s24, %s104_s24 }
  0x4f   :  { %p6928_p5 = scmp.ne.s32.totalorder %s104_s24, %s6927_s25  ;;  %p6933_p7 = scmp.lt.s32.totalorder %s6927_s25, %s6927_s25 }
  0x51   :  { %p6934_p8 = por %p6933_p7, %p6932_p6 }
  0x53   :  { %p6935_p9 = pnand %p6934_p8, %p6928_p5 }
  0x55   :  { %6938 = shalt.err (!%p6935_p9)
}
  0x56   :  { %109 = dma.hbm_to_vmem [thread:$0]  %s8567_s27, 512, %s104_s24, [#allocation18], %s7221_s3, %s7221_s3, %s7222_s0  }
  0x57   :  { %s6939_s21 = scalar_lea.hbm %s8532_s11, 512 }
  0x58   :  { %p6940_p10 = scmp.ne.s32.totalorder %s8532_s11, %s6939_s21  ;;  %p6943_p11 = scmp.lt.u32.totalorder %s6939_s21, %s8532_s11 }
  0x5a   :  { %p6945_p12 = pnand %p6943_p11, %p6940_p10 }
  0x5c   :  { %6948 = shalt.err (!%p6945_p12)
}
  0x5d   :  { %s6949_s7 = scalar_lea.vmem %s7398_s1, 512  ;;  %p6954_p0 = scmp.lt.s32.totalorder %s7398_s1, %s7398_s1 }
  0x5e   :  { %p6950_p13 = scmp.ne.s32.totalorder %s7398_s1, %s6949_s7  ;;  %p6955_p1 = scmp.lt.s32.totalorder %s6949_s7, %s6949_s7 }
  0x60   :  { %p6956_p2 = por %p6955_p1, %p6954_p0 }
  0x62   :  { %p6957_p3 = pnand %p6956_p2, %p6950_p13 }
  0x64   :  { %6960 = shalt.err (!%p6957_p3)
}
  0x65   :  { %137 = dma.hbm_to_vmem [thread:$0]  %s8532_s11, 512, %s7398_s1, [#allocation21], %s7221_s3, %s7221_s3, %s7222_s0  }
  0x66   :  { %s7225_s28 = smov [#allocation23]   ;;  %s7226_s25 = smov [#allocation26]  }
  0x67   :  { %s155_s29 = sshll.u32 %s7225_s28, 4  ;;  %s179_s2 = sshll.u32 %s7226_s25, 4  ;;  %s156_s29 = int_to_ptr.vmem [resolvable:$true] %s155_s29  ;;  %s7435_s2 = int_to_ptr.vmem [resolvable:$true] %s179_s2 }
  0x68   :  { %s6961_s4 = scalar_lea.hbm %s8534_s13, 512 }
  0x69   :  { %p6962_p4 = scmp.ne.s32.totalorder %s8534_s13, %s6961_s4  ;;  %p6965_p5 = scmp.lt.u32.totalorder %s6961_s4, %s8534_s13 }
  0x6b   :  { %p6967_p6 = pnand %p6965_p5, %p6962_p4 }
  0x6d   :  { %6970 = shalt.err (!%p6967_p6)
}
  0x6e   :  { %s6971_s11 = scalar_lea.vmem %s156_s29, 512  ;;  %p6976_p8 = scmp.lt.s32.totalorder %s156_s29, %s156_s29 }
  0x6f   :  { %p6972_p7 = scmp.ne.s32.totalorder %s156_s29, %s6971_s11  ;;  %p6977_p9 = scmp.lt.s32.totalorder %s6971_s11, %s6971_s11 }
  0x71   :  { %p6978_p10 = por %p6977_p9, %p6976_p8 }
  0x73   :  { %p6979_p11 = pnand %p6978_p10, %p6972_p7 }
  0x75   :  { %6982 = shalt.err (!%p6979_p11)
}
  0x76   :  { %161 = dma.hbm_to_vmem [thread:$0]  %s8534_s13, 512, %s156_s29, [#allocation24], %s7221_s3, %s7221_s3, %s7222_s0  }
  0x77   :  { %s6983_s27 = scalar_lea.hbm %s8536_s15, 512 }
  0x78   :  { %p6984_p12 = scmp.ne.s32.totalorder %s8536_s15, %s6983_s27  ;;  %p6987_p13 = scmp.lt.u32.totalorder %s6983_s27, %s8536_s15 }
  0x7a   :  { %p6989_p0 = pnand %p6987_p13, %p6984_p12 }
  0x7c   :  { %6992 = shalt.err (!%p6989_p0)
}
  0x7d   :  { %s6993_s4 = scalar_lea.vmem %s7435_s2, 512  ;;  %p6998_p2 = scmp.lt.s32.totalorder %s7435_s2, %s7435_s2 }
  0x7e   :  { %p6994_p1 = scmp.ne.s32.totalorder %s7435_s2, %s6993_s4  ;;  %p6999_p3 = scmp.lt.s32.totalorder %s6993_s4, %s6993_s4 }
  0x80   :  { %p7000_p4 = por %p6999_p3, %p6998_p2 }
  0x82   :  { %p7001_p5 = pnand %p7000_p4, %p6994_p1 }
  0x84   :  { %7004 = shalt.err (!%p7001_p5)
}
  0x85   :  { %185 = dma.hbm_to_vmem [thread:$0]  %s8536_s15, 512, %s7435_s2, [#allocation27], %s7221_s3, %s7221_s3, %s7222_s0  }
  0x86   :  { %s7227_s21 = smov [#allocation29]   ;;  %s7228_s5 = smov [#allocation9]  }
  0x87   :  { %s205_s22 = sshll.u32 %s7227_s21, 4  ;;  %s43_s6 = sshll.u32 %s7228_s5, 4  ;;  %s206_s22 = int_to_ptr.vmem [resolvable:$true] %s205_s22  ;;  %s7472_s6 = int_to_ptr.vmem [resolvable:$true] %s43_s6 }
  0x88   :  { %s7005_s23 = scalar_lea.hbm %s8539_s18, 512 }
  0x89   :  { %p7006_p6 = scmp.ne.s32.totalorder %s8539_s18, %s7005_s23  ;;  %p7009_p7 = scmp.lt.u32.totalorder %s7005_s23, %s8539_s18 }
  0x8b   :  { %p7011_p8 = pnand %p7009_p7, %p7006_p6 }
  0x8d   :  { %7014 = shalt.err (!%p7011_p8)
}
  0x8e   :  { %s7015_s15 = scalar_lea.vmem %s206_s22, 512  ;;  %p7020_p10 = scmp.lt.s32.totalorder %s206_s22, %s206_s22 }
  0x8f   :  { %p7016_p9 = scmp.ne.s32.totalorder %s206_s22, %s7015_s15  ;;  %p7021_p11 = scmp.lt.s32.totalorder %s7015_s15, %s7015_s15 }
  0x91   :  { %p7022_p12 = por %p7021_p11, %p7020_p10 }
  0x93   :  { %p7023_p13 = pnand %p7022_p12, %p7016_p9 }
  0x95   :  { %7026 = shalt.err (!%p7023_p13)
}
  0x96   :  { %211 = dma.hbm_to_vmem [thread:$0]  %s8539_s18, 512, %s206_s22, [#allocation30], %s7221_s3, %s7221_s3, %s7222_s0  }
  0x97   :  { %s8568_s4 = sld [smem:[#allocation41_spill]] }
  0x9d   :  { %s7027_s13 = scalar_lea.hbm %s8568_s4, 256 }
  0x9e   :  { %p7028_p0 = scmp.ne.s32.totalorder %s8568_s4, %s7027_s13  ;;  %p7031_p1 = scmp.lt.u32.totalorder %s7027_s13, %s8568_s4 }
  0xa0   :  { %p7033_p2 = pnand %p7031_p1, %p7028_p0 }
  0xa2   :  { %7036 = shalt.err (!%p7033_p2)
}
  0xa3   :  { %s7037_s1 = scalar_lea.vmem %s7472_s6, 256  ;;  %p7042_p4 = scmp.lt.s32.totalorder %s7472_s6, %s7472_s6 }
  0xa4   :  { %p7038_p3 = scmp.ne.s32.totalorder %s7472_s6, %s7037_s1  ;;  %p7043_p5 = scmp.lt.s32.totalorder %s7037_s1, %s7037_s1 }
  0xa6   :  { %p7044_p6 = por %p7043_p5, %p7042_p4 }
  0xa8   :  { %p7045_p7 = pnand %p7044_p6, %p7038_p3 }
  0xaa   :  { %7048 = shalt.err (!%p7045_p7)
}
  0xab   :  { %49 = dma.hbm_to_vmem [thread:$0]  %s8568_s4, 256, %s7472_s6, [#allocation10], %s7221_s3, %s7221_s3, %s7222_s0  }
  0xac   :  { %s7229_s23 = smov [#allocation13]   ;;  %s7230_s24 = smov [#allocation16]  }
  0xad   :  { %s68_s7 = sshll.u32 %s7229_s23, 4  ;;  %s91_s27 = sshll.u32 %s7230_s24, 4  ;;  %s69_s7 = int_to_ptr.vmem [resolvable:$true] %s68_s7  ;;  %s7509_s27 = int_to_ptr.vmem [resolvable:$true] %s91_s27 }
  0xae   :  { %s8569_s2 = sld [smem:[#allocation43_spill]] }
  0xb4   :  { %s7049_s25 = scalar_lea.hbm %s8569_s2, 32 }
  0xb5   :  { %p7050_p8 = scmp.ne.s32.totalorder %s8569_s2, %s7049_s25  ;;  %p7053_p9 = scmp.lt.u32.totalorder %s7049_s25, %s8569_s2 }
  0xb7   :  { %p7055_p10 = pnand %p7053_p9, %p7050_p8 }
  0xb9   :  { %7058 = shalt.err (!%p7055_p10)
}
  0xba   :  { %s7059_s6 = scalar_lea.vmem %s69_s7, 32  ;;  %p7064_p12 = scmp.lt.s32.totalorder %s69_s7, %s69_s7 }
  0xbb   :  { %p7060_p11 = scmp.ne.s32.totalorder %s69_s7, %s7059_s6  ;;  %p7065_p13 = scmp.lt.s32.totalorder %s7059_s6, %s7059_s6 }
  0xbd   :  { %p7066_p0 = por %p7065_p13, %p7064_p12 }
  0xbf   :  { %p7067_p1 = pnand %p7066_p0, %p7060_p11 }
  0xc1   :  { %7070 = shalt.err (!%p7067_p1)
}
  0xc2   :  { %71 = dma.hbm_to_vmem [thread:$0]  %s8569_s2, 32, %s69_s7, [#allocation12]  }
  0xc3   :  { %s8570_s1 = sld [smem:[#allocation46_spill]] }
  0xc9   :  { %s7071_s18 = scalar_lea.hbm %s8570_s1, 512 }
  0xca   :  { %p7072_p2 = scmp.ne.s32.totalorder %s8570_s1, %s7071_s18  ;;  %p7075_p3 = scmp.lt.u32.totalorder %s7071_s18, %s8570_s1 }
  0xcc   :  { %p7077_p4 = pnand %p7075_p3, %p7072_p2 }
  0xce   :  { %7080 = shalt.err (!%p7077_p4)
}
  0xcf   :  { %s7081_s15 = scalar_lea.vmem %s7509_s27, 512  ;;  %p7086_p6 = scmp.lt.s32.totalorder %s7509_s27, %s7509_s27 }
  0xd0   :  { %p7082_p5 = scmp.ne.s32.totalorder %s7509_s27, %s7081_s15  ;;  %p7087_p7 = scmp.lt.s32.totalorder %s7081_s15, %s7081_s15 }
  0xd2   :  { %p7088_p8 = por %p7087_p7, %p7086_p6 }
  0xd4   :  { %p7089_p9 = pnand %p7088_p8, %p7082_p5 }
  0xd6   :  { %7092 = shalt.err (!%p7089_p9)
}
  0xd7   :  { %97 = dma.hbm_to_vmem [thread:$0]  %s8570_s1, 512, %s7509_s27, [#allocation15], %s7221_s3, %s7221_s3, %s7222_s0  }
  0xd8   :  { %s7231_s25 = smov [#allocation19]   ;;  %s7232_s26 = smov [#allocation22]  }
  0xd9   :  { %s115_s30 = sshll.u32 %s7231_s25, 4  ;;  %s143_s13 = sshll.u32 %s7232_s26, 4  ;;  %s116_s30 = int_to_ptr.vmem [resolvable:$true] %s115_s30  ;;  %s7543_s13 = int_to_ptr.vmem [resolvable:$true] %s143_s13 }
  0xda   :  { %s7093_s4 = scalar_lea.hbm %s8529_s8, 512 }
  0xdb   :  { %p7094_p10 = scmp.ne.s32.totalorder %s8529_s8, %s7093_s4  ;;  %p7097_p11 = scmp.lt.u32.totalorder %s7093_s4, %s8529_s8 }
  0xdd   :  { %p7099_p12 = pnand %p7097_p11, %p7094_p10 }
  0xdf   :  { %7102 = shalt.err (!%p7099_p12)
}
  0xe0   :  { %s7103_s27 = scalar_lea.vmem %s116_s30, 512  ;;  %p7108_p0 = scmp.lt.s32.totalorder %s116_s30, %s116_s30 }
  0xe1   :  { %p7104_p13 = scmp.ne.s32.totalorder %s116_s30, %s7103_s27  ;;  %p7109_p1 = scmp.lt.s32.totalorder %s7103_s27, %s7103_s27 }
  0xe3   :  { %p7110_p2 = por %p7109_p1, %p7108_p0 }
  0xe5   :  { %p7111_p3 = pnand %p7110_p2, %p7104_p13 }
  0xe7   :  { %7114 = shalt.err (!%p7111_p3)
}
  0xe8   :  { %121 = dma.hbm_to_vmem [thread:$0]  %s8529_s8, 512, %s116_s30, [#allocation18], %s7221_s3, %s7221_s3, %s7222_s0  }
  0xe9   :  { %s7115_s28 = scalar_lea.hbm %s8533_s12, 512 }
  0xea   :  { %p7116_p4 = scmp.ne.s32.totalorder %s8533_s12, %s7115_s28  ;;  %p7119_p5 = scmp.lt.u32.totalorder %s7115_s28, %s8533_s12 }
  0xec   :  { %p7121_p6 = pnand %p7119_p5, %p7116_p4 }
  0xee   :  { %7124 = shalt.err (!%p7121_p6)
}
  0xef   :  { %s7125_s26 = scalar_lea.vmem %s7543_s13, 512  ;;  %p7130_p8 = scmp.lt.s32.totalorder %s7543_s13, %s7543_s13 }
  0xf0   :  { %p7126_p7 = scmp.ne.s32.totalorder %s7543_s13, %s7125_s26  ;;  %p7131_p9 = scmp.lt.s32.totalorder %s7125_s26, %s7125_s26 }
  0xf2   :  { %p7132_p10 = por %p7131_p9, %p7130_p8 }
  0xf4   :  { %p7133_p11 = pnand %p7132_p10, %p7126_p7 }
  0xf6   :  { %7136 = shalt.err (!%p7133_p11)
}
  0xf7   :  { %149 = dma.hbm_to_vmem [thread:$0]  %s8533_s12, 512, %s7543_s13, [#allocation21], %s7221_s3, %s7221_s3, %s7222_s0  }
  0xf8   :  { %s7233_s29 = smov [#allocation25]   ;;  %s7234_s4 = smov [#allocation28]  }
  0xf9   :  { %s167_s6 = sshll.u32 %s7233_s29, 4  ;;  %s191_s21 = sshll.u32 %s7234_s4, 4  ;;  %s168_s6 = int_to_ptr.vmem [resolvable:$true] %s167_s6  ;;  %s7580_s21 = int_to_ptr.vmem [resolvable:$true] %s191_s21 }
  0xfa   :  { %s7137_s18 = scalar_lea.hbm %s8535_s14, 512 }
  0xfb   :  { %p7138_p12 = scmp.ne.s32.totalorder %s8535_s14, %s7137_s18  ;;  %p7141_p13 = scmp.lt.u32.totalorder %s7137_s18, %s8535_s14 }
  0xfd   :  { %p7143_p0 = pnand %p7141_p13, %p7138_p12 }
  0xff   :  { %7146 = shalt.err (!%p7143_p0)
}
 0x100   :  { %s7147_s12 = scalar_lea.vmem %s168_s6, 512  ;;  %p7152_p2 = scmp.lt.s32.totalorder %s168_s6, %s168_s6 }
 0x101   :  { %p7148_p1 = scmp.ne.s32.totalorder %s168_s6, %s7147_s12  ;;  %p7153_p3 = scmp.lt.s32.totalorder %s7147_s12, %s7147_s12 }
 0x103   :  { %p7154_p4 = por %p7153_p3, %p7152_p2 }
 0x105   :  { %p7155_p5 = pnand %p7154_p4, %p7148_p1 }
 0x107   :  { %7158 = shalt.err (!%p7155_p5)
}
 0x108   :  { %173 = dma.hbm_to_vmem [thread:$0]  %s8535_s14, 512, %s168_s6, [#allocation24], %s7221_s3, %s7221_s3, %s7222_s0  }
 0x109   :  { %s7159_s7 = scalar_lea.hbm %s8537_s16, 512 }
 0x10a   :  { %p7160_p6 = scmp.ne.s32.totalorder %s8537_s16, %s7159_s7  ;;  %p7163_p7 = scmp.lt.u32.totalorder %s7159_s7, %s8537_s16 }
 0x10c   :  { %p7165_p8 = pnand %p7163_p7, %p7160_p6 }
 0x10e   :  { %7168 = shalt.err (!%p7165_p8)
}
 0x10f   :  { %s7169_s30 = scalar_lea.vmem %s7580_s21, 512  ;;  %p7174_p10 = scmp.lt.s32.totalorder %s7580_s21, %s7580_s21 }
 0x110   :  { %p7170_p9 = scmp.ne.s32.totalorder %s7580_s21, %s7169_s30  ;;  %p7175_p11 = scmp.lt.s32.totalorder %s7169_s30, %s7169_s30 }
 0x112   :  { %p7176_p12 = por %p7175_p11, %p7174_p10 }
 0x114   :  { %p7177_p13 = pnand %p7176_p12, %p7170_p9 }
 0x116   :  { %7180 = shalt.err (!%p7177_p13)
}
 0x117   :  { %197 = dma.hbm_to_vmem [thread:$0]  %s8537_s16, 512, %s7580_s21, [#allocation27], %s7221_s3, %s7221_s3, %s7222_s0  }
 0x118   :  { %s7235_s6 = smov [#allocation31]   ;;  %s7181_s18 = scalar_lea.hbm %s8541_s20, 1024 }
 0x119   :  { %s219_s4 = sshll.u32 %s7235_s6, 4  ;;  %p7182_p0 = scmp.ne.s32.totalorder %s8541_s20, %s7181_s18  ;;  %s220_s4 = int_to_ptr.vmem [resolvable:$true] %s219_s4 }
 0x11a   :  { %p7185_p1 = scmp.lt.u32.totalorder %s7181_s18, %s8541_s20 }
 0x11c   :  { %p7187_p2 = pnand %p7185_p1, %p7182_p0 }
 0x11e   :  { %7190 = shalt.err (!%p7187_p2)
}
 0x11f   :  { %s7191_s12 = scalar_lea.vmem %s220_s4, 1024  ;;  %p7196_p4 = scmp.lt.s32.totalorder %s220_s4, %s220_s4 }
 0x120   :  { %p7192_p3 = scmp.ne.s32.totalorder %s220_s4, %s7191_s12  ;;  %p7197_p5 = scmp.lt.s32.totalorder %s7191_s12, %s7191_s12 }
 0x122   :  { %p7198_p6 = por %p7197_p5, %p7196_p4 }
 0x124   :  { %p7199_p7 = pnand %p7198_p6, %p7192_p3 }
 0x126   :  { %7202 = shalt.err (!%p7199_p7)
}
 0x127   :  { %225 = dma.hbm_to_vmem [thread:$0]  %s8541_s20, 1024, %s220_s4, [#allocation30], %s7221_s3, %s7221_s3, %s7222_s0  }
 0x128   :  { %7203 = dma.done.wait [#allocation10], 256  }
 0x129   :  { %7204 = vsyncadd [#allocation10], 4294967040 }
 0x12a   :  { %7205 = dma.done.wait [#allocation12], 288  }
 0x12b   :  { %7206 = vsyncadd [#allocation12], 4294967008 }
 0x12c   :  { %7207 = dma.done.wait [#allocation15], 1024  }
 0x12d   :  { %7208 = vsyncadd [#allocation15], 4294966272 }
 0x12e   :  { %7209 = dma.done.wait [#allocation18], 1024  }
 0x12f   :  { %7210 = vsyncadd [#allocation18], 4294966272 }
 0x130   :  { %7211 = dma.done.wait [#allocation21], 1024  }
 0x131   :  { %7212 = vsyncadd [#allocation21], 4294966272 }
 0x132   :  { %7213 = dma.done.wait [#allocation24], 1024  }
 0x133   :  { %7214 = vsyncadd [#allocation24], 4294966272 }
 0x134   :  { %7215 = dma.done.wait [#allocation27], 1024  }
 0x135   :  { %7216 = vsyncadd [#allocation27], 4294966272 }
 0x136   :  { %7217 = dma.done.wait [#allocation30], 1536  }
 0x137   :  { %7218 = vsyncadd [#allocation30], 4294965760  ;;  %v7236_v0 = vmov 0   ;;  %v6427_v1 = vld [vmem:[#allocation11 + $0x4] ss:$8 sps:$4 sm:$0xff]   ;;  %s8571_s0 = sld [smem:[#allocation40_spill]]  ;;  %v406_v17 = vlaneseq }
 0x138   :  { %363 = vmatprep.mubr.bf16.mxu0 %v7236_v0  ;;  %458 = vmatprep.mubr.bf16.mxu1 %v7236_v0  ;;  %v6429_v2 = vld [vmem:[#allocation9 + $0x4] ss:$8 sps:$4 sm:$0xff]   ;;  %v6431_v3 = vld [vmem:[#allocation11] ss:$8 sps:$4 sm:$0xff]   ;;  %v6432_v4 = vld [vmem:[#allocation9] ss:$8 sps:$4 sm:$0xff]  }
 0x139   :  { %331 = vmatprep.subr.bf16.mxu0 %v6427_v1  ;;  %426 = vmatprep.subr.bf16.mxu1 %v6429_v2  ;;  %vm318_vm0 = vcmask 130048   ;;  %s8572_s28 = sld [smem:[#allocation44_spill]]  ;;  %v407_v18 = vshrl.u32 %v406_v17, 7  ;;  %v404_v20 = vld [vmem:[#allocation13] sm:$0x3]  ;;  %s7237_s21 = smov 64  }
 0x13a   :  { %332 = vmatpush1.bf16.msra.mxu0 %v6431_v3  ;;  %427 = vmatpush1.bf16.msra.mxu1 %v6432_v4  ;;  %vm723_vm1 = vcmask 257024   ;;  %vm643_vm2 = vcmask 523264   ;;  %s7238_s20 = smov 96   ;;  %vm1766_vm3 = vcmask 261120   ;;  %s8573_s11 = sld [smem:[#allocation48_spill]]  ;;  %vm7240_vm4 = vmmov 0  }
 0x13b   :  { %v7730_v19 = vsub.s32 0, %v407_v18  ;;  %v7732_v21 = vsub.s32 1, %v407_v18  ;;  %s8574_s12 = sld [smem:[#allocation49_spill]]  ;;  %vm5741_vm5 = vcmask 31744  }
 0x13d   :  { %v6433_v5 = vld [vmem:[%s8571_s0] sm:$0xff]   ;;  %v6437_v11 = vld [vmem:[%s8571_s0 + $0x8] sm:$0xff]   ;;  %v6441_v15 = vld [vmem:[%s8571_s0 + $0x10] sm:$0xff]   ;;  %v409_v25 = vrot.slane %v404_v20, %v7730_v19  ;;  %v413_v28 = vrot.slane %v404_v20, %v7732_v21 }
 0x13e   :  { %5761 = vmatmul.mubr.msk.bf16.vlgmr.msra.gmra.mrb[0].mxu0 %vm318_vm0, %v6433_v5  ;;  %5767 = vmatmul.mubr.msk.bf16.vlgmr.msra.gmra.mrb[0].mxu1 %vm318_vm0, %v6433_v5  ;;  %v6445_v16 = vld [vmem:[%s8571_s0 + $0x18] sm:$0xff]   ;;  %s8575_s0 = sld [smem:[#allocation50_spill]] }
 0x13f   :  { %v7640_v6 = vld [vmem:[%s8572_s28] ss:$8 sps:$4 sm:$0xff]   ;;  %v7645_v7 = vld [vmem:[%s8572_s28 + $0x4] ss:$8 sps:$4 sm:$0xff]   ;;  %v7654_v8 = vld [vmem:[%s8572_s28 + $0x14] ss:$8 sps:$4 sm:$0xff]   ;;  %373 = vmatprep.mubr.bf16.mxu0 %v7236_v0  ;;  %468 = vmatprep.mubr.bf16.mxu1 %v7236_v0 }
 0x140   :  { %647 = vmatprep.subr.bf16.mxu0 %v7645_v7  ;;  %785 = vmatprep.subr.bf16.mxu1 %v7645_v7  ;;  %v7661_v9 = vld [vmem:[%s8572_s28 + $0x10] ss:$8 sps:$4 sm:$0xff]   ;;  %v7668_v10 = vld [vmem:[%s8572_s28 + $0x24] ss:$8 sps:$4 sm:$0xff]   ;;  %v7677_v12 = vld [vmem:[%s8572_s28 + $0x20] ss:$8 sps:$4 sm:$0xff]  }
 0x141   :  { %648 = vmatpush1.bf16.msra.mxu0 %v7640_v6  ;;  %786 = vmatpush1.bf16.msra.mxu1 %v7640_v6  ;;  %v7684_v13 = vld [vmem:[%s8572_s28 + $0x34] ss:$8 sps:$4 sm:$0xff]   ;;  %v7693_v14 = vld [vmem:[%s8572_s28 + $0x30] ss:$8 sps:$4 sm:$0xff]  }
 0x142   :  { %649 = vmatprep.subr.bf16.mxu0 %v7654_v8  ;;  %787 = vmatprep.subr.bf16.mxu1 %v7654_v8 }
 0x145   :  { %650 = vmatpush1.bf16.msra.mxu0 %v7661_v9  ;;  %788 = vmatpush1.bf16.msra.mxu1 %v7661_v9 }
 0x146   :  { %651 = vmatprep.subr.bf16.mxu0 %v7668_v10  ;;  %5762 = vmatmul.mubr.msk.bf16.gmra.mrb[4].mxu0 %vm318_vm0, %v6437_v11 }
 0x147   :  { %5768 = vmatmul.mubr.msk.bf16.gmra.mrb[4].mxu1 %vm318_vm0, %v6437_v11  ;;  %383 = vmatprep.mubr.bf16.mxu0 %v7236_v0 }
 0x148   :  { %478 = vmatprep.mubr.bf16.mxu1 %v7236_v0  ;;  %789 = vmatprep.subr.bf16.mxu1 %v7668_v10 }
 0x149   :  { %652 = vmatpush1.bf16.msra.mxu0 %v7677_v12  ;;  %790 = vmatpush1.bf16.msra.mxu1 %v7677_v12 }
 0x14a   :  { %653 = vmatprep.subr.bf16.mxu0 %v7684_v13  ;;  %791 = vmatprep.subr.bf16.mxu1 %v7684_v13 }
 0x14d   :  { %654 = vmatpush1.bf16.msra.mxu0 %v7693_v14  ;;  %792 = vmatpush1.bf16.msra.mxu1 %v7693_v14 }
 0x14e   :  { %923 = vmatprep.subr.bf16.mxu0 %v7645_v7  ;;  %5763 = vmatmul.mubr.msk.bf16.gmra.mrb[8].mxu0 %vm318_vm0, %v6441_v15 }
 0x14f   :  { %5769 = vmatmul.mubr.msk.bf16.gmra.mrb[8].mxu1 %vm318_vm0, %v6441_v15  ;;  %393 = vmatprep.mubr.bf16.mxu0 %v7236_v0 }
 0x150   :  { %488 = vmatprep.mubr.bf16.mxu1 %v7236_v0  ;;  %1061 = vmatprep.subr.bf16.mxu1 %v7645_v7 }
 0x156   :  { %5764 = vmatmul.mubr.msk.bf16.gmra.mrb[12].mxu0 %vm318_vm0, %v6445_v16 }
 0x157   :  { %5770 = vmatmul.mubr.msk.bf16.gmra.mrb[12].mxu1 %vm318_vm0, %v6445_v16  ;;  %679 = vmatprep.mubr.bf16.mxu0 %v7236_v0 }
 0x158   :  { %817 = vmatprep.mubr.bf16.mxu1 %v7236_v0 }
 0x15e   :  { %680 = vmatmul.mubr.bf16.vlgmr.msra.gmra.mrb[16].mxu0 %v7236_v0 }
 0x15f   :  { %924 = vmatpush1.bf16.msra.mxu0 %v7640_v6  ;;  %955 = vmatprep.mubr.bf16.mxu0 %v7236_v0 }
 0x160   :  { %925 = vmatprep.subr.bf16.mxu0 %v7654_v8 }
 0x163   :  { %926 = vmatpush1.bf16.msra.mxu0 %v7661_v9 }
 0x164   :  { %927 = vmatprep.subr.bf16.mxu0 %v7668_v10 }
 0x167   :  { %928 = vmatpush1.bf16.msra.mxu0 %v7677_v12 }
 0x168   :  { %929 = vmatprep.subr.bf16.mxu0 %v7684_v13 }
 0x16b   :  { %930 = vmatpush1.bf16.msra.mxu0 %v7693_v14 }
 0x16c   :  { %1199 = vmatprep.subr.bf16.mxu0 %v7645_v7 }
 0x211   :  { %v7734_v22 = vpop.f32.mrb[0].mxu0  ;;  %v460_v23 = vpop.f32.mrb[0].mxu1 }
 0x212   :  { %v7736_v24 = vpop.f32.mrb[1].mxu0  ;;  %v462_v26 = vpop.f32.mrb[1].mxu1  ;;  %v461_v5 = vadd.f32 %v460_v23, %v409_v25 }
 0x213   :  { %v369_v27 = vpop.f32.mrb[2].mxu0  ;;  %v464_v29 = vpop.f32.mrb[2].mxu1  ;;  %v463_v15 = vadd.f32 %v462_v26, %v413_v28 }
 0x214   :  { %v371_v30 = vpop.f32.mrb[3].mxu0  ;;  %v465_v31 = vadd.f32 %v464_v29, %v409_v25  ;;  %v466_v32 = vpop.f32.mrb[3].mxu1 }
 0x215   :  { %v467_v33 = vadd.f32 %v466_v32, %v413_v28 }
 0x219   :  { %v375_v34 = vpop.f32.mrb[4].mxu0 }
 0x21a   :  { %v470_v35 = vpop.f32.mrb[4].mxu1  ;;  %v377_v36 = vpop.f32.mrb[5].mxu0 }
 0x21b   :  { %v471_v37 = vadd.f32 %v470_v35, %v409_v25  ;;  %v472_v38 = vpop.f32.mrb[5].mxu1  ;;  %v379_v39 = vpop.f32.mrb[6].mxu0 }
 0x21c   :  { %v473_v40 = vadd.f32 %v472_v38, %v413_v28  ;;  %v474_v41 = vpop.f32.mrb[6].mxu1  ;;  %v381_v42 = vpop.f32.mrb[7].mxu0 }
 0x21d   :  { %v475_v43 = vadd.f32 %v474_v41, %v409_v25  ;;  %v476_v44 = vpop.f32.mrb[7].mxu1 }
 0x21e   :  { %v477_v45 = vadd.f32 %v476_v44, %v413_v28 }
 0x221   :  { %v385_v46 = vpop.f32.mrb[8].mxu0 }
 0x222   :  { %v480_v47 = vpop.f32.mrb[8].mxu1  ;;  %v534_v48 = vadd.f32 %v475_v43, %v385_v46  ;;  %v387_v50 = vpop.f32.mrb[9].mxu0 }
 0x223   :  { %v481_v49 = vadd.f32 %v480_v47, %v409_v25  ;;  %v482_v51 = vpop.f32.mrb[9].mxu1  ;;  %v535_v52 = vadd.f32 %v477_v45, %v387_v50  ;;  %v389_v54 = vpop.f32.mrb[10].mxu0 }
 0x224   :  { %v483_v53 = vadd.f32 %v482_v51, %v413_v28  ;;  %v484_v55 = vpop.f32.mrb[10].mxu1  ;;  %v522_v57 = vadd.f32 %v471_v37, %v389_v54  ;;  %v391_v59 = vpop.f32.mrb[11].mxu0 }
 0x225   :  { %v546_v56 = vadd.f32 %v481_v49, %v379_v39  ;;  %v485_v58 = vadd.f32 %v484_v55, %v409_v25  ;;  %v486_v60 = vpop.f32.mrb[11].mxu1  ;;  %v7740_v61 = vpack.c.bf16 %v535_v52, %v534_v48  ;;  %v523_v63 = vadd.f32 %v473_v40, %v391_v59 }
 0x226   :  { %v547_v62 = vadd.f32 %v483_v53, %v381_v42  ;;  %v487_v1 = vadd.f32 %v486_v60, %v413_v28 }
 0x227   :  { %v558_v2 = vadd.f32 %v485_v58, %v375_v34  ;;  %v7742_v3 = vpack.c.bf16 %v523_v63, %v522_v57 }
 0x228   :  { %v559_v4 = vadd.f32 %v487_v1, %v377_v36  ;;  %v7744_v11 = vpack.c.bf16 %v547_v62, %v546_v56 }
 0x229   :  { %v395_v16 = vpop.f32.mrb[12].mxu0 }
 0x22a   :  { %v490_v17 = vpop.f32.mrb[12].mxu1  ;;  %v7746_v18 = vpack.c.bf16 %v559_v4, %v558_v2  ;;  %v510_v20 = vadd.f32 %v465_v31, %v395_v16  ;;  %v397_v32 = vpop.f32.mrb[13].mxu0 }
 0x22b   :  { %v491_v29 = vadd.f32 %v490_v17, %v409_v25  ;;  %v492_v35 = vpop.f32.mrb[13].mxu1  ;;  %v511_v37 = vadd.f32 %v467_v33, %v397_v32  ;;  %v399_v39 = vpop.f32.mrb[14].mxu0 }
 0x22c   :  { %v493_v38 = vadd.f32 %v492_v35, %v413_v28  ;;  %v494_v40 = vpop.f32.mrb[14].mxu1  ;;  %v499_v41 = vadd.f32 %v461_v5, %v399_v39  ;;  %v401_v36 = vpop.f32.mrb[15].mxu0 }
 0x22d   :  { %v570_v34 = vadd.f32 %v491_v29, %v369_v27  ;;  %v495_v42 = vadd.f32 %v494_v40, %v409_v25  ;;  %v496_v23 = vpop.f32.mrb[15].mxu1  ;;  %v7748_v43 = vpack.c.bf16 %v511_v37, %v510_v20  ;;  %v500_v44 = vadd.f32 %v463_v15, %v401_v36 }
 0x22e   :  { %v571_v26 = vadd.f32 %v493_v38, %v371_v30  ;;  %v497_v45 = vadd.f32 %v496_v23, %v413_v28 }
 0x22f   :  { %v582_v46 = vadd.f32 %v495_v42, %v7734_v22  ;;  %v6207_v31 = vpack.c.bf16 %v500_v44, %v499_v41  ;;  %v826_v17 = vunpack.c.l.bf16 %v7748_v43  ;;  %v827_v29 = vunpack.c.h.bf16 %v7748_v43 }
 0x230   :  { %v583_v47 = vadd.f32 %v497_v45, %v7736_v24  ;;  %v7752_v48 = vpack.c.bf16 %v571_v26, %v570_v34 }
 0x231   :  { %v681_v33 = vpop.f32.mrb[16].mxu0  ;;  %v688_v49 = vunpack.c.l.bf16 %v6207_v31  ;;  %v689_v50 = vunpack.c.h.bf16 %v6207_v31 }
 0x232   :  { %v7754_v27 = vpack.c.bf16 %v583_v47, %v582_v46  ;;  %v683_v25 = vpop.f32.mrb[17].mxu0 }
 0x233   :  { %v690_v51 = vadd.f32 %v688_v49, %v681_v33  ;;  %v691_v52 = vadd.f32 %v689_v50, %v683_v25  ;;  %v685_v53 = vpop.f32.mrb[18].mxu0 }
 0x234   :  { %v686_v54 = vpop.f32.mrb[19].mxu0 }
 0x235   :  { %6585 = vtanh.f32 %v691_v52  ;;  %v5787_v22 = vmul.f32 -1.442695, %v690_v51  ;;  %v5788_v63 = vmul.f32 -1.442695, %v691_v52  ;;  %v964_v52 = vunpack.c.l.bf16 %v7742_v3 }
 0x236   :  { %v965_v54 = vunpack.c.h.bf16 %v7742_v3 }
 0x237   :  { %6587 = vpow2.f32 %v5787_v22 }
 0x23f   :  { %v6586_v30 = vpop.eup %6585 }
 0x240   :  { %707 = vrot.lane.b32.xlu0 %v6586_v30, %s7237_s21 }
 0x241   :  { %v6588_v24 = vpop.eup %6587 }
 0x242   :  { %v698_v28 = vadd.f32 1.0, %v6588_v24 }
 0x244   :  { %6589 = vrcp.f32 %v698_v28 }
 0x24e   :  { %v6590_v55 = vpop.eup %6589 }
 0x24f   :  { %v705_v58 = vmul.f32 0.0, %v6590_v55 }
 0x2b2   :  { %v708_v56 = vpop.permute.xlu0 %707 }
 0x2b3   :  { %v710_v57 = vmul.f32 %v6590_v55, %v708_v56 }
 0x2b5   :  { %712 = vrot.lane.b32.xlu0 %v710_v57, %s7237_s21 }
 0x327   :  { %v713_v59 = vpop.permute.xlu0 %712 }
 0x328   :  { %v715_v60 = vadd.f32 %v713_v59, %v705_v58 }
 0x32a   :  { %6591 = vtanh.f32 %v715_v60 }
 0x32b   :  { %6593 = vpow2.f32 %v5788_v63 }
 0x334   :  { %v6592_v62 = vpop.eup %6591 }
 0x335   :  { %718 = vrot.lane.b32.xlu1 %v6592_v62, %s7237_s21  ;;  %v6594_v1 = vpop.eup %6593 }
 0x336   :  { %v699_v2 = vadd.f32 1.0, %v6594_v1 }
 0x338   :  { %6595 = vrcp.f32 %v699_v2 }
 0x342   :  { %v6596_v4 = vpop.eup %6595 }
 0x3a7   :  { %v719_v5 = vpop.permute.xlu1 %718 }
 0x3a8   :  { %v721_v15 = vmul.f32 %v6596_v4, %v719_v5 }
 0x3aa   :  { %v7759_v16 = vpack.c.bf16 %v721_v15, %v721_v15 }
 0x3ac   :  { %724 = vst.msk [vmem:[#allocation2] sm:$0xf] %vm723_vm1, %v7759_v16  ;;  %5798 = vmatmul.mubr.msk.bf16.vlgmr.msra.gmra.mrb[16].mxu1 %vm643_vm2, %v7759_v16 }
 0x3ad   :  { %1062 = vmatpush1.bf16.msra.mxu1 %v7640_v6  ;;  %1093 = vmatprep.mubr.bf16.mxu1 %v7236_v0 }
 0x3ae   :  { %1063 = vmatprep.subr.bf16.mxu1 %v7654_v8 }
 0x3b1   :  { %1064 = vmatpush1.bf16.msra.mxu1 %v7661_v9 }
 0x3b2   :  { %1065 = vmatprep.subr.bf16.mxu1 %v7668_v10 }
 0x3b5   :  { %1066 = vmatpush1.bf16.msra.mxu1 %v7677_v12 }
 0x3b6   :  { %1067 = vmatprep.subr.bf16.mxu1 %v7684_v13 }
 0x3b9   :  { %1068 = vmatpush1.bf16.msra.mxu1 %v7693_v14 }
 0x3ba   :  { %1337 = vmatprep.subr.bf16.mxu1 %v7645_v7 }
 0x47f   :  { %v819_v20 = vpop.f32.mrb[16].mxu1 }
 0x480   :  { %v828_v32 = vadd.f32 %v826_v17, %v819_v20  ;;  %v821_v35 = vpop.f32.mrb[17].mxu1 }
 0x481   :  { %v829_v37 = vadd.f32 %v827_v29, %v821_v35  ;;  %v823_v38 = vpop.f32.mrb[18].mxu1 }
 0x482   :  { %v824_v39 = vpop.f32.mrb[19].mxu1  ;;  %v5799_v34 = vmul.f32 -1.442695, %v828_v32 }
 0x483   :  { %6597 = vtanh.f32 %v829_v37  ;;  %v5800_v31 = vmul.f32 -1.442695, %v829_v37  ;;  %v1102_v37 = vunpack.c.l.bf16 %v7740_v61  ;;  %v1103_v39 = vunpack.c.h.bf16 %v7740_v61 }
 0x484   :  { %6599 = vpow2.f32 %v5799_v34 }
 0x48d   :  { %v6598_v40 = vpop.eup %6597 }
 0x48e   :  { %845 = vrot.lane.b32.xlu1 %v6598_v40, %s7237_s21  ;;  %v6600_v41 = vpop.eup %6599 }
 0x48f   :  { %v836_v42 = vadd.f32 1.0, %v6600_v41 }
 0x491   :  { %6601 = vrcp.f32 %v836_v42 }
 0x49b   :  { %v6602_v36 = vpop.eup %6601 }
 0x49c   :  { %v843_v43 = vmul.f32 %v6602_v36, %v715_v60 }
 0x500   :  { %v846_v23 = vpop.permute.xlu1 %845 }
 0x501   :  { %v848_v26 = vmul.f32 %v6602_v36, %v846_v23 }
 0x503   :  { %850 = vrot.lane.b32.xlu0 %v848_v26, %s7237_s21 }
 0x575   :  { %v851_v44 = vpop.permute.xlu0 %850 }
 0x576   :  { %v853_v45 = vadd.f32 %v851_v44, %v843_v43 }
 0x578   :  { %6603 = vtanh.f32 %v853_v45 }
 0x579   :  { %6605 = vpow2.f32 %v5800_v31 }
 0x582   :  { %v6604_v46 = vpop.eup %6603 }
 0x583   :  { %856 = vrot.lane.b32.xlu1 %v6604_v46, %s7237_s21  ;;  %v6606_v47 = vpop.eup %6605 }
 0x584   :  { %v837_v33 = vadd.f32 1.0, %v6606_v47 }
 0x586   :  { %6607 = vrcp.f32 %v837_v33 }
 0x590   :  { %v6608_v49 = vpop.eup %6607 }
 0x5f5   :  { %v857_v50 = vpop.permute.xlu1 %856 }
 0x5f6   :  { %v859_v25 = vmul.f32 %v6608_v49, %v857_v50 }
 0x5f8   :  { %v7779_v51 = vpack.c.bf16 %v859_v25, %v859_v25 }
 0x5fa   :  { %862 = vst.msk [vmem:[#allocation2 + $0x4] sm:$0xf] %vm723_vm1, %v7779_v51  ;;  %5810 = vmatmul.mubr.msk.bf16.vlgmr.msra.gmra.mrb[20].mxu0 %vm643_vm2, %v7779_v51 }
 0x5fb   :  { %1200 = vmatpush1.bf16.msra.mxu0 %v7640_v6  ;;  %1231 = vmatprep.mubr.bf16.mxu0 %v7236_v0 }
 0x5fc   :  { %1201 = vmatprep.subr.bf16.mxu0 %v7654_v8 }
 0x5ff   :  { %1202 = vmatpush1.bf16.msra.mxu0 %v7661_v9 }
 0x600   :  { %1203 = vmatprep.subr.bf16.mxu0 %v7668_v10 }
 0x603   :  { %1204 = vmatpush1.bf16.msra.mxu0 %v7677_v12 }
 0x604   :  { %1205 = vmatprep.subr.bf16.mxu0 %v7684_v13 }
 0x607   :  { %1206 = vmatpush1.bf16.msra.mxu0 %v7693_v14 }
 0x608   :  { %1475 = vmatprep.subr.bf16.mxu0 %v7645_v7 }
 0x6cd   :  { %v957_v53 = vpop.f32.mrb[20].mxu0 }
 0x6ce   :  { %v966_v30 = vadd.f32 %v964_v52, %v957_v53  ;;  %v959_v22 = vpop.f32.mrb[21].mxu0 }
 0x6cf   :  { %v967_v24 = vadd.f32 %v965_v54, %v959_v22  ;;  %v961_v28 = vpop.f32.mrb[22].mxu0  ;;  %v1240_v22 = vunpack.c.l.bf16 %v7744_v11 }
 0x6d0   :  { %v962_v55 = vpop.f32.mrb[23].mxu0  ;;  %v5811_v57 = vmul.f32 -1.442695, %v966_v30  ;;  %v1241_v28 = vunpack.c.h.bf16 %v7744_v11 }
 0x6d1   :  { %6609 = vtanh.f32 %v967_v24  ;;  %v5812_v5 = vmul.f32 -1.442695, %v967_v24 }
 0x6d2   :  { %6611 = vpow2.f32 %v5811_v57 }
 0x6db   :  { %v6610_v56 = vpop.eup %6609 }
 0x6dc   :  { %983 = vrot.lane.b32.xlu0 %v6610_v56, %s7237_s21  ;;  %v6612_v58 = vpop.eup %6611 }
 0x6dd   :  { %v974_v59 = vadd.f32 1.0, %v6612_v58 }
 0x6df   :  { %6613 = vrcp.f32 %v974_v59 }
 0x6e9   :  { %v6614_v60 = vpop.eup %6613 }
 0x6ea   :  { %v981_v3 = vmul.f32 %v6614_v60, %v853_v45 }
 0x74e   :  { %v984_v62 = vpop.permute.xlu0 %983 }
 0x74f   :  { %v986_v63 = vmul.f32 %v6614_v60, %v984_v62 }
 0x751   :  { %988 = vrot.lane.b32.xlu1 %v986_v63, %s7237_s21 }
 0x7c3   :  { %v989_v1 = vpop.permute.xlu1 %988 }
 0x7c4   :  { %v991_v2 = vadd.f32 %v989_v1, %v981_v3 }
 0x7c6   :  { %6615 = vtanh.f32 %v991_v2 }
 0x7c7   :  { %6617 = vpow2.f32 %v5812_v5 }
 0x7d0   :  { %v6616_v4 = vpop.eup %6615 }
 0x7d1   :  { %994 = vrot.lane.b32.xlu0 %v6616_v4, %s7237_s21  ;;  %v6618_v15 = vpop.eup %6617 }
 0x7d2   :  { %v975_v17 = vadd.f32 1.0, %v6618_v15 }
 0x7d4   :  { %6619 = vrcp.f32 %v975_v17 }
 0x7de   :  { %v6620_v20 = vpop.eup %6619 }
 0x843   :  { %v995_v29 = vpop.permute.xlu0 %994 }
 0x844   :  { %v997_v32 = vmul.f32 %v6620_v20, %v995_v29 }
 0x846   :  { %v7799_v35 = vpack.c.bf16 %v997_v32, %v997_v32 }
 0x848   :  { %1000 = vst.msk [vmem:[#allocation2 + $0x8] sm:$0xf] %vm723_vm1, %v7799_v35  ;;  %5822 = vmatmul.mubr.msk.bf16.vlgmr.msra.gmra.mrb[20].mxu1 %vm643_vm2, %v7799_v35 }
 0x849   :  { %1338 = vmatpush1.bf16.msra.mxu1 %v7640_v6  ;;  %1369 = vmatprep.mubr.bf16.mxu1 %v7236_v0 }
 0x84a   :  { %1339 = vmatprep.subr.bf16.mxu1 %v7654_v8 }
 0x84d   :  { %1340 = vmatpush1.bf16.msra.mxu1 %v7661_v9 }
 0x84e   :  { %1341 = vmatprep.subr.bf16.mxu1 %v7668_v10 }
 0x851   :  { %1342 = vmatpush1.bf16.msra.mxu1 %v7677_v12 }
 0x852   :  { %1343 = vmatprep.subr.bf16.mxu1 %v7684_v13 }
 0x855   :  { %1344 = vmatpush1.bf16.msra.mxu1 %v7693_v14 }
 0x856   :  { %1613 = vmatprep.subr.bf16.mxu1 %v7645_v7 }
 0x91b   :  { %v1095_v38 = vpop.f32.mrb[20].mxu1 }
 0x91c   :  { %v1104_v40 = vadd.f32 %v1102_v37, %v1095_v38  ;;  %v1097_v34 = vpop.f32.mrb[21].mxu1 }
 0x91d   :  { %v1105_v41 = vadd.f32 %v1103_v39, %v1097_v34  ;;  %v1099_v42 = vpop.f32.mrb[22].mxu1  ;;  %v1378_v34 = vunpack.c.l.bf16 %v7746_v18 }
 0x91e   :  { %v1100_v36 = vpop.f32.mrb[23].mxu1  ;;  %v5823_v26 = vmul.f32 -1.442695, %v1104_v40  ;;  %v1379_v42 = vunpack.c.h.bf16 %v7746_v18 }
 0x91f   :  { %6621 = vtanh.f32 %v1105_v41  ;;  %v5824_v49 = vmul.f32 -1.442695, %v1105_v41 }
 0x920   :  { %6623 = vpow2.f32 %v5823_v26 }
 0x929   :  { %v6622_v23 = vpop.eup %6621 }
 0x92a   :  { %1121 = vrot.lane.b32.xlu1 %v6622_v23, %s7237_s21  ;;  %v6624_v43 = vpop.eup %6623 }
 0x92b   :  { %v1112_v44 = vadd.f32 1.0, %v6624_v43 }
 0x92d   :  { %6625 = vrcp.f32 %v1112_v44 }
 0x937   :  { %v6626_v7 = vpop.eup %6625 }
 0x938   :  { %v1119_v61 = vmul.f32 %v6626_v7, %v991_v2 }
 0x99c   :  { %v1122_v45 = vpop.permute.xlu1 %1121 }
 0x99d   :  { %v1124_v46 = vmul.f32 %v6626_v7, %v1122_v45 }
 0x99f   :  { %1126 = vrot.lane.b32.xlu0 %v1124_v46, %s7237_s21 }
 0xa11   :  { %v1127_v31 = vpop.permute.xlu0 %1126 }
 0xa12   :  { %v1129_v47 = vadd.f32 %v1127_v31, %v1119_v61 }
 0xa14   :  { %6627 = vtanh.f32 %v1129_v47 }
 0xa15   :  { %6629 = vpow2.f32 %v5824_v49 }
 0xa1e   :  { %v6628_v33 = vpop.eup %6627 }
 0xa1f   :  { %1132 = vrot.lane.b32.xlu1 %v6628_v33, %s7237_s21  ;;  %v6630_v50 = vpop.eup %6629 }
 0xa20   :  { %v1113_v25 = vadd.f32 1.0, %v6630_v50 }
 0xa22   :  { %6631 = vrcp.f32 %v1113_v25 }
 0xa2c   :  { %v6632_v52 = vpop.eup %6631 }
 0xa91   :  { %v1133_v53 = vpop.permute.xlu1 %1132 }
 0xa92   :  { %v1135_v54 = vmul.f32 %v6632_v52, %v1133_v53  ;;  %v1516_v52 = vunpack.c.l.bf16 %v7752_v48 }
 0xa94   :  { %v7819_v30 = vpack.c.bf16 %v1135_v54, %v1135_v54  ;;  %v1517_v54 = vunpack.c.h.bf16 %v7752_v48 }
 0xa96   :  { %1138 = vst.msk [vmem:[#allocation2 + $0xc] sm:$0xf] %vm723_vm1, %v7819_v30  ;;  %5834 = vmatmul.mubr.msk.bf16.vlgmr.msra.gmra.mrb[24].mxu0 %vm643_vm2, %v7819_v30 }
 0xa97   :  { %1476 = vmatpush1.bf16.msra.mxu0 %v7640_v6  ;;  %1507 = vmatprep.mubr.bf16.mxu0 %v7236_v0 }
 0xa98   :  { %1477 = vmatprep.subr.bf16.mxu0 %v7654_v8 }
 0xa9b   :  { %1478 = vmatpush1.bf16.msra.mxu0 %v7661_v9 }
 0xa9c   :  { %1479 = vmatprep.subr.bf16.mxu0 %v7668_v10 }
 0xa9f   :  { %1480 = vmatpush1.bf16.msra.mxu0 %v7677_v12 }
 0xaa0   :  { %1481 = vmatprep.subr.bf16.mxu0 %v7684_v13 }
 0xaa3   :  { %1482 = vmatpush1.bf16.msra.mxu0 %v7693_v14 }
 0xb69   :  { %v1233_v24 = vpop.f32.mrb[24].mxu0 }
 0xb6a   :  { %v1242_v55 = vadd.f32 %v1240_v22, %v1233_v24  ;;  %v1235_v56 = vpop.f32.mrb[25].mxu0 }
 0xb6b   :  { %v1243_v57 = vadd.f32 %v1241_v28, %v1235_v56  ;;  %v1237_v58 = vpop.f32.mrb[26].mxu0 }
 0xb6c   :  { %v1238_v59 = vpop.f32.mrb[27].mxu0  ;;  %v5835_v62 = vmul.f32 -1.442695, %v1242_v55 }
 0xb6d   :  { %6633 = vtanh.f32 %v1243_v57  ;;  %v5836_v20 = vmul.f32 -1.442695, %v1243_v57 }
 0xb6e   :  { %6635 = vpow2.f32 %v5835_v62 }
 0xb77   :  { %v6634_v60 = vpop.eup %6633 }
 0xb78   :  { %1259 = vrot.lane.b32.xlu0 %v6634_v60, %s7237_s21  ;;  %v6636_v63 = vpop.eup %6635 }
 0xb79   :  { %v1250_v3 = vadd.f32 1.0, %v6636_v63 }
 0xb7b   :  { %6637 = vrcp.f32 %v1250_v3 }
 0xb85   :  { %v6638_v1 = vpop.eup %6637 }
 0xb86   :  { %v1257_v11 = vmul.f32 %v6638_v1, %v1129_v47 }
 0xbea   :  { %v1260_v2 = vpop.permute.xlu0 %1259 }
 0xbeb   :  { %v1262_v4 = vmul.f32 %v6638_v1, %v1260_v2 }
 0xbed   :  { %1264 = vrot.lane.b32.xlu1 %v1262_v4, %s7237_s21 }
 0xc5f   :  { %v1265_v5 = vpop.permute.xlu1 %1264 }
 0xc60   :  { %v1267_v15 = vadd.f32 %v1265_v5, %v1257_v11 }
 0xc62   :  { %6639 = vtanh.f32 %v1267_v15 }
 0xc63   :  { %6641 = vpow2.f32 %v5836_v20 }
 0xc6c   :  { %v6640_v17 = vpop.eup %6639 }
 0xc6d   :  { %1270 = vrot.lane.b32.xlu0 %v6640_v17, %s7237_s21  ;;  %v6642_v29 = vpop.eup %6641 }
 0xc6e   :  { %v1251_v32 = vadd.f32 1.0, %v6642_v29 }
 0xc70   :  { %6643 = vrcp.f32 %v1251_v32 }
 0xc7a   :  { %v6644_v37 = vpop.eup %6643 }
 0xcdf   :  { %v1271_v38 = vpop.permute.xlu0 %1270 }
 0xce0   :  { %v1273_v39 = vmul.f32 %v6644_v37, %v1271_v38  ;;  %v1654_v37 = vunpack.c.l.bf16 %v7754_v27 }
 0xce2   :  { %v7838_v40 = vpack.c.bf16 %v1273_v39, %v1273_v39  ;;  %v1655_v39 = vunpack.c.h.bf16 %v7754_v27 }
 0xce4   :  { %1276 = vst.msk [vmem:[#allocation2 + $0x10] sm:$0xf] %vm723_vm1, %v7838_v40  ;;  %5846 = vmatmul.mubr.msk.bf16.vlgmr.msra.gmra.mrb[24].mxu1 %vm643_vm2, %v7838_v40 }
 0xce5   :  { %1614 = vmatpush1.bf16.msra.mxu1 %v7640_v6  ;;  %1645 = vmatprep.mubr.bf16.mxu1 %v7236_v0 }
 0xce6   :  { %1615 = vmatprep.subr.bf16.mxu1 %v7654_v8 }
 0xce9   :  { %1616 = vmatpush1.bf16.msra.mxu1 %v7661_v9 }
 0xcea   :  { %1617 = vmatprep.subr.bf16.mxu1 %v7668_v10 }
 0xced   :  { %1618 = vmatpush1.bf16.msra.mxu1 %v7677_v12 }
 0xcee   :  { %1619 = vmatprep.subr.bf16.mxu1 %v7684_v13 }
 0xcf1   :  { %1620 = vmatpush1.bf16.msra.mxu1 %v7693_v14 }
 0xdb7   :  { %v1371_v41 = vpop.f32.mrb[24].mxu1 }
 0xdb8   :  { %v1380_v6 = vadd.f32 %v1378_v34, %v1371_v41  ;;  %v1373_v36 = vpop.f32.mrb[25].mxu1 }
 0xdb9   :  { %v1381_v23 = vadd.f32 %v1379_v42, %v1373_v36  ;;  %v1375_v26 = vpop.f32.mrb[26].mxu1 }
 0xdba   :  { %v1376_v8 = vpop.f32.mrb[27].mxu1  ;;  %v5847_v10 = vmul.f32 -1.442695, %v1380_v6 }
 0xdbb   :  { %6645 = vtanh.f32 %v1381_v23  ;;  %v5848_v61 = vmul.f32 -1.442695, %v1381_v23 }
 0xdbc   :  { %6647 = vpow2.f32 %v5847_v10 }
 0xdc5   :  { %v6646_v9 = vpop.eup %6645 }
 0xdc6   :  { %1397 = vrot.lane.b32.xlu1 %v6646_v9, %s7237_s21  ;;  %v6648_v12 = vpop.eup %6647 }
 0xdc7   :  { %v1388_v13 = vadd.f32 1.0, %v6648_v12 }
 0xdc9   :  { %6649 = vrcp.f32 %v1388_v13 }
 0xdd3   :  { %v6650_v14 = vpop.eup %6649 }
 0xdd4   :  { %v1395_v18 = vmul.f32 %v6650_v14, %v1267_v15 }
 0xe38   :  { %v1398_v43 = vpop.permute.xlu1 %1397 }
 0xe39   :  { %v1400_v44 = vmul.f32 %v6650_v14, %v1398_v43 }
 0xe3b   :  { %1402 = vrot.lane.b32.xlu0 %v1400_v44, %s7237_s21 }
 0xead   :  { %v1403_v7 = vpop.permute.xlu0 %1402 }
 0xeae   :  { %v1405_v45 = vadd.f32 %v1403_v7, %v1395_v18 }
 0xeb0   :  { %6651 = vtanh.f32 %v1405_v45 }
 0xeb1   :  { %6653 = vpow2.f32 %v5848_v61  ;;  %v6449_v61 = vld [vmem:[#allocation16] ss:$8 sps:$4 sm:$0xff]  }
 0xeba   :  { %v6652_v46 = vpop.eup %6651 }
 0xebb   :  { %1408 = vrot.lane.b32.xlu1 %v6652_v46, %s7237_s21  ;;  %v6654_v31 = vpop.eup %6653 }
 0xebc   :  { %v1389_v47 = vadd.f32 1.0, %v6654_v31  ;;  %v6451_v31 = vld [vmem:[#allocation16 + $0x4] ss:$8 sps:$4 sm:$0xff]  }
 0xebd   :  { %1779 = vmatprep.subr.bf16.mxu0 %v6451_v31 }
 0xebe   :  { %6655 = vrcp.f32 %v1389_v47  ;;  %v6452_v47 = vld [vmem:[#allocation19] ss:$8 sps:$4 sm:$0xff]  }
 0xec8   :  { %v6656_v33 = vpop.eup %6655 }
 0xf2d   :  { %v1409_v49 = vpop.permute.xlu1 %1408 }
 0xf2e   :  { %v1411_v50 = vmul.f32 %v6656_v33, %v1409_v49  ;;  %v6454_v33 = vld [vmem:[#allocation19 + $0x4] ss:$8 sps:$4 sm:$0xff]   ;;  %v6455_v49 = vld [vmem:[#allocation16 + $0x10] ss:$8 sps:$4 sm:$0xff]  }
 0xf2f   :  { %2001 = vmatprep.subr.bf16.mxu1 %v6454_v33 }
 0xf30   :  { %v7857_v25 = vpack.c.bf16 %v1411_v50, %v1411_v50  ;;  %v6457_v50 = vld [vmem:[#allocation16 + $0x14] ss:$8 sps:$4 sm:$0xff]  }
 0xf32   :  { %1414 = vst.msk [vmem:[#allocation2 + $0x14] sm:$0xf] %vm723_vm1, %v7857_v25  ;;  %5858 = vmatmul.mubr.msk.bf16.vlgmr.msra.gmra.mrb[28].mxu0 %vm643_vm2, %v7857_v25 }
 0xf33   :  { %1811 = vmatprep.mubr.bf16.mxu0 %v7236_v0  ;;  %1780 = vmatpush1.bf16.msra.mxu0 %v6449_v61 }
 0xf34   :  { %1781 = vmatprep.subr.bf16.mxu0 %v6457_v50 }
 0xf37   :  { %1782 = vmatpush1.bf16.msra.mxu0 %v6455_v49 }
0x1005   :  { %v1509_v53 = vpop.f32.mrb[28].mxu0 }
0x1006   :  { %v1518_v22 = vadd.f32 %v1516_v52, %v1509_v53  ;;  %v1511_v24 = vpop.f32.mrb[29].mxu0  ;;  %v6458_v52 = vld [vmem:[#allocation19 + $0x10] ss:$8 sps:$4 sm:$0xff]   ;;  %v6460_v53 = vld [vmem:[#allocation19 + $0x14] ss:$8 sps:$4 sm:$0xff]  }
0x1007   :  { %v1519_v28 = vadd.f32 %v1517_v54, %v1511_v24  ;;  %v1513_v55 = vpop.f32.mrb[30].mxu0 }
0x1008   :  { %v1514_v56 = vpop.f32.mrb[31].mxu0  ;;  %v5859_v58 = vmul.f32 -1.442695, %v1518_v22  ;;  %v6467_v55 = vld [vmem:[#allocation17 + $0x4] ss:$8 sps:$4 sm:$0xff]  }
0x1009   :  { %6657 = vtanh.f32 %v1519_v28  ;;  %v5860_v11 = vmul.f32 -1.442695, %v1519_v28  ;;  %v6464_v28 = vld [vmem:[#allocation14 + $0x4] ss:$8 sps:$4 sm:$0xff]  }
0x100a   :  { %6659 = vpow2.f32 %v5859_v58  ;;  %1904 = vmatprep.subr.bf16.mxu0 %v6464_v28 }
0x1013   :  { %v6658_v57 = vpop.eup %6657 }
0x1014   :  { %1535 = vrot.lane.b32.xlu0 %v6658_v57, %s7237_s21  ;;  %v6660_v59 = vpop.eup %6659 }
0x1015   :  { %v1526_v60 = vadd.f32 1.0, %v6660_v59  ;;  %v6462_v59 = vld [vmem:[#allocation14] ss:$8 sps:$4 sm:$0xff]  }
0x1017   :  { %6661 = vrcp.f32 %v1526_v60  ;;  %v6465_v60 = vld [vmem:[#allocation17] ss:$8 sps:$4 sm:$0xff]  }
0x1021   :  { %v6662_v62 = vpop.eup %6661 }
0x1022   :  { %v1533_v48 = vmul.f32 %v6662_v62, %v1405_v45 }
0x1086   :  { %v1536_v63 = vpop.permute.xlu0 %1535 }
0x1087   :  { %v1538_v3 = vmul.f32 %v6662_v62, %v1536_v63 }
0x1089   :  { %1540 = vrot.lane.b32.xlu1 %v1538_v3, %s7237_s21  ;;  %v6475_v3 = vld [vmem:[#allocation17 + $0x14] ss:$8 sps:$4 sm:$0xff]  }
0x10fb   :  { %v1541_v1 = vpop.permute.xlu1 %1540 }
0x10fc   :  { %v1543_v2 = vadd.f32 %v1541_v1, %v1533_v48  ;;  %v7906_v1 = vld [vmem:[%s8531_s10 + $0x4] ss:$8 sps:$4 sm:$0xff]  }
0x10fe   :  { %6663 = vtanh.f32 %v1543_v2 }
0x10ff   :  { %6665 = vpow2.f32 %v5860_v11 }
0x1108   :  { %v6664_v4 = vpop.eup %6663 }
0x1109   :  { %1546 = vrot.lane.b32.xlu0 %v6664_v4, %s7237_s21  ;;  %v6666_v5 = vpop.eup %6665 }
0x110a   :  { %v1527_v15 = vadd.f32 1.0, %v6666_v5  ;;  %v7926_v5 = vld [vmem:[%s8531_s10] ss:$8 sps:$4 sm:$0xff]  }
0x110c   :  { %6667 = vrcp.f32 %v1527_v15  ;;  %v6477_v15 = vld [vmem:[#allocation2] sm:$0xff]  }
0x1116   :  { %v6668_v17 = vpop.eup %6667 }
0x117b   :  { %v1547_v20 = vpop.permute.xlu0 %1546 }
0x117c   :  { %v1549_v29 = vmul.f32 %v6668_v17, %v1547_v20  ;;  %v7931_v17 = vld [vmem:[%s8531_s10 + $0x14] ss:$8 sps:$4 sm:$0xff]   ;;  %v7940_v20 = vld [vmem:[%s8531_s10 + $0x10] ss:$8 sps:$4 sm:$0xff]  }
0x117e   :  { %v1550_v32 = vpack.c.bf16 %v1549_v29, %v1549_v29  ;;  %v7947_v29 = vld [vmem:[%s8531_s10 + $0x24] ss:$8 sps:$4 sm:$0xff]  }
0x1180   :  { %1552 = vst.msk [vmem:[#allocation2 + $0x18] sm:$0xf] %vm723_vm1, %v1550_v32  ;;  %5870 = vmatmul.mubr.msk.bf16.vlgmr.msra.gmra.mrb[28].mxu1 %vm643_vm2, %v1550_v32 }
0x1181   :  { %2033 = vmatprep.mubr.bf16.mxu1 %v7236_v0  ;;  %2002 = vmatpush1.bf16.msra.mxu1 %v6452_v47 }
0x1182   :  { %2003 = vmatprep.subr.bf16.mxu1 %v6460_v53 }
0x1185   :  { %2004 = vmatpush1.bf16.msra.mxu1 %v6458_v52 }
0x1186   :  { %2094 = vmatprep.subr.bf16.mxu1 %v6467_v55 }
0x1253   :  { %v1647_v38 = vpop.f32.mrb[28].mxu1 }
0x1254   :  { %v1656_v34 = vadd.f32 %v1654_v37, %v1647_v38  ;;  %v1649_v41 = vpop.f32.mrb[29].mxu1  ;;  %v7955_v37 = vld [vmem:[%s8531_s10 + $0x20] ss:$8 sps:$4 sm:$0xff]   ;;  %v7961_v38 = vld [vmem:[%s8531_s10 + $0x34] ss:$8 sps:$4 sm:$0xff]  }
0x1255   :  { %v1657_v42 = vadd.f32 %v1655_v39, %v1649_v41  ;;  %v1651_v6 = vpop.f32.mrb[30].mxu1  ;;  %v7972_v39 = vld [vmem:[%s8531_s10 + $0x30] ss:$8 sps:$4 sm:$0xff]  }
0x1256   :  { %v1652_v36 = vpop.f32.mrb[31].mxu1  ;;  %v5871_v26 = vmul.f32 -1.442695, %v1656_v34  ;;  %v6485_v34 = vld [vmem:[#allocation2 + $0x10] sm:$0xff]  }
0x1257   :  { %6669 = vtanh.f32 %v1657_v42 }
0x1258   :  { %6671 = vpow2.f32 %v5871_v26 }
0x1261   :  { %v6670_v23 = vpop.eup %6669 }
0x1262   :  { %1673 = vrot.lane.b32.xlu1 %v6670_v23, %s7237_s21  ;;  %v6672_v8 = vpop.eup %6671 }
0x1263   :  { %v1664_v9 = vadd.f32 1.0, %v6672_v8 }
0x1265   :  { %6673 = vrcp.f32 %v1664_v9 }
0x126f   :  { %v6674_v10 = vpop.eup %6673 }
0x1270   :  { %v1671_v27 = vmul.f32 %v6674_v10, %v1543_v2 }
0x12d4   :  { %v1674_v12 = vpop.permute.xlu1 %1673 }
0x12d5   :  { %v1676_v13 = vmul.f32 %v6674_v10, %v1674_v12 }
0x12d7   :  { %1678 = vrot.lane.b32.xlu0 %v1676_v13, %s7237_s21 }
0x12db   :  { %1556 = vrot.lane.b32.xlu0 %v1550_v32, %s7238_s20  ;;  %v6481_v32 = vld [vmem:[#allocation2 + $0x8] sm:$0xff]  }
0x12df   :  { %1280 = vrot.lane.b32.xlu0 %v7838_v40, %s7238_s20 }
0x12e3   :  { %1004 = vrot.lane.b32.xlu0 %v7799_v35, %s7238_s20 }
0x12e7   :  { %728 = vrot.lane.b32.xlu0 %v7759_v16, %s7238_s20  ;;  %v5872_v16 = vmul.f32 -1.442695, %v1657_v42  ;;  %v2167_v42 = vld [vmem:[%s8530_s9] sm:$0x3] }
0x12e8   :  { %v2172_v23 = vrot.slane %v2167_v42, %v7730_v19  ;;  %v2176_v9 = vrot.slane %v2167_v42, %v7732_v21 }
0x1349   :  { %v1679_v14 = vpop.permute.xlu0 %1678 }
0x134a   :  { %v1681_v43 = vadd.f32 %v1679_v14, %v1671_v27 }
0x134c   :  { %6675 = vtanh.f32 %v1681_v43 }
0x134d   :  { %v1557_v44 = vpop.permute.xlu0 %1556  ;;  %6677 = vpow2.f32 %v5872_v16 }
0x134e   :  { %1560 = vst.msk [vmem:[#allocation3 + $0x4] sm:$0xf] %vm723_vm1, %v1557_v44 }
0x1351   :  { %v1281_v18 = vpop.permute.xlu0 %1280 }
0x1352   :  { %1284 = vst.msk [vmem:[#allocation3 + $0xc] sm:$0xf] %vm723_vm1, %v1281_v18 }
0x1355   :  { %v1005_v7 = vpop.permute.xlu0 %1004 }
0x1356   :  { %v6676_v45 = vpop.eup %6675  ;;  %1008 = vst.msk [vmem:[#allocation3 + $0x14] sm:$0xf] %vm723_vm1, %v1005_v7 }
0x1357   :  { %1684 = vrot.lane.b32.xlu1 %v6676_v45, %s7237_s21  ;;  %v6678_v40 = vpop.eup %6677 }
0x1358   :  { %v1665_v46 = vadd.f32 1.0, %v6678_v40 }
0x1359   :  { %v729_v35 = vpop.permute.xlu0 %728 }
0x135a   :  { %732 = vst.msk [vmem:[#allocation3 + $0x1c] sm:$0xf] %vm723_vm1, %v729_v35  ;;  %6679 = vrcp.f32 %v1665_v46 }
0x1364   :  { %v6680_v54 = vpop.eup %6679 }
0x13c9   :  { %v1685_v22 = vpop.permute.xlu1 %1684 }
0x13ca   :  { %v1687_v24 = vmul.f32 %v6680_v54, %v1685_v22 }
0x13cc   :  { %v1688_v56 = vpack.c.bf16 %v1687_v24, %v1687_v24 }
0x13ce   :  { %1690 = vst.msk [vmem:[#allocation2 + $0x1c] sm:$0xf] %vm723_vm1, %v1688_v56  ;;  %1694 = vrot.lane.b32.xlu1 %v1688_v56, %s7238_s20 }
0x13d2   :  { %1418 = vrot.lane.b32.xlu1 %v7857_v25, %s7238_s20  ;;  %v6472_v25 = vld [vmem:[#allocation14 + $0x14] ss:$8 sps:$4 sm:$0xff]  }
0x13d5   :  { %v6489_v41 = vld [vmem:[#allocation2 + $0x18] sm:$0xff]  }
0x13d6   :  { %1142 = vrot.lane.b32.xlu1 %v7819_v30, %s7238_s20  ;;  %v6473_v30 = vld [vmem:[#allocation17 + $0x10] ss:$8 sps:$4 sm:$0xff]  }
0x13da   :  { %866 = vrot.lane.b32.xlu1 %v7779_v51, %s7238_s20  ;;  %v6470_v51 = vld [vmem:[#allocation14 + $0x10] ss:$8 sps:$4 sm:$0xff]  }
0x1440   :  { %v1695_v57 = vpop.permute.xlu1 %1694 }
0x1441   :  { %1697 = vst.msk [vmem:[#allocation3] sm:$0xf] %vm723_vm1, %v1695_v57 }
0x1444   :  { %v1419_v58 = vpop.permute.xlu1 %1418 }
0x1445   :  { %1422 = vst.msk [vmem:[#allocation3 + $0x8] sm:$0xf] %vm723_vm1, %v1419_v58 }
0x1448   :  { %v1143_v62 = vpop.permute.xlu1 %1142  ;;  %v6461_v63 = vld [vmem:[#allocation3] sm:$0xff]  }
0x1449   :  { %1146 = vst.msk [vmem:[#allocation3 + $0x10] sm:$0xf] %vm723_vm1, %v1143_v62  ;;  %5882 = vmatmul.mubr.msk.bf16.vlgmr.msra.gmra.mrb[32].mxu0 %vm1766_vm3, %v6461_v63  ;;  %5902 = vmatmul.mubr.msk.bf16.vlgmr.msra.gmra.mrb[32].mxu1 %vm1766_vm3, %v6461_v63 }
0x144a   :  { %1905 = vmatpush1.bf16.msra.mxu0 %v6462_v59  ;;  %2095 = vmatpush1.bf16.msra.mxu1 %v6465_v60 }
0x144b   :  { %1821 = vmatprep.mubr.bf16.mxu0 %v7236_v0  ;;  %2043 = vmatprep.mubr.bf16.mxu1 %v7236_v0 }
0x144c   :  { %v867_v48 = vpop.permute.xlu1 %866  ;;  %1906 = vmatprep.subr.bf16.mxu0 %v6472_v25  ;;  %2096 = vmatprep.subr.bf16.mxu1 %v6475_v3  ;;  %v6468_v2 = vld [vmem:[#allocation3 + $0x8] sm:$0xff]  }
0x144d   :  { %870 = vst.msk [vmem:[#allocation3 + $0x18] sm:$0xf] %vm723_vm1, %v867_v48 }
0x144e   :  { %1907 = vmatpush1.bf16.msra.mxu0 %v6470_v51  ;;  %2097 = vmatpush1.bf16.msra.mxu1 %v6473_v30 }
0x144f   :  { %2332 = vmatprep.subr.bf16.mxu0 %v7906_v1  ;;  %2469 = vmatprep.subr.bf16.mxu1 %v7906_v1 }
0x1450   :  { %v6469_v4 = vld [vmem:[#allocation3 + $0x10] sm:$0xff]  }
0x1451   :  { %5883 = vmatmul.mubr.msk.bf16.gmra.mrb[36].mxu0 %vm1766_vm3, %v6468_v2  ;;  %5903 = vmatmul.mubr.msk.bf16.gmra.mrb[36].mxu1 %vm1766_vm3, %v6468_v2 }
0x1452   :  { %1831 = vmatprep.mubr.bf16.mxu0 %v7236_v0  ;;  %2053 = vmatprep.mubr.bf16.mxu1 %v7236_v0 }
0x1454   :  { %v6476_v11 = vld [vmem:[#allocation3 + $0x18] sm:$0xff]  }
0x1459   :  { %5884 = vmatmul.mubr.msk.bf16.gmra.mrb[40].mxu0 %vm1766_vm3, %v6469_v4  ;;  %5904 = vmatmul.mubr.msk.bf16.gmra.mrb[40].mxu1 %vm1766_vm3, %v6469_v4 }
0x145a   :  { %1841 = vmatprep.mubr.bf16.mxu0 %v7236_v0  ;;  %2063 = vmatprep.mubr.bf16.mxu1 %v7236_v0 }
0x1461   :  { %5885 = vmatmul.mubr.msk.bf16.gmra.mrb[44].mxu0 %vm1766_vm3, %v6476_v11  ;;  %5905 = vmatmul.mubr.msk.bf16.gmra.mrb[44].mxu1 %vm1766_vm3, %v6476_v11 }
0x1462   :  { %1936 = vmatprep.mubr.bf16.mxu0 %v7236_v0  ;;  %2126 = vmatprep.mubr.bf16.mxu1 %v7236_v0 }
0x1469   :  { %5894 = vmatmul.mubr.msk.bf16.vlgmr.msra.gmra.mrb[32].mxu0 %vm1766_vm3, %v6477_v15  ;;  %5910 = vmatmul.mubr.msk.bf16.vlgmr.msra.gmra.mrb[32].mxu1 %vm1766_vm3, %v6477_v15 }
0x146a   :  { %2333 = vmatpush1.bf16.msra.mxu0 %v7926_v5  ;;  %1946 = vmatprep.mubr.bf16.mxu0 %v7236_v0 }
0x146b   :  { %2136 = vmatprep.mubr.bf16.mxu1 %v7236_v0  ;;  %2334 = vmatprep.subr.bf16.mxu0 %v7931_v17 }
0x146c   :  { %2470 = vmatpush1.bf16.msra.mxu1 %v7926_v5 }
0x146d   :  { %2471 = vmatprep.subr.bf16.mxu1 %v7931_v17 }
0x146e   :  { %2335 = vmatpush1.bf16.msra.mxu0 %v7940_v20 }
0x146f   :  { %2336 = vmatprep.subr.bf16.mxu0 %v7947_v29 }
0x1470   :  { %2472 = vmatpush1.bf16.msra.mxu1 %v7940_v20 }
0x1471   :  { %5895 = vmatmul.mubr.msk.bf16.gmra.mrb[36].mxu0 %vm1766_vm3, %v6481_v32  ;;  %5911 = vmatmul.mubr.msk.bf16.gmra.mrb[36].mxu1 %vm1766_vm3, %v6481_v32 }
0x1472   :  { %1956 = vmatprep.mubr.bf16.mxu0 %v7236_v0  ;;  %2146 = vmatprep.mubr.bf16.mxu1 %v7236_v0 }
0x1473   :  { %2337 = vmatpush1.bf16.msra.mxu0 %v7955_v37  ;;  %2473 = vmatprep.subr.bf16.mxu1 %v7947_v29 }
0x1474   :  { %2338 = vmatprep.subr.bf16.mxu0 %v7961_v38  ;;  %2474 = vmatpush1.bf16.msra.mxu1 %v7955_v37 }
0x1475   :  { %2475 = vmatprep.subr.bf16.mxu1 %v7961_v38 }
0x1477   :  { %2339 = vmatpush1.bf16.msra.mxu0 %v7972_v39 }
0x1478   :  { %2476 = vmatpush1.bf16.msra.mxu1 %v7972_v39  ;;  %2607 = vmatprep.subr.bf16.mxu0 %v7906_v1 }
0x1479   :  { %5896 = vmatmul.mubr.msk.bf16.gmra.mrb[40].mxu0 %vm1766_vm3, %v6485_v34  ;;  %5912 = vmatmul.mubr.msk.bf16.gmra.mrb[40].mxu1 %vm1766_vm3, %v6485_v34 }
0x147a   :  { %1966 = vmatprep.mubr.bf16.mxu0 %v7236_v0  ;;  %2156 = vmatprep.mubr.bf16.mxu1 %v7236_v0 }
0x147b   :  { %2745 = vmatprep.subr.bf16.mxu1 %v7906_v1 }
0x1481   :  { %5897 = vmatmul.mubr.msk.bf16.gmra.mrb[44].mxu0 %vm1766_vm3, %v6489_v41  ;;  %5913 = vmatmul.mubr.msk.bf16.gmra.mrb[44].mxu1 %vm1766_vm3, %v6489_v41 }
0x1482   :  { %2364 = vmatprep.mubr.bf16.mxu0 %v7236_v0  ;;  %2501 = vmatprep.mubr.bf16.mxu1 %v7236_v0 }
0x1489   :  { %2365 = vmatmul.mubr.bf16.vlgmr.msra.gmra.mrb[48].mxu0 %v7236_v0 }
0x148a   :  { %2608 = vmatpush1.bf16.msra.mxu0 %v7926_v5  ;;  %2639 = vmatprep.mubr.bf16.mxu0 %v7236_v0 }
0x148b   :  { %2609 = vmatprep.subr.bf16.mxu0 %v7931_v17 }
0x148e   :  { %2610 = vmatpush1.bf16.msra.mxu0 %v7940_v20 }
0x148f   :  { %2611 = vmatprep.subr.bf16.mxu0 %v7947_v29 }
0x1492   :  { %2612 = vmatpush1.bf16.msra.mxu0 %v7955_v37 }
0x1493   :  { %2613 = vmatprep.subr.bf16.mxu0 %v7961_v38 }
0x1496   :  { %2614 = vmatpush1.bf16.msra.mxu0 %v7972_v39 }
0x1497   :  { %2883 = vmatprep.subr.bf16.mxu0 %v7906_v1 }
0x153c   :  { %v1938_v6 = vpop.f32.mrb[32].mxu0  ;;  %v8003_v36 = vpop.f32.mrb[32].mxu1 }
0x153d   :  { %v1940_v26 = vpop.f32.mrb[33].mxu0  ;;  %v8006_v8 = vpop.f32.mrb[33].mxu1  ;;  %v2179_v34 = vadd.f32 %v2172_v23, %v1938_v6 }
0x153e   :  { %v1942_v10 = vpop.f32.mrb[34].mxu0  ;;  %v2132_v12 = vpop.f32.mrb[34].mxu1 }
0x153f   :  { %v2181_v13 = vadd.f32 %v2172_v23, %v1942_v10  ;;  %v1944_v27 = vpop.f32.mrb[35].mxu0  ;;  %v2134_v14 = vpop.f32.mrb[35].mxu1 }
0x1540   :  { %v2182_v43 = vadd.f32 %v2176_v9, %v1944_v27 }
0x1544   :  { %v1948_v44 = vpop.f32.mrb[36].mxu0  ;;  %v2138_v18 = vpop.f32.mrb[36].mxu1 }
0x1545   :  { %v2183_v7 = vadd.f32 %v2172_v23, %v1948_v44  ;;  %v1950_v45 = vpop.f32.mrb[37].mxu0  ;;  %v2140_v35 = vpop.f32.mrb[37].mxu1  ;;  %v2180_v44 = vadd.f32 %v2176_v9, %v1940_v26 }
0x1546   :  { %v2184_v16 = vadd.f32 %v2176_v9, %v1950_v45  ;;  %v1952_v40 = vpop.f32.mrb[38].mxu0  ;;  %v2142_v46 = vpop.f32.mrb[38].mxu1 }
0x1547   :  { %v2185_v61 = vadd.f32 %v2172_v23, %v1952_v40  ;;  %v1954_v31 = vpop.f32.mrb[39].mxu0  ;;  %v2144_v47 = vpop.f32.mrb[39].mxu1 }
0x1548   :  { %v2186_v33 = vadd.f32 %v2176_v9, %v1954_v31 }
0x154c   :  { %v1958_v49 = vpop.f32.mrb[40].mxu0  ;;  %v2148_v50 = vpop.f32.mrb[40].mxu1 }
0x154d   :  { %v2187_v52 = vadd.f32 %v2172_v23, %v1958_v49  ;;  %v2228_v53 = vadd.f32 %v2185_v61, %v2148_v50  ;;  %v1960_v54 = vpop.f32.mrb[41].mxu0  ;;  %v2150_v22 = vpop.f32.mrb[41].mxu1 }
0x154e   :  { %v2188_v24 = vadd.f32 %v2176_v9, %v1960_v54  ;;  %v2229_v28 = vadd.f32 %v2186_v33, %v2150_v22  ;;  %v1962_v55 = vpop.f32.mrb[42].mxu0  ;;  %v2152_v56 = vpop.f32.mrb[42].mxu1 }
0x154f   :  { %v2239_v57 = vadd.f32 %v2187_v52, %v2142_v46  ;;  %v2189_v58 = vadd.f32 %v2172_v23, %v1962_v55  ;;  %v2217_v59 = vadd.f32 %v2183_v7, %v2152_v56  ;;  %v1964_v60 = vpop.f32.mrb[43].mxu0  ;;  %v2154_v62 = vpop.f32.mrb[43].mxu1 }
0x1550   :  { %v2240_v63 = vadd.f32 %v2188_v24, %v2144_v47  ;;  %v8009_v25 = vpack.c.bf16 %v2229_v28, %v2228_v53  ;;  %v2190_v3 = vadd.f32 %v2176_v9, %v1964_v60  ;;  %v2218_v51 = vadd.f32 %v2184_v16, %v2154_v62 }
0x1551   :  { %v2250_v30 = vadd.f32 %v2189_v58, %v2138_v18 }
0x1552   :  { %v2251_v48 = vadd.f32 %v2190_v3, %v2140_v35  ;;  %v8011_v2 = vpack.c.bf16 %v2218_v51, %v2217_v59  ;;  %v8013_v4 = vpack.c.bf16 %v2240_v63, %v2239_v57 }
0x1554   :  { %v1968_v11 = vpop.f32.mrb[44].mxu0  ;;  %v2158_v15 = vpop.f32.mrb[44].mxu1  ;;  %v8015_v32 = vpack.c.bf16 %v2251_v48, %v2250_v30 }
0x1555   :  { %v2191_v41 = vadd.f32 %v2172_v23, %v1968_v11  ;;  %v2206_v42 = vadd.f32 %v2181_v13, %v2158_v15  ;;  %v1970_v10 = vpop.f32.mrb[45].mxu0  ;;  %v2160_v27 = vpop.f32.mrb[45].mxu1 }
0x1556   :  { %v2192_v7 = vadd.f32 %v2176_v9, %v1970_v10  ;;  %v2207_v45 = vadd.f32 %v2182_v43, %v2160_v27  ;;  %v1972_v40 = vpop.f32.mrb[46].mxu0  ;;  %v2162_v16 = vpop.f32.mrb[46].mxu1 }
0x1557   :  { %v2261_v18 = vadd.f32 %v2191_v41, %v2132_v12  ;;  %v2193_v35 = vadd.f32 %v2172_v23, %v1972_v40  ;;  %v2195_v46 = vadd.f32 %v2179_v34, %v2162_v16  ;;  %v1974_v61 = vpop.f32.mrb[47].mxu0  ;;  %v2164_v31 = vpop.f32.mrb[47].mxu1 }
0x1558   :  { %v2262_v47 = vadd.f32 %v2192_v7, %v2134_v14  ;;  %v6224_v33 = vpack.c.bf16 %v2207_v45, %v2206_v42  ;;  %v2194_v49 = vadd.f32 %v2176_v9, %v1974_v61  ;;  %v2196_v50 = vadd.f32 %v2180_v44, %v2164_v31 }
0x1559   :  { %v2272_v6 = vadd.f32 %v2193_v35, %v8003_v36 }
0x155a   :  { %v2273_v13 = vadd.f32 %v2194_v49, %v8006_v8  ;;  %v6223_v52 = vpack.c.bf16 %v2196_v50, %v2195_v46  ;;  %v8019_v53 = vpack.c.bf16 %v2262_v47, %v2261_v18  ;;  %v2510_v41 = vunpack.c.l.bf16 %v6224_v33 }
0x155b   :  { %v2511_v10 = vunpack.c.h.bf16 %v6224_v33 }
0x155c   :  { %v2366_v26 = vpop.f32.mrb[48].mxu0  ;;  %v2373_v43 = vunpack.c.l.bf16 %v6223_v52  ;;  %v2374_v54 = vunpack.c.h.bf16 %v6223_v52  ;;  %v8021_v22 = vpack.c.bf16 %v2273_v13, %v2272_v6 }
0x155d   :  { %v2368_v23 = vpop.f32.mrb[49].mxu0 }
0x155e   :  { %v2375_v12 = vadd.f32 %v2373_v43, %v2366_v26  ;;  %v2376_v24 = vadd.f32 %v2374_v54, %v2368_v23  ;;  %v2370_v28 = vpop.f32.mrb[50].mxu0 }
0x155f   :  { %v2371_v14 = vpop.f32.mrb[51].mxu0 }
0x1560   :  { %6681 = vtanh.f32 %v2376_v24  ;;  %v5930_v36 = vmul.f32 -1.442695, %v2375_v12  ;;  %v5931_v3 = vmul.f32 -1.442695, %v2376_v24  ;;  %v2648_v24 = vunpack.c.l.bf16 %v8011_v2 }
0x1561   :  { %v2649_v14 = vunpack.c.h.bf16 %v8011_v2 }
0x1562   :  { %6683 = vpow2.f32 %v5930_v36 }
0x156a   :  { %v6682_v9 = vpop.eup %6681 }
0x156b   :  { %2392 = vrot.lane.b32.xlu0 %v6682_v9, %s7237_s21 }
0x156c   :  { %v6684_v8 = vpop.eup %6683 }
0x156d   :  { %v2383_v55 = vadd.f32 1.0, %v6684_v8 }
0x156f   :  { %6685 = vrcp.f32 %v2383_v55 }
0x1579   :  { %v6686_v56 = vpop.eup %6685 }
0x157a   :  { %v2390_v59 = vmul.f32 0.0, %v6686_v56 }
0x15dd   :  { %v2393_v57 = vpop.permute.xlu0 %2392 }
0x15de   :  { %v2395_v58 = vmul.f32 %v6686_v56, %v2393_v57 }
0x15e0   :  { %2397 = vrot.lane.b32.xlu1 %v2395_v58, %s7237_s21 }
0x1652   :  { %v2398_v60 = vpop.permute.xlu1 %2397 }
0x1653   :  { %v2400_v62 = vadd.f32 %v2398_v60, %v2390_v59 }
0x1655   :  { %6687 = vtanh.f32 %v2400_v62 }
0x1656   :  { %6689 = vpow2.f32 %v5931_v3 }
0x165f   :  { %v6688_v63 = vpop.eup %6687 }
0x1660   :  { %2403 = vrot.lane.b32.xlu0 %v6688_v63, %s7237_s21  ;;  %v6690_v51 = vpop.eup %6689 }
0x1661   :  { %v2384_v30 = vadd.f32 1.0, %v6690_v51 }
0x1663   :  { %6691 = vrcp.f32 %v2384_v30 }
0x166d   :  { %v6692_v48 = vpop.eup %6691 }
0x16d2   :  { %v2404_v11 = vpop.permute.xlu0 %2403 }
0x16d3   :  { %v2406_v15 = vmul.f32 %v6692_v48, %v2404_v11 }
0x16d5   :  { %v8026_v34 = vpack.c.bf16 %v2406_v15, %v2406_v15 }
0x16d7   :  { %2408 = vst.msk [vmem:[#allocation4] sm:$0xf] %vm723_vm1, %v8026_v34  ;;  %5941 = vmatmul.mubr.msk.bf16.vlgmr.msra.gmra.mrb[48].mxu1 %vm643_vm2, %v8026_v34 }
0x16d8   :  { %2746 = vmatpush1.bf16.msra.mxu1 %v7926_v5  ;;  %2777 = vmatprep.mubr.bf16.mxu1 %v7236_v0 }
0x16d9   :  { %2747 = vmatprep.subr.bf16.mxu1 %v7931_v17 }
0x16dc   :  { %2748 = vmatpush1.bf16.msra.mxu1 %v7940_v20 }
0x16dd   :  { %2749 = vmatprep.subr.bf16.mxu1 %v7947_v29 }
0x16e0   :  { %2750 = vmatpush1.bf16.msra.mxu1 %v7955_v37 }
0x16e1   :  { %2751 = vmatprep.subr.bf16.mxu1 %v7961_v38 }
0x16e4   :  { %2752 = vmatpush1.bf16.msra.mxu1 %v7972_v39 }
0x16e5   :  { %3021 = vmatprep.subr.bf16.mxu1 %v7906_v1 }
0x17aa   :  { %v2503_v42 = vpop.f32.mrb[48].mxu1 }
0x17ab   :  { %v2512_v27 = vadd.f32 %v2510_v41, %v2503_v42  ;;  %v2505_v44 = vpop.f32.mrb[49].mxu1 }
0x17ac   :  { %v2513_v7 = vadd.f32 %v2511_v10, %v2505_v44  ;;  %v2507_v45 = vpop.f32.mrb[50].mxu1  ;;  %v2786_v44 = vunpack.c.l.bf16 %v8009_v25 }
0x17ad   :  { %v2508_v40 = vpop.f32.mrb[51].mxu1  ;;  %v5942_v18 = vmul.f32 -1.442695, %v2512_v27  ;;  %v2787_v45 = vunpack.c.h.bf16 %v8009_v25 }
0x17ae   :  { %6693 = vtanh.f32 %v2513_v7  ;;  %v5943_v13 = vmul.f32 -1.442695, %v2513_v7 }
0x17af   :  { %6695 = vpow2.f32 %v5942_v18 }
0x17b8   :  { %v6694_v16 = vpop.eup %6693 }
0x17b9   :  { %2529 = vrot.lane.b32.xlu1 %v6694_v16, %s7237_s21  ;;  %v6696_v35 = vpop.eup %6695 }
0x17ba   :  { %v2520_v46 = vadd.f32 1.0, %v6696_v35 }
0x17bc   :  { %6697 = vrcp.f32 %v2520_v46 }
0x17c6   :  { %v6698_v61 = vpop.eup %6697 }
0x17c7   :  { %v2527_v33 = vmul.f32 %v6698_v61, %v2400_v62 }
0x182b   :  { %v2530_v31 = vpop.permute.xlu1 %2529 }
0x182c   :  { %v2532_v47 = vmul.f32 %v6698_v61, %v2530_v31 }
0x182e   :  { %2534 = vrot.lane.b32.xlu0 %v2532_v47, %s7237_s21 }
0x18a0   :  { %v2535_v49 = vpop.permute.xlu0 %2534 }
0x18a1   :  { %v2537_v50 = vadd.f32 %v2535_v49, %v2527_v33 }
0x18a3   :  { %6699 = vtanh.f32 %v2537_v50 }
0x18a4   :  { %6701 = vpow2.f32 %v5943_v13 }
0x18ad   :  { %v6700_v6 = vpop.eup %6699 }
0x18ae   :  { %2540 = vrot.lane.b32.xlu1 %v6700_v6, %s7237_s21  ;;  %v6702_v52 = vpop.eup %6701 }
0x18af   :  { %v2521_v26 = vadd.f32 1.0, %v6702_v52 }
0x18b1   :  { %6703 = vrcp.f32 %v2521_v26 }
0x18bb   :  { %v6704_v43 = vpop.eup %6703 }
0x1920   :  { %v2541_v54 = vpop.permute.xlu1 %2540 }
0x1921   :  { %v2543_v23 = vmul.f32 %v6704_v43, %v2541_v54 }
0x1923   :  { %v8044_v12 = vpack.c.bf16 %v2543_v23, %v2543_v23 }
0x1925   :  { %2546 = vst.msk [vmem:[#allocation4 + $0x4] sm:$0xf] %vm723_vm1, %v8044_v12  ;;  %5953 = vmatmul.mubr.msk.bf16.vlgmr.msra.gmra.mrb[52].mxu0 %vm643_vm2, %v8044_v12 }
0x1926   :  { %2884 = vmatpush1.bf16.msra.mxu0 %v7926_v5  ;;  %2915 = vmatprep.mubr.bf16.mxu0 %v7236_v0 }
0x1927   :  { %2885 = vmatprep.subr.bf16.mxu0 %v7931_v17 }
0x192a   :  { %2886 = vmatpush1.bf16.msra.mxu0 %v7940_v20 }
0x192b   :  { %2887 = vmatprep.subr.bf16.mxu0 %v7947_v29 }
0x192e   :  { %2888 = vmatpush1.bf16.msra.mxu0 %v7955_v37 }
0x192f   :  { %2889 = vmatprep.subr.bf16.mxu0 %v7961_v38 }
0x1932   :  { %2890 = vmatpush1.bf16.msra.mxu0 %v7972_v39 }
0x1933   :  { %3159 = vmatprep.subr.bf16.mxu0 %v7906_v1 }
0x19f8   :  { %v2641_v28 = vpop.f32.mrb[52].mxu0 }
0x19f9   :  { %v2650_v9 = vadd.f32 %v2648_v24, %v2641_v28  ;;  %v2643_v36 = vpop.f32.mrb[53].mxu0 }
0x19fa   :  { %v2651_v8 = vadd.f32 %v2649_v14, %v2643_v36  ;;  %v2645_v55 = vpop.f32.mrb[54].mxu0  ;;  %v2924_v36 = vunpack.c.l.bf16 %v8013_v4 }
0x19fb   :  { %v2646_v56 = vpop.f32.mrb[55].mxu0  ;;  %v5954_v58 = vmul.f32 -1.442695, %v2650_v9  ;;  %v2925_v55 = vunpack.c.h.bf16 %v8013_v4 }
0x19fc   :  { %6705 = vtanh.f32 %v2651_v8  ;;  %v5955_v48 = vmul.f32 -1.442695, %v2651_v8 }
0x19fd   :  { %6707 = vpow2.f32 %v5954_v58 }
0x1a06   :  { %v6706_v57 = vpop.eup %6705 }
0x1a07   :  { %2667 = vrot.lane.b32.xlu0 %v6706_v57, %s7237_s21  ;;  %v6708_v59 = vpop.eup %6707 }
0x1a08   :  { %v2658_v60 = vadd.f32 1.0, %v6708_v59 }
0x1a0a   :  { %6709 = vrcp.f32 %v2658_v60 }
0x1a14   :  { %v6710_v1 = vpop.eup %6709 }
0x1a15   :  { %v2665_v2 = vmul.f32 %v6710_v1, %v2537_v50 }
0x1a79   :  { %v2668_v62 = vpop.permute.xlu0 %2667 }
0x1a7a   :  { %v2670_v63 = vmul.f32 %v6710_v1, %v2668_v62 }
0x1a7c   :  { %2672 = vrot.lane.b32.xlu1 %v2670_v63, %s7237_s21 }
0x1aee   :  { %v2673_v3 = vpop.permute.xlu1 %2672 }
0x1aef   :  { %v2675_v51 = vadd.f32 %v2673_v3, %v2665_v2 }
0x1af1   :  { %6711 = vtanh.f32 %v2675_v51 }
0x1af2   :  { %6713 = vpow2.f32 %v5955_v48 }
0x1afb   :  { %v6712_v30 = vpop.eup %6711 }
0x1afc   :  { %2678 = vrot.lane.b32.xlu0 %v6712_v30, %s7237_s21  ;;  %v6714_v11 = vpop.eup %6713 }
0x1afd   :  { %v2659_v15 = vadd.f32 1.0, %v6714_v11 }
0x1aff   :  { %6715 = vrcp.f32 %v2659_v15 }
0x1b09   :  { %v6716_v41 = vpop.eup %6715 }
0x1b6e   :  { %v2679_v42 = vpop.permute.xlu0 %2678 }
0x1b6f   :  { %v2681_v10 = vmul.f32 %v6716_v41, %v2679_v42  ;;  %v3062_v41 = vunpack.c.l.bf16 %v8015_v32 }
0x1b71   :  { %v8064_v27 = vpack.c.bf16 %v2681_v10, %v2681_v10  ;;  %v3063_v10 = vunpack.c.h.bf16 %v8015_v32 }
0x1b73   :  { %2684 = vst.msk [vmem:[#allocation4 + $0x8] sm:$0xf] %vm723_vm1, %v8064_v27  ;;  %5965 = vmatmul.mubr.msk.bf16.vlgmr.msra.gmra.mrb[52].mxu1 %vm643_vm2, %v8064_v27 }
0x1b74   :  { %3022 = vmatpush1.bf16.msra.mxu1 %v7926_v5  ;;  %3053 = vmatprep.mubr.bf16.mxu1 %v7236_v0 }
0x1b75   :  { %3023 = vmatprep.subr.bf16.mxu1 %v7931_v17 }
0x1b78   :  { %3024 = vmatpush1.bf16.msra.mxu1 %v7940_v20 }
0x1b79   :  { %3025 = vmatprep.subr.bf16.mxu1 %v7947_v29 }
0x1b7c   :  { %3026 = vmatpush1.bf16.msra.mxu1 %v7955_v37 }
0x1b7d   :  { %3027 = vmatprep.subr.bf16.mxu1 %v7961_v38 }
0x1b80   :  { %3028 = vmatpush1.bf16.msra.mxu1 %v7972_v39 }
0x1c46   :  { %v2779_v7 = vpop.f32.mrb[52].mxu1 }
0x1c47   :  { %v2788_v40 = vadd.f32 %v2786_v44, %v2779_v7  ;;  %v2781_v16 = vpop.f32.mrb[53].mxu1 }
0x1c48   :  { %v2789_v18 = vadd.f32 %v2787_v45, %v2781_v16  ;;  %v2783_v35 = vpop.f32.mrb[54].mxu1 }
0x1c49   :  { %v2784_v46 = vpop.f32.mrb[55].mxu1  ;;  %v5966_v31 = vmul.f32 -1.442695, %v2788_v40 }
0x1c4a   :  { %6717 = vtanh.f32 %v2789_v18  ;;  %v5967_v43 = vmul.f32 -1.442695, %v2789_v18 }
0x1c4b   :  { %6719 = vpow2.f32 %v5966_v31 }
0x1c54   :  { %v6718_v61 = vpop.eup %6717 }
0x1c55   :  { %2805 = vrot.lane.b32.xlu1 %v6718_v61, %s7237_s21  ;;  %v6720_v47 = vpop.eup %6719 }
0x1c56   :  { %v2796_v33 = vadd.f32 1.0, %v6720_v47 }
0x1c58   :  { %6721 = vrcp.f32 %v2796_v33 }
0x1c62   :  { %v6722_v49 = vpop.eup %6721 }
0x1c63   :  { %v2803_v25 = vmul.f32 %v6722_v49, %v2675_v51 }
0x1cc7   :  { %v2806_v50 = vpop.permute.xlu1 %2805 }
0x1cc8   :  { %v2808_v6 = vmul.f32 %v6722_v49, %v2806_v50 }
0x1cca   :  { %2810 = vrot.lane.b32.xlu0 %v2808_v6, %s7237_s21  ;;  %v6495_v6 = vld [vmem:[#allocation22 + $0x4] ss:$8 sps:$4 sm:$0xff]  }
0x1d3c   :  { %v2811_v13 = vpop.permute.xlu0 %2810 }
0x1d3d   :  { %v2813_v52 = vadd.f32 %v2811_v13, %v2803_v25 }
0x1d3f   :  { %6723 = vtanh.f32 %v2813_v52 }
0x1d40   :  { %6725 = vpow2.f32 %v5967_v43 }
0x1d49   :  { %v6724_v26 = vpop.eup %6723 }
0x1d4a   :  { %2816 = vrot.lane.b32.xlu1 %v6724_v26, %s7237_s21  ;;  %v6726_v54 = vpop.eup %6725 }
0x1d4b   :  { %v2797_v23 = vadd.f32 1.0, %v6726_v54 }
0x1d4d   :  { %6727 = vrcp.f32 %v2797_v23 }
0x1d57   :  { %v6728_v24 = vpop.eup %6727 }
0x1dbc   :  { %v2817_v28 = vpop.permute.xlu1 %2816 }
0x1dbd   :  { %v2819_v14 = vmul.f32 %v6728_v24, %v2817_v28  ;;  %v6493_v24 = vld [vmem:[#allocation22] ss:$8 sps:$4 sm:$0xff]  }
0x1dbf   :  { %v8083_v9 = vpack.c.bf16 %v2819_v14, %v2819_v14  ;;  %v6498_v14 = vld [vmem:[#allocation22 + $0x14] ss:$8 sps:$4 sm:$0xff]  }
0x1dc1   :  { %2822 = vst.msk [vmem:[#allocation4 + $0xc] sm:$0xf] %vm723_vm1, %v8083_v9  ;;  %5977 = vmatmul.mubr.msk.bf16.vlgmr.msra.gmra.mrb[56].mxu0 %vm643_vm2, %v8083_v9 }
0x1dc2   :  { %3160 = vmatpush1.bf16.msra.mxu0 %v7926_v5  ;;  %3191 = vmatprep.mubr.bf16.mxu0 %v7236_v0 }
0x1dc3   :  { %3161 = vmatprep.subr.bf16.mxu0 %v7931_v17 }
0x1dc6   :  { %3162 = vmatpush1.bf16.msra.mxu0 %v7940_v20 }
0x1dc7   :  { %3163 = vmatprep.subr.bf16.mxu0 %v7947_v29 }
0x1dca   :  { %3164 = vmatpush1.bf16.msra.mxu0 %v7955_v37 }
0x1dcb   :  { %3165 = vmatprep.subr.bf16.mxu0 %v7961_v38 }
0x1dce   :  { %3166 = vmatpush1.bf16.msra.mxu0 %v7972_v39 }
0x1dcf   :  { %3462 = vmatprep.subr.bf16.mxu0 %v6495_v6  ;;  %v6533_v6 = vld [vmem:[%s8531_s10 + $0x34] ss:$8 sps:$4 sm:$0xff]  }
0x1e94   :  { %v2917_v8 = vpop.f32.mrb[56].mxu0 }
0x1e95   :  { %v2926_v5 = vadd.f32 %v2924_v36, %v2917_v8  ;;  %v2919_v56 = vpop.f32.mrb[57].mxu0  ;;  %v6496_v36 = vld [vmem:[#allocation22 + $0x10] ss:$8 sps:$4 sm:$0xff]   ;;  %v6505_v8 = vld [vmem:[#allocation20 + $0x4] ss:$8 sps:$4 sm:$0xff]  }
0x1e96   :  { %v2927_v57 = vadd.f32 %v2925_v55, %v2919_v56  ;;  %v2921_v58 = vpop.f32.mrb[58].mxu0  ;;  %v6503_v55 = vld [vmem:[#allocation20] ss:$8 sps:$4 sm:$0xff]   ;;  %v6508_v56 = vld [vmem:[#allocation20 + $0x14] ss:$8 sps:$4 sm:$0xff]  }
0x1e97   :  { %v2922_v17 = vpop.f32.mrb[59].mxu0  ;;  %v5978_v29 = vmul.f32 -1.442695, %v2926_v5  ;;  %v8124_v5 = vld [vmem:[#allocation3] sm:$0xff]  }
0x1e98   :  { %6729 = vtanh.f32 %v2927_v57  ;;  %v5979_v2 = vmul.f32 -1.442695, %v2927_v57  ;;  %v6506_v57 = vld [vmem:[#allocation20 + $0x10] ss:$8 sps:$4 sm:$0xff]   ;;  %v6515_v58 = vld [vmem:[#allocation23 + $0x4] ss:$8 sps:$4 sm:$0xff]  }
0x1e99   :  { %6731 = vpow2.f32 %v5978_v29  ;;  %v8129_v17 = vld [vmem:[#allocation3 + $0x8] sm:$0xff]   ;;  %v8139_v29 = vld [vmem:[#allocation3 + $0x18] sm:$0xff]  }
0x1ea2   :  { %v6730_v20 = vpop.eup %6729 }
0x1ea3   :  { %2943 = vrot.lane.b32.xlu0 %v6730_v20, %s7237_s21  ;;  %v6732_v37 = vpop.eup %6731  ;;  %v8134_v20 = vld [vmem:[#allocation3 + $0x10] sm:$0xff]  }
0x1ea4   :  { %v2934_v38 = vadd.f32 1.0, %v6732_v37  ;;  %v6513_v37 = vld [vmem:[#allocation23] ss:$8 sps:$4 sm:$0xff]  }
0x1ea6   :  { %6733 = vrcp.f32 %v2934_v38  ;;  %v8144_v38 = vld [vmem:[#allocation2] sm:$0xff]  }
0x1eb0   :  { %v6734_v39 = vpop.eup %6733 }
0x1eb1   :  { %v2941_v4 = vmul.f32 %v6734_v39, %v2813_v52 }
0x1f15   :  { %v2944_v59 = vpop.permute.xlu0 %2943 }
0x1f16   :  { %v2946_v60 = vmul.f32 %v6734_v39, %v2944_v59  ;;  %v6518_v39 = vld [vmem:[#allocation23 + $0x14] ss:$8 sps:$4 sm:$0xff]   ;;  %v6516_v59 = vld [vmem:[#allocation23 + $0x10] ss:$8 sps:$4 sm:$0xff]  }
0x1f18   :  { %2948 = vrot.lane.b32.xlu1 %v2946_v60, %s7237_s21  ;;  %v8149_v60 = vld [vmem:[#allocation2 + $0x8] sm:$0xff]  }
0x1f8a   :  { %v2949_v1 = vpop.permute.xlu1 %2948 }
0x1f8b   :  { %v2951_v62 = vadd.f32 %v2949_v1, %v2941_v4  ;;  %v8154_v4 = vld [vmem:[#allocation2 + $0x10] sm:$0xff]   ;;  %v8159_v1 = vld [vmem:[#allocation2 + $0x18] sm:$0xff]  }
0x1f8d   :  { %6735 = vtanh.f32 %v2951_v62 }
0x1f8e   :  { %6737 = vpow2.f32 %v5979_v2 }
0x1f97   :  { %v6736_v63 = vpop.eup %6735 }
0x1f98   :  { %2954 = vrot.lane.b32.xlu0 %v6736_v63, %s7237_s21  ;;  %v6738_v3 = vpop.eup %6737  ;;  %v8169_v63 = vld [vmem:[#allocation4 + $0x8] sm:$0xff]  }
0x1f99   :  { %v2935_v51 = vadd.f32 1.0, %v6738_v3  ;;  %v3200_v3 = vunpack.c.l.bf16 %v8019_v53 }
0x1f9b   :  { %6739 = vrcp.f32 %v2935_v51 }
0x1fa5   :  { %v6740_v30 = vpop.eup %6739 }
0x200a   :  { %v2955_v48 = vpop.permute.xlu0 %2954 }
0x200b   :  { %v2957_v11 = vmul.f32 %v6740_v30, %v2955_v48  ;;  %v3201_v30 = vunpack.c.h.bf16 %v8019_v53  ;;  %v6522_v53 = vld [vmem:[%s8531_s10] ss:$8 sps:$4 sm:$0xff]  }
0x200d   :  { %v8102_v15 = vpack.c.bf16 %v2957_v11, %v2957_v11 }
0x200f   :  { %2960 = vst.msk [vmem:[#allocation4 + $0x10] sm:$0xf] %vm723_vm1, %v8102_v15  ;;  %5989 = vmatmul.mubr.msk.bf16.vlgmr.msra.gmra.mrb[56].mxu1 %vm643_vm2, %v8102_v15 }
0x2010   :  { %3329 = vmatprep.mubr.bf16.mxu1 %v7236_v0 }
0x20e2   :  { %v3055_v42 = vpop.f32.mrb[56].mxu1 }
0x20e3   :  { %v3064_v44 = vadd.f32 %v3062_v41, %v3055_v42  ;;  %v3057_v7 = vpop.f32.mrb[57].mxu1 }
0x20e4   :  { %v3065_v45 = vadd.f32 %v3063_v10, %v3057_v7  ;;  %v3059_v40 = vpop.f32.mrb[58].mxu1 }
0x20e5   :  { %v3060_v16 = vpop.f32.mrb[59].mxu1  ;;  %v5990_v35 = vmul.f32 -1.442695, %v3064_v44 }
0x20e6   :  { %6741 = vtanh.f32 %v3065_v45  ;;  %v5991_v13 = vmul.f32 -1.442695, %v3065_v45 }
0x20e7   :  { %6743 = vpow2.f32 %v5990_v35 }
0x20f0   :  { %v6742_v18 = vpop.eup %6741 }
0x20f1   :  { %3081 = vrot.lane.b32.xlu1 %v6742_v18, %s7237_s21  ;;  %v6744_v46 = vpop.eup %6743 }
0x20f2   :  { %v3072_v61 = vadd.f32 1.0, %v6744_v46  ;;  %v6524_v46 = vld [vmem:[%s8531_s10 + $0x4] ss:$8 sps:$4 sm:$0xff]  }
0x20f3   :  { %3297 = vmatprep.subr.bf16.mxu1 %v6524_v46  ;;  %v6564_v46 = vld [vmem:[#allocation29 + $0x14] ss:$8 sps:$4 sm:$0xff]  }
0x20f4   :  { %6745 = vrcp.f32 %v3072_v61  ;;  %v6527_v61 = vld [vmem:[%s8531_s10 + $0x14] ss:$8 sps:$4 sm:$0xff]   ;;  %3298 = vmatpush1.bf16.msra.mxu1 %v6522_v53 }
0x20f5   :  { %3299 = vmatprep.subr.bf16.mxu1 %v6527_v61  ;;  %v6561_v53 = vld [vmem:[#allocation25 + $0x14] ss:$8 sps:$4 sm:$0xff]   ;;  %v6559_v61 = vld [vmem:[#allocation25 + $0x10] ss:$8 sps:$4 sm:$0xff]  }
0x20fe   :  { %v6746_v31 = vpop.eup %6745 }
0x20ff   :  { %v3079_v32 = vmul.f32 %v6746_v31, %v2951_v62  ;;  %v8164_v62 = vld [vmem:[#allocation4] sm:$0xff]  }
0x2163   :  { %v3082_v47 = vpop.permute.xlu1 %3081 }
0x2164   :  { %v3084_v33 = vmul.f32 %v6746_v31, %v3082_v47  ;;  %v6525_v31 = vld [vmem:[%s8531_s10 + $0x10] ss:$8 sps:$4 sm:$0xff]   ;;  %v6530_v47 = vld [vmem:[%s8531_s10 + $0x24] ss:$8 sps:$4 sm:$0xff]  }
0x2165   :  { %3300 = vmatpush1.bf16.msra.mxu1 %v6525_v31  ;;  %v6562_v31 = vld [vmem:[#allocation29 + $0x10] ss:$8 sps:$4 sm:$0xff]  }
0x2166   :  { %3086 = vrot.lane.b32.xlu0 %v3084_v33, %s7237_s21  ;;  %v6528_v33 = vld [vmem:[%s8531_s10 + $0x20] ss:$8 sps:$4 sm:$0xff]   ;;  %3301 = vmatprep.subr.bf16.mxu1 %v6530_v47 }
0x2169   :  { %3302 = vmatpush1.bf16.msra.mxu1 %v6528_v33 }
0x216a   :  { %3303 = vmatprep.subr.bf16.mxu1 %v6533_v6 }
0x21d8   :  { %v3087_v49 = vpop.permute.xlu0 %3086 }
0x21d9   :  { %v8113_v50 = vadd.f32 %v3087_v49, %v3079_v32 }
0x21db   :  { %6747 = vtanh.f32 %v8113_v50 }
0x21dc   :  { %6749 = vpow2.f32 %v5991_v13  ;;  %v6531_v13 = vld [vmem:[%s8531_s10 + $0x30] ss:$8 sps:$4 sm:$0xff]  }
0x21dd   :  { %3304 = vmatpush1.bf16.msra.mxu1 %v6531_v13  ;;  %v8282_v13 = vld [vmem:[#allocation31 + $0x4] ss:$8 sps:$4 sm:$0xff]  }
0x21e5   :  { %v6748_v25 = vpop.eup %6747 }
0x21e6   :  { %3092 = vrot.lane.b32.xlu1 %v6748_v25, %s7237_s21  ;;  %v6750_v52 = vpop.eup %6749 }
0x21e7   :  { %v3073_v26 = vadd.f32 1.0, %v6750_v52  ;;  %v6536_v52 = vld [vmem:[#allocation28 + $0x4] ss:$8 sps:$4 sm:$0xff]  }
0x21e8   :  { %3684 = vmatprep.subr.bf16.mxu1 %v6536_v52 }
0x21e9   :  { %6751 = vrcp.f32 %v3073_v26 }
0x21f3   :  { %v6752_v43 = vpop.eup %6751 }
0x2258   :  { %v3093_v54 = vpop.permute.xlu1 %3092 }
0x2259   :  { %v3095_v23 = vmul.f32 %v6752_v43, %v3093_v54 }
0x225b   :  { %v8117_v28 = vpack.c.bf16 %v3095_v23, %v3095_v23 }
0x225d   :  { %3098 = vst.msk [vmem:[#allocation4 + $0x14] sm:$0xf] %vm723_vm1, %v8117_v28  ;;  %6001 = vmatmul.mubr.msk.bf16.vlgmr.msra.gmra.mrb[60].mxu0 %vm643_vm2, %v8117_v28 }
0x225e   :  { %3463 = vmatpush1.bf16.msra.mxu0 %v6493_v24  ;;  %3494 = vmatprep.mubr.bf16.mxu0 %v7236_v0 }
0x225f   :  { %3464 = vmatprep.subr.bf16.mxu0 %v6498_v14 }
0x2262   :  { %3465 = vmatpush1.bf16.msra.mxu0 %v6496_v36  ;;  %v6534_v36 = vld [vmem:[#allocation28] ss:$8 sps:$4 sm:$0xff]  }
0x2263   :  { %3587 = vmatprep.subr.bf16.mxu0 %v6505_v8 }
0x2264   :  { %v8174_v2 = vld [vmem:[#allocation4 + $0x10] sm:$0xff]  }
0x2265   :  { %6025 = vmatmul.mubr.msk.bf16.vlgmr.msra.gmra.mrb[64].mxu0 %vm1766_vm3, %v8124_v5 }
0x2266   :  { %3504 = vmatprep.mubr.bf16.mxu0 %v7236_v0  ;;  %3588 = vmatpush1.bf16.msra.mxu0 %v6503_v55  ;;  %v6539_v55 = vld [vmem:[#allocation28 + $0x14] ss:$8 sps:$4 sm:$0xff]  }
0x2267   :  { %3589 = vmatprep.subr.bf16.mxu0 %v6508_v56  ;;  %v6537_v56 = vld [vmem:[#allocation28 + $0x10] ss:$8 sps:$4 sm:$0xff]  }
0x226a   :  { %3590 = vmatpush1.bf16.msra.mxu0 %v6506_v57  ;;  %v6542_v57 = vld [vmem:[#allocation26 + $0x4] ss:$8 sps:$4 sm:$0xff]  }
0x226b   :  { %3914 = vmatprep.subr.bf16.mxu0 %v6515_v58  ;;  %v6540_v58 = vld [vmem:[#allocation26] ss:$8 sps:$4 sm:$0xff]  }
0x226d   :  { %6026 = vmatmul.mubr.msk.bf16.gmra.mrb[68].mxu0 %vm1766_vm3, %v8129_v17 }
0x226e   :  { %3514 = vmatprep.mubr.bf16.mxu0 %v7236_v0 }
0x2275   :  { %6027 = vmatmul.mubr.msk.bf16.gmra.mrb[72].mxu0 %vm1766_vm3, %v8134_v20 }
0x2276   :  { %3524 = vmatprep.mubr.bf16.mxu0 %v7236_v0 }
0x227d   :  { %6028 = vmatmul.mubr.msk.bf16.gmra.mrb[76].mxu0 %vm1766_vm3, %v8139_v29 }
0x227e   :  { %3619 = vmatprep.mubr.bf16.mxu0 %v7236_v0 }
0x2285   :  { %6037 = vmatmul.mubr.msk.bf16.vlgmr.msra.gmra.mrb[64].mxu0 %vm1766_vm3, %v8144_v38 }
0x2286   :  { %3629 = vmatprep.mubr.bf16.mxu0 %v7236_v0  ;;  %3915 = vmatpush1.bf16.msra.mxu0 %v6513_v37  ;;  %v6545_v37 = vld [vmem:[#allocation26 + $0x14] ss:$8 sps:$4 sm:$0xff]  }
0x2287   :  { %3916 = vmatprep.subr.bf16.mxu0 %v6518_v39  ;;  %v6543_v39 = vld [vmem:[#allocation26 + $0x10] ss:$8 sps:$4 sm:$0xff]  }
0x228a   :  { %3917 = vmatpush1.bf16.msra.mxu0 %v6516_v59  ;;  %v6548_v59 = vld [vmem:[%s8538_s17 + $0x4] ss:$8 sps:$4 sm:$0xff]  }
0x228d   :  { %6038 = vmatmul.mubr.msk.bf16.gmra.mrb[68].mxu0 %vm1766_vm3, %v8149_v60 }
0x228e   :  { %3639 = vmatprep.mubr.bf16.mxu0 %v7236_v0 }
0x2295   :  { %6039 = vmatmul.mubr.msk.bf16.gmra.mrb[72].mxu0 %vm1766_vm3, %v8154_v4 }
0x2296   :  { %3649 = vmatprep.mubr.bf16.mxu0 %v7236_v0 }
0x229d   :  { %6040 = vmatmul.mubr.msk.bf16.gmra.mrb[76].mxu0 %vm1766_vm3, %v8159_v1 }
0x229e   :  { %3946 = vmatprep.mubr.bf16.mxu0 %v7236_v0 }
0x22a5   :  { %6065 = vmatmul.mubr.msk.bf16.vlgmr.msra.gmra.mrb[64].mxu0 %vm1766_vm3, %v8164_v62 }
0x22a6   :  { %3956 = vmatprep.mubr.bf16.mxu0 %v7236_v0 }
0x22ad   :  { %6066 = vmatmul.mubr.msk.bf16.gmra.mrb[68].mxu0 %vm1766_vm3, %v8169_v63 }
0x22ae   :  { %3966 = vmatprep.mubr.bf16.mxu0 %v7236_v0 }
0x22b5   :  { %6067 = vmatmul.mubr.msk.bf16.gmra.mrb[72].mxu0 %vm1766_vm3, %v8174_v2 }
0x22b6   :  { %3976 = vmatprep.mubr.bf16.mxu0 %v7236_v0 }
0x2330   :  { %v3193_v51 = vpop.f32.mrb[60].mxu0 }
0x2331   :  { %v3202_v48 = vadd.f32 %v3200_v3, %v3193_v51  ;;  %v3195_v11 = vpop.f32.mrb[61].mxu0 }
0x2332   :  { %v3203_v41 = vadd.f32 %v3201_v30, %v3195_v11  ;;  %v3197_v42 = vpop.f32.mrb[62].mxu0 }
0x2333   :  { %v3198_v10 = vpop.f32.mrb[63].mxu0  ;;  %v6002_v7 = vmul.f32 -1.442695, %v3202_v48 }
0x2334   :  { %6753 = vtanh.f32 %v3203_v41 }
0x2335   :  { %6755 = vpow2.f32 %v6002_v7 }
0x233e   :  { %v6754_v44 = vpop.eup %6753 }
0x233f   :  { %3219 = vrot.lane.b32.xlu0 %v6754_v44, %s7237_s21  ;;  %v6756_v45 = vpop.eup %6755 }
0x2340   :  { %v3210_v40 = vadd.f32 1.0, %v6756_v45 }
0x2342   :  { %6757 = vrcp.f32 %v3210_v40 }
0x234c   :  { %v6758_v16 = vpop.eup %6757 }
0x234d   :  { %v3217_v32 = vmul.f32 %v6758_v16, %v8113_v50  ;;  %v6003_v50 = vmul.f32 -1.442695, %v3203_v41 }
0x23b1   :  { %v3220_v18 = vpop.permute.xlu0 %3219 }
0x23b2   :  { %v3222_v35 = vmul.f32 %v6758_v16, %v3220_v18  ;;  %v6556_v18 = vld [vmem:[#allocation29] ss:$8 sps:$4 sm:$0xff]  }
0x23b4   :  { %3224 = vrot.lane.b32.xlu1 %v3222_v35, %s7237_s21  ;;  %v6558_v35 = vld [vmem:[#allocation29 + $0x4] ss:$8 sps:$4 sm:$0xff]  }
0x2426   :  { %v3225_v49 = vpop.permute.xlu1 %3224 }
0x2427   :  { %v8205_v25 = vadd.f32 %v3225_v49, %v3217_v32 }
0x2429   :  { %6759 = vtanh.f32 %v8205_v25 }
0x242a   :  { %6761 = vpow2.f32 %v6003_v50 }
0x2433   :  { %v6760_v26 = vpop.eup %6759 }
0x2434   :  { %3230 = vrot.lane.b32.xlu0 %v6760_v26, %s7237_s21  ;;  %v6762_v43 = vpop.eup %6761 }
0x2435   :  { %v3211_v54 = vadd.f32 1.0, %v6762_v43 }
0x2437   :  { %6763 = vrcp.f32 %v3211_v54 }
0x2441   :  { %v6764_v23 = vpop.eup %6763 }
0x24a6   :  { %v3231_v24 = vpop.permute.xlu0 %3230 }
0x24a7   :  { %v3233_v14 = vmul.f32 %v6764_v23, %v3231_v24  ;;  %v8302_v23 = vld [vmem:[#allocation31 + $0x14] ss:$8 sps:$4 sm:$0xff]  }
0x24a9   :  { %v8212_v8 = vpack.c.bf16 %v3233_v14, %v3233_v14  ;;  %v8313_v14 = vld [vmem:[#allocation31 + $0x24] ss:$8 sps:$4 sm:$0xff]  }
0x24ab   :  { %3236 = vst.msk [vmem:[#allocation4 + $0x18] sm:$0xf] %vm723_vm1, %v8212_v8  ;;  %6013 = vmatmul.mubr.msk.bf16.vlgmr.msra.gmra.mrb[60].mxu1 %vm643_vm2, %v8212_v8 }
0x24ac   :  { %3685 = vmatpush1.bf16.msra.mxu1 %v6534_v36  ;;  %3716 = vmatprep.mubr.bf16.mxu1 %v7236_v0 }
0x24ad   :  { %3686 = vmatprep.subr.bf16.mxu1 %v6539_v55  ;;  %v8322_v55 = vld [vmem:[#allocation31 + $0x34] ss:$8 sps:$4 sm:$0xff]  }
0x24b0   :  { %3687 = vmatpush1.bf16.msra.mxu1 %v6537_v56  ;;  %v8330_v56 = vld [vmem:[#allocation31 + $0x30] ss:$8 sps:$4 sm:$0xff]  }
0x24b1   :  { %3777 = vmatprep.subr.bf16.mxu1 %v6542_v57 }
0x24b3   :  { %6045 = vmatmul.mubr.msk.bf16.vlgmr.msra.gmra.mrb[64].mxu1 %vm1766_vm3, %v8124_v5  ;;  %v6546_v5 = vld [vmem:[%s8538_s17] ss:$8 sps:$4 sm:$0xff]  }
0x24b4   :  { %3726 = vmatprep.mubr.bf16.mxu1 %v7236_v0  ;;  %3778 = vmatpush1.bf16.msra.mxu1 %v6540_v58 }
0x24b5   :  { %3779 = vmatprep.subr.bf16.mxu1 %v6545_v37  ;;  %v4382_v37 = vld [vmem:[%s8540_s19] sm:$0x3] }
0x24b8   :  { %3780 = vmatpush1.bf16.msra.mxu1 %v6543_v39 }
0x24b9   :  { %4027 = vmatprep.subr.bf16.mxu1 %v6548_v59 }
0x24bb   :  { %6046 = vmatmul.mubr.msk.bf16.gmra.mrb[68].mxu1 %vm1766_vm3, %v8129_v17  ;;  %v6551_v17 = vld [vmem:[%s8538_s17 + $0x14] ss:$8 sps:$4 sm:$0xff]  }
0x24bc   :  { %3736 = vmatprep.mubr.bf16.mxu1 %v7236_v0 }
0x24c3   :  { %6047 = vmatmul.mubr.msk.bf16.gmra.mrb[72].mxu1 %vm1766_vm3, %v8134_v20  ;;  %v6549_v20 = vld [vmem:[%s8538_s17 + $0x10] ss:$8 sps:$4 sm:$0xff]  }
0x24c4   :  { %3746 = vmatprep.mubr.bf16.mxu1 %v7236_v0 }
0x24cb   :  { %6048 = vmatmul.mubr.msk.bf16.gmra.mrb[76].mxu1 %vm1766_vm3, %v8139_v29  ;;  %v3338_v29 = vunpack.c.l.bf16 %v8021_v22 }
0x24cc   :  { %3809 = vmatprep.mubr.bf16.mxu1 %v7236_v0 }
0x24d3   :  { %6053 = vmatmul.mubr.msk.bf16.vlgmr.msra.gmra.mrb[64].mxu1 %vm1766_vm3, %v8144_v38 }
0x24d4   :  { %3819 = vmatprep.mubr.bf16.mxu1 %v7236_v0  ;;  %4028 = vmatpush1.bf16.msra.mxu1 %v6546_v5  ;;  %v4387_v5 = vrot.slane %v4382_v37, %v7730_v19 }
0x24d5   :  { %4029 = vmatprep.subr.bf16.mxu1 %v6551_v17 }
0x24d8   :  { %4030 = vmatpush1.bf16.msra.mxu1 %v6549_v20 }
0x24d9   :  { %4293 = vmatprep.subr.bf16.mxu1 %v6558_v35 }
0x24db   :  { %6054 = vmatmul.mubr.msk.bf16.gmra.mrb[68].mxu1 %vm1766_vm3, %v8149_v60  ;;  %v3339_v60 = vunpack.c.h.bf16 %v8021_v22 }
0x24dc   :  { %3829 = vmatprep.mubr.bf16.mxu1 %v7236_v0 }
0x24e3   :  { %6055 = vmatmul.mubr.msk.bf16.gmra.mrb[72].mxu1 %vm1766_vm3, %v8154_v4 }
0x24e4   :  { %3839 = vmatprep.mubr.bf16.mxu1 %v7236_v0 }
0x24eb   :  { %6056 = vmatmul.mubr.msk.bf16.gmra.mrb[76].mxu1 %vm1766_vm3, %v8159_v1 }
0x24ec   :  { %4059 = vmatprep.mubr.bf16.mxu1 %v7236_v0 }
0x24f3   :  { %6073 = vmatmul.mubr.msk.bf16.vlgmr.msra.gmra.mrb[64].mxu1 %vm1766_vm3, %v8164_v62 }
0x24f4   :  { %4069 = vmatprep.mubr.bf16.mxu1 %v7236_v0  ;;  %4294 = vmatpush1.bf16.msra.mxu1 %v6556_v18 }
0x24f5   :  { %4295 = vmatprep.subr.bf16.mxu1 %v6564_v46 }
0x24f8   :  { %4296 = vmatpush1.bf16.msra.mxu1 %v6562_v31 }
0x24f9   :  { %4684 = vmatprep.subr.bf16.mxu1 %v8282_v13 }
0x24fb   :  { %6074 = vmatmul.mubr.msk.bf16.gmra.mrb[68].mxu1 %vm1766_vm3, %v8169_v63 }
0x24fc   :  { %4079 = vmatprep.mubr.bf16.mxu1 %v7236_v0 }
0x2503   :  { %6075 = vmatmul.mubr.msk.bf16.gmra.mrb[72].mxu1 %vm1766_vm3, %v8174_v2 }
0x2504   :  { %4089 = vmatprep.mubr.bf16.mxu1 %v7236_v0 }
0x257e   :  { %v3331_v38 = vpop.f32.mrb[60].mxu1 }
0x257f   :  { %v3340_v4 = vadd.f32 %v3338_v29, %v3331_v38  ;;  %v3333_v1 = vpop.f32.mrb[61].mxu1  ;;  %v4391_v29 = vrot.slane %v4382_v37, %v7732_v21 }
0x2580   :  { %v3341_v62 = vadd.f32 %v3339_v60, %v3333_v1  ;;  %v3335_v3 = vpop.f32.mrb[62].mxu1 }
0x2581   :  { %v3336_v51 = vpop.f32.mrb[63].mxu1  ;;  %v6014_v63 = vmul.f32 -1.442695, %v3340_v4 }
0x2582   :  { %6765 = vtanh.f32 %v3341_v62  ;;  %v6015_v47 = vmul.f32 -1.442695, %v3341_v62 }
0x2583   :  { %6767 = vpow2.f32 %v6014_v63 }
0x258c   :  { %v6766_v30 = vpop.eup %6765 }
0x258d   :  { %3357 = vrot.lane.b32.xlu1 %v6766_v30, %s7237_s21  ;;  %v6768_v48 = vpop.eup %6767 }
0x258e   :  { %v3348_v2 = vadd.f32 1.0, %v6768_v48 }
0x2590   :  { %6769 = vrcp.f32 %v3348_v2 }
0x259a   :  { %v6770_v11 = vpop.eup %6769 }
0x259b   :  { %v3355_v22 = vmul.f32 %v6770_v11, %v8205_v25 }
0x25ff   :  { %v3358_v41 = vpop.permute.xlu1 %3357 }
0x2600   :  { %v3360_v42 = vmul.f32 %v6770_v11, %v3358_v41 }
0x2602   :  { %3362 = vrot.lane.b32.xlu0 %v3360_v42, %s7237_s21 }
0x2606   :  { %3240 = vrot.lane.b32.xlu0 %v8212_v8, %s7238_s20  ;;  %v8319_v8 = vld [vmem:[#allocation31 + $0x20] ss:$8 sps:$4 sm:$0xff]  }
0x260a   :  { %2964 = vrot.lane.b32.xlu0 %v8102_v15, %s7238_s20  ;;  %v6555_v15 = vld [vmem:[#allocation25 + $0x4] ss:$8 sps:$4 sm:$0xff]  }
0x260b   :  { %4180 = vmatprep.subr.bf16.mxu0 %v6555_v15 }
0x260e   :  { %2688 = vrot.lane.b32.xlu0 %v8064_v27, %s7238_s20 }
0x2612   :  { %2412 = vrot.lane.b32.xlu0 %v8026_v34, %s7238_s20  ;;  %v6553_v34 = vld [vmem:[#allocation25] ss:$8 sps:$4 sm:$0xff]  }
0x2613   :  { %4181 = vmatpush1.bf16.msra.mxu0 %v6553_v34 }
0x2614   :  { %4182 = vmatprep.subr.bf16.mxu0 %v6561_v53 }
0x2617   :  { %4183 = vmatpush1.bf16.msra.mxu0 %v6559_v61 }
0x2618   :  { %4547 = vmatprep.subr.bf16.mxu0 %v8282_v13 }
0x2674   :  { %v3363_v10 = vpop.permute.xlu0 %3362 }
0x2675   :  { %v3365_v44 = vadd.f32 %v3363_v10, %v3355_v22 }
0x2677   :  { %6771 = vtanh.f32 %v3365_v44 }
0x2678   :  { %v3241_v7 = vpop.permute.xlu0 %3240  ;;  %6773 = vpow2.f32 %v6015_v47 }
0x2679   :  { %3244 = vst.msk [vmem:[#allocation5 + $0x4] sm:$0xf] %vm723_vm1, %v3241_v7 }
0x267c   :  { %v2965_v45 = vpop.permute.xlu0 %2964 }
0x267d   :  { %2968 = vst.msk [vmem:[#allocation5 + $0xc] sm:$0xf] %vm723_vm1, %v2965_v45 }
0x2680   :  { %v2689_v40 = vpop.permute.xlu0 %2688 }
0x2681   :  { %v6772_v16 = vpop.eup %6771  ;;  %2692 = vst.msk [vmem:[#allocation5 + $0x14] sm:$0xf] %vm723_vm1, %v2689_v40 }
0x2682   :  { %3368 = vrot.lane.b32.xlu1 %v6772_v16, %s7237_s21  ;;  %v6774_v33 = vpop.eup %6773 }
0x2683   :  { %v3349_v32 = vadd.f32 1.0, %v6774_v33 }
0x2684   :  { %v2413_v27 = vpop.permute.xlu0 %2412 }
0x2685   :  { %2416 = vst.msk [vmem:[#allocation5 + $0x1c] sm:$0xf] %vm723_vm1, %v2413_v27  ;;  %6775 = vrcp.f32 %v3349_v32 }
0x268f   :  { %v6776_v49 = vpop.eup %6775 }
0x26f4   :  { %v3369_v6 = vpop.permute.xlu1 %3368 }
0x26f5   :  { %v3371_v25 = vmul.f32 %v6776_v49, %v3369_v6 }
0x26f7   :  { %v3372_v52 = vpack.c.bf16 %v3371_v25, %v3371_v25 }
0x26f9   :  { %3374 = vst.msk [vmem:[#allocation4 + $0x1c] sm:$0xf] %vm723_vm1, %v3372_v52  ;;  %3378 = vrot.lane.b32.xlu1 %v3372_v52, %s7238_s20 }
0x26fd   :  { %3102 = vrot.lane.b32.xlu1 %v8117_v28, %s7238_s20  ;;  %v8300_v28 = vld [vmem:[#allocation31] ss:$8 sps:$4 sm:$0xff]  }
0x2700   :  { %v6552_v26 = vld [vmem:[#allocation4 + $0x18] sm:$0xff]  }
0x2701   :  { %2826 = vrot.lane.b32.xlu1 %v8083_v9, %s7238_s20  ;;  %6068 = vmatmul.mubr.msk.bf16.gmra.mrb[76].mxu0 %vm1766_vm3, %v6552_v26 }
0x2702   :  { %6076 = vmatmul.mubr.msk.bf16.gmra.mrb[76].mxu1 %vm1766_vm3, %v6552_v26  ;;  %4212 = vmatprep.mubr.bf16.mxu0 %v7236_v0 }
0x2703   :  { %4325 = vmatprep.mubr.bf16.mxu1 %v7236_v0 }
0x2705   :  { %2550 = vrot.lane.b32.xlu1 %v8044_v12, %s7238_s20  ;;  %v8309_v12 = vld [vmem:[#allocation31 + $0x10] ss:$8 sps:$4 sm:$0xff]  }
0x276b   :  { %v3379_v50 = vpop.permute.xlu1 %3378 }
0x276c   :  { %3381 = vst.msk [vmem:[#allocation5] sm:$0xf] %vm723_vm1, %v3379_v50 }
0x276f   :  { %v3103_v43 = vpop.permute.xlu1 %3102 }
0x2770   :  { %3106 = vst.msk [vmem:[#allocation5 + $0x8] sm:$0xf] %vm723_vm1, %v3103_v43 }
0x2773   :  { %v2827_v9 = vpop.permute.xlu1 %2826  ;;  %v6565_v54 = vld [vmem:[#allocation5] sm:$0xff]  }
0x2774   :  { %2830 = vst.msk [vmem:[#allocation5 + $0x10] sm:$0xf] %vm723_vm1, %v2827_v9  ;;  %6085 = vmatmul.mubr.msk.bf16.vlgmr.msra.gmra.mrb[64].mxu0 %vm1766_vm3, %v6565_v54  ;;  %6093 = vmatmul.mubr.msk.bf16.vlgmr.msra.gmra.mrb[64].mxu1 %vm1766_vm3, %v6565_v54 }
0x2775   :  { %4548 = vmatpush1.bf16.msra.mxu0 %v8300_v28  ;;  %4222 = vmatprep.mubr.bf16.mxu0 %v7236_v0 }
0x2776   :  { %4335 = vmatprep.mubr.bf16.mxu1 %v7236_v0  ;;  %4549 = vmatprep.subr.bf16.mxu0 %v8302_v23 }
0x2777   :  { %v2551_v24 = vpop.permute.xlu1 %2550  ;;  %4685 = vmatpush1.bf16.msra.mxu1 %v8300_v28  ;;  %v6569_v36 = vld [vmem:[#allocation5 + $0x8] sm:$0xff]  }
0x2778   :  { %2554 = vst.msk [vmem:[#allocation5 + $0x18] sm:$0xf] %vm723_vm1, %v2551_v24  ;;  %4686 = vmatprep.subr.bf16.mxu1 %v8302_v23 }
0x2779   :  { %4550 = vmatpush1.bf16.msra.mxu0 %v8309_v12 }
0x277a   :  { %4551 = vmatprep.subr.bf16.mxu0 %v8313_v14 }
0x277b   :  { %4687 = vmatpush1.bf16.msra.mxu1 %v8309_v12  ;;  %v6573_v57 = vld [vmem:[#allocation5 + $0x10] sm:$0xff]  }
0x277c   :  { %6086 = vmatmul.mubr.msk.bf16.gmra.mrb[68].mxu0 %vm1766_vm3, %v6569_v36  ;;  %6094 = vmatmul.mubr.msk.bf16.gmra.mrb[68].mxu1 %vm1766_vm3, %v6569_v36 }
0x277d   :  { %4232 = vmatprep.mubr.bf16.mxu0 %v7236_v0  ;;  %4345 = vmatprep.mubr.bf16.mxu1 %v7236_v0 }
0x277e   :  { %4552 = vmatpush1.bf16.msra.mxu0 %v8319_v8  ;;  %4688 = vmatprep.subr.bf16.mxu1 %v8313_v14 }
0x277f   :  { %4553 = vmatprep.subr.bf16.mxu0 %v8322_v55  ;;  %4689 = vmatpush1.bf16.msra.mxu1 %v8319_v8  ;;  %v6577_v58 = vld [vmem:[#allocation5 + $0x18] sm:$0xff]  }
0x2780   :  { %4690 = vmatprep.subr.bf16.mxu1 %v8322_v55 }
0x2782   :  { %4554 = vmatpush1.bf16.msra.mxu0 %v8330_v56 }
0x2783   :  { %4691 = vmatpush1.bf16.msra.mxu1 %v8330_v56  ;;  %4822 = vmatprep.subr.bf16.mxu0 %v8282_v13 }
0x2784   :  { %6087 = vmatmul.mubr.msk.bf16.gmra.mrb[72].mxu0 %vm1766_vm3, %v6573_v57  ;;  %6095 = vmatmul.mubr.msk.bf16.gmra.mrb[72].mxu1 %vm1766_vm3, %v6573_v57 }
0x2785   :  { %4242 = vmatprep.mubr.bf16.mxu0 %v7236_v0  ;;  %4355 = vmatprep.mubr.bf16.mxu1 %v7236_v0 }
0x2786   :  { %4960 = vmatprep.subr.bf16.mxu1 %v8282_v13 }
0x278c   :  { %6088 = vmatmul.mubr.msk.bf16.gmra.mrb[76].mxu0 %vm1766_vm3, %v6577_v58  ;;  %6096 = vmatmul.mubr.msk.bf16.gmra.mrb[76].mxu1 %vm1766_vm3, %v6577_v58 }
0x278d   :  { %4579 = vmatprep.mubr.bf16.mxu0 %v7236_v0  ;;  %4716 = vmatprep.mubr.bf16.mxu1 %v7236_v0 }
0x2794   :  { %4580 = vmatmul.mubr.bf16.vlgmr.msra.gmra.mrb[80].mxu0 %v7236_v0 }
0x2795   :  { %4823 = vmatpush1.bf16.msra.mxu0 %v8300_v28  ;;  %4854 = vmatprep.mubr.bf16.mxu0 %v7236_v0 }
0x2796   :  { %4824 = vmatprep.subr.bf16.mxu0 %v8302_v23 }
0x2799   :  { %4825 = vmatpush1.bf16.msra.mxu0 %v8309_v12 }
0x279a   :  { %4826 = vmatprep.subr.bf16.mxu0 %v8313_v14 }
0x279d   :  { %4827 = vmatpush1.bf16.msra.mxu0 %v8319_v8 }
0x279e   :  { %4828 = vmatprep.subr.bf16.mxu0 %v8322_v55 }
0x27a1   :  { %4829 = vmatpush1.bf16.msra.mxu0 %v8330_v56 }
0x27a2   :  { %5098 = vmatprep.subr.bf16.mxu0 %v8282_v13 }
0x2847   :  { %v4214_v39 = vpop.f32.mrb[64].mxu0  ;;  %v8361_v59 = vpop.f32.mrb[64].mxu1 }
0x2848   :  { %v4216_v17 = vpop.f32.mrb[65].mxu0  ;;  %v8364_v20 = vpop.f32.mrb[65].mxu1  ;;  %v4394_v24 = vadd.f32 %v4387_v5, %v4214_v39 }
0x2849   :  { %v4218_v38 = vpop.f32.mrb[66].mxu0  ;;  %v4331_v60 = vpop.f32.mrb[66].mxu1 }
0x284a   :  { %v4396_v4 = vadd.f32 %v4387_v5, %v4218_v38  ;;  %v4220_v1 = vpop.f32.mrb[67].mxu0  ;;  %v4333_v62 = vpop.f32.mrb[67].mxu1  ;;  %v4395_v38 = vadd.f32 %v4391_v29, %v4216_v17 }
0x284b   :  { %v4397_v3 = vadd.f32 %v4391_v29, %v4220_v1 }
0x284f   :  { %v4224_v51 = vpop.f32.mrb[68].mxu0  ;;  %v4337_v30 = vpop.f32.mrb[68].mxu1 }
0x2850   :  { %v4398_v63 = vadd.f32 %v4387_v5, %v4224_v51  ;;  %v4226_v48 = vpop.f32.mrb[69].mxu0  ;;  %v4339_v2 = vpop.f32.mrb[69].mxu1 }
0x2851   :  { %v4399_v11 = vadd.f32 %v4391_v29, %v4226_v48  ;;  %v4228_v41 = vpop.f32.mrb[70].mxu0  ;;  %v4341_v42 = vpop.f32.mrb[70].mxu1 }
0x2852   :  { %v4400_v19 = vadd.f32 %v4387_v5, %v4228_v41  ;;  %v4230_v22 = vpop.f32.mrb[71].mxu0  ;;  %v4343_v10 = vpop.f32.mrb[71].mxu1 }
0x2853   :  { %v4401_v44 = vadd.f32 %v4391_v29, %v4230_v22 }
0x2857   :  { %v4234_v7 = vpop.f32.mrb[72].mxu0  ;;  %v4347_v21 = vpop.f32.mrb[72].mxu1 }
0x2858   :  { %v4402_v45 = vadd.f32 %v4387_v5, %v4234_v7  ;;  %v4443_v40 = vadd.f32 %v4400_v19, %v4347_v21  ;;  %v4236_v16 = vpop.f32.mrb[73].mxu0  ;;  %v4349_v27 = vpop.f32.mrb[73].mxu1 }
0x2859   :  { %v4403_v34 = vadd.f32 %v4391_v29, %v4236_v16  ;;  %v4444_v15 = vadd.f32 %v4401_v44, %v4349_v27  ;;  %v4238_v18 = vpop.f32.mrb[74].mxu0  ;;  %v4351_v35 = vpop.f32.mrb[74].mxu1 }
0x285a   :  { %v4454_v53 = vadd.f32 %v4402_v45, %v4341_v42  ;;  %v4404_v46 = vadd.f32 %v4387_v5, %v4238_v18  ;;  %v4432_v61 = vadd.f32 %v4398_v63, %v4351_v35  ;;  %v4240_v31 = vpop.f32.mrb[75].mxu0  ;;  %v4353_v47 = vpop.f32.mrb[75].mxu1 }
0x285b   :  { %v4455_v33 = vadd.f32 %v4403_v34, %v4343_v10  ;;  %v8367_v32 = vpack.c.bf16 %v4444_v15, %v4443_v40  ;;  %v4405_v49 = vadd.f32 %v4391_v29, %v4240_v31  ;;  %v4433_v6 = vadd.f32 %v4399_v11, %v4353_v47 }
0x285c   :  { %v4465_v25 = vadd.f32 %v4404_v46, %v4337_v30 }
0x285d   :  { %v4466_v52 = vadd.f32 %v4405_v49, %v4339_v2  ;;  %v8369_v26 = vpack.c.bf16 %v4433_v6, %v4432_v61  ;;  %v8371_v50 = vpack.c.bf16 %v4455_v33, %v4454_v53 }
0x285f   :  { %v4244_v43 = vpop.f32.mrb[76].mxu0  ;;  %v4357_v9 = vpop.f32.mrb[76].mxu1  ;;  %v8373_v54 = vpack.c.bf16 %v4466_v52, %v4465_v25 }
0x2860   :  { %v4406_v36 = vadd.f32 %v4387_v5, %v4244_v43  ;;  %v4421_v57 = vadd.f32 %v4396_v4, %v4357_v9  ;;  %v4246_v58 = vpop.f32.mrb[77].mxu0  ;;  %v4359_v37 = vpop.f32.mrb[77].mxu1 }
0x2861   :  { %v4407_v1 = vadd.f32 %v4391_v29, %v4246_v58  ;;  %v4422_v51 = vadd.f32 %v4397_v3, %v4359_v37  ;;  %v4248_v63 = vpop.f32.mrb[78].mxu0  ;;  %v4361_v48 = vpop.f32.mrb[78].mxu1 }
0x2862   :  { %v4476_v30 = vadd.f32 %v4406_v36, %v4331_v60  ;;  %v4408_v2 = vadd.f32 %v4387_v5, %v4248_v63  ;;  %v4410_v11 = vadd.f32 %v4394_v24, %v4361_v48  ;;  %v4250_v41 = vpop.f32.mrb[79].mxu0  ;;  %v4363_v42 = vpop.f32.mrb[79].mxu1 }
0x2863   :  { %v4477_v19 = vadd.f32 %v4407_v1, %v4333_v62  ;;  %v6240_v22 = vpack.c.bf16 %v4422_v51, %v4421_v57  ;;  %v4409_v10 = vadd.f32 %v4391_v29, %v4250_v41  ;;  %v4411_v44 = vadd.f32 %v4395_v38, %v4363_v42 }
0x2864   :  { %v4487_v39 = vadd.f32 %v4408_v2, %v8361_v59 }
0x2865   :  { %v4488_v4 = vadd.f32 %v4409_v10, %v8364_v20  ;;  %v6239_v7 = vpack.c.bf16 %v4411_v44, %v4410_v11  ;;  %v8377_v21 = vpack.c.bf16 %v4477_v19, %v4476_v30  ;;  %v4725_v9 = vunpack.c.l.bf16 %v6240_v22 }
0x2866   :  { %v4726_v36 = vunpack.c.h.bf16 %v6240_v22 }
0x2867   :  { %v4581_v17 = vpop.f32.mrb[80].mxu0  ;;  %v4588_v3 = vunpack.c.l.bf16 %v6239_v7  ;;  %v4589_v45 = vunpack.c.h.bf16 %v6239_v7  ;;  %v8379_v40 = vpack.c.bf16 %v4488_v4, %v4487_v39 }
0x2868   :  { %v4583_v5 = vpop.f32.mrb[81].mxu0 }
0x2869   :  { %v4590_v60 = vadd.f32 %v4588_v3, %v4581_v17  ;;  %v4591_v16 = vadd.f32 %v4589_v45, %v4583_v5  ;;  %v4585_v27 = vpop.f32.mrb[82].mxu0  ;;  %v4863_v5 = vunpack.c.l.bf16 %v8369_v26 }
0x286a   :  { %v4586_v62 = vpop.f32.mrb[83].mxu0 }
0x286b   :  { %6777 = vtanh.f32 %v4591_v16  ;;  %v6113_v59 = vmul.f32 -1.442695, %v4590_v60  ;;  %v6114_v47 = vmul.f32 -1.442695, %v4591_v16  ;;  %v4864_v16 = vunpack.c.h.bf16 %v8369_v26 }
0x286d   :  { %6779 = vpow2.f32 %v6113_v59 }
0x2875   :  { %v6778_v29 = vpop.eup %6777 }
0x2876   :  { %4607 = vrot.lane.b32.xlu0 %v6778_v29, %s7237_s21 }
0x2877   :  { %v6780_v20 = vpop.eup %6779 }
0x2878   :  { %v4598_v34 = vadd.f32 1.0, %v6780_v20 }
0x287a   :  { %6781 = vrcp.f32 %v4598_v34 }
0x2884   :  { %v6782_v15 = vpop.eup %6781 }
0x2885   :  { %v4605_v53 = vmul.f32 0.0, %v6782_v15 }
0x28e8   :  { %v4608_v18 = vpop.permute.xlu0 %4607 }
0x28e9   :  { %v4610_v35 = vmul.f32 %v6782_v15, %v4608_v18 }
0x28eb   :  { %4612 = vrot.lane.b32.xlu1 %v4610_v35, %s7237_s21 }
0x295d   :  { %v4613_v46 = vpop.permute.xlu1 %4612 }
0x295e   :  { %v4615_v61 = vadd.f32 %v4613_v46, %v4605_v53 }
0x2960   :  { %6783 = vtanh.f32 %v4615_v61 }
0x2961   :  { %6785 = vpow2.f32 %v6114_v47 }
0x296a   :  { %v6784_v31 = vpop.eup %6783 }
0x296b   :  { %4618 = vrot.lane.b32.xlu0 %v6784_v31, %s7237_s21  ;;  %v6786_v33 = vpop.eup %6785 }
0x296c   :  { %v4599_v49 = vadd.f32 1.0, %v6786_v33 }
0x296e   :  { %6787 = vrcp.f32 %v4599_v49 }
0x2978   :  { %v6788_v6 = vpop.eup %6787 }
0x29dd   :  { %v4619_v25 = vpop.permute.xlu0 %4618 }
0x29de   :  { %v4621_v52 = vmul.f32 %v6788_v6, %v4619_v25 }
0x29e0   :  { %v8384_v43 = vpack.c.bf16 %v4621_v52, %v4621_v52 }
0x29e2   :  { %6124 = vmatmul.mubr.msk.bf16.vlgmr.msra.gmra.mrb[80].mxu1 %vm643_vm2, %v8384_v43 }
0x29e3   :  { %4961 = vmatpush1.bf16.msra.mxu1 %v8300_v28  ;;  %4992 = vmatprep.mubr.bf16.mxu1 %v7236_v0 }
0x29e4   :  { %4962 = vmatprep.subr.bf16.mxu1 %v8302_v23 }
0x29e7   :  { %4963 = vmatpush1.bf16.msra.mxu1 %v8309_v12 }
0x29e8   :  { %4964 = vmatprep.subr.bf16.mxu1 %v8313_v14 }
0x29eb   :  { %4965 = vmatpush1.bf16.msra.mxu1 %v8319_v8 }
0x29ec   :  { %4966 = vmatprep.subr.bf16.mxu1 %v8322_v55 }
0x29ef   :  { %4967 = vmatpush1.bf16.msra.mxu1 %v8330_v56 }
0x29f0   :  { %5236 = vmatprep.subr.bf16.mxu1 %v8282_v13 }
0x2ab5   :  { %v4718_v24 = vpop.f32.mrb[80].mxu1 }
0x2ab6   :  { %v4727_v57 = vadd.f32 %v4725_v9, %v4718_v24  ;;  %v4720_v58 = vpop.f32.mrb[81].mxu1 }
0x2ab7   :  { %v4728_v37 = vadd.f32 %v4726_v36, %v4720_v58  ;;  %v4722_v38 = vpop.f32.mrb[82].mxu1 }
0x2ab8   :  { %v4723_v1 = vpop.f32.mrb[83].mxu1  ;;  %v6125_v63 = vmul.f32 -1.442695, %v4727_v57  ;;  %v5001_v57 = vunpack.c.l.bf16 %v8367_v32 }
0x2ab9   :  { %6789 = vtanh.f32 %v4728_v37  ;;  %v6126_v44 = vmul.f32 -1.442695, %v4728_v37  ;;  %v5002_v37 = vunpack.c.h.bf16 %v8367_v32 }
0x2aba   :  { %6791 = vpow2.f32 %v6125_v63 }
0x2ac3   :  { %v6790_v51 = vpop.eup %6789 }
0x2ac4   :  { %4744 = vrot.lane.b32.xlu1 %v6790_v51, %s7237_s21  ;;  %v6792_v48 = vpop.eup %6791 }
0x2ac5   :  { %v4735_v30 = vadd.f32 1.0, %v6792_v48 }
0x2ac7   :  { %6793 = vrcp.f32 %v4735_v30 }
0x2ad1   :  { %v6794_v2 = vpop.eup %6793 }
0x2ad2   :  { %v4742_v42 = vmul.f32 %v6794_v2, %v4615_v61 }
0x2b36   :  { %v4745_v11 = vpop.permute.xlu1 %4744 }
0x2b37   :  { %v4747_v41 = vmul.f32 %v6794_v2, %v4745_v11 }
0x2b39   :  { %4749 = vrot.lane.b32.xlu0 %v4747_v41, %s7237_s21 }
0x2bab   :  { %v4750_v19 = vpop.permute.xlu0 %4749 }
0x2bac   :  { %v4752_v22 = vadd.f32 %v4750_v19, %v4742_v42 }
0x2bae   :  { %6795 = vtanh.f32 %v4752_v22 }
0x2baf   :  { %6797 = vpow2.f32 %v6126_v44 }
0x2bb8   :  { %v6796_v10 = vpop.eup %6795 }
0x2bb9   :  { %4755 = vrot.lane.b32.xlu1 %v6796_v10, %s7237_s21  ;;  %v6798_v39 = vpop.eup %6797 }
0x2bba   :  { %v4736_v4 = vadd.f32 1.0, %v6798_v39 }
0x2bbc   :  { %6799 = vrcp.f32 %v4736_v4 }
0x2bc6   :  { %v6800_v7 = vpop.eup %6799 }
0x2c2b   :  { %v4756_v17 = vpop.permute.xlu1 %4755 }
0x2c2c   :  { %v4758_v3 = vmul.f32 %v6800_v7, %v4756_v17 }
0x2c2e   :  { %v8400_v45 = vpack.c.bf16 %v4758_v3, %v4758_v3 }
0x2c30   :  { %6136 = vmatmul.mubr.msk.bf16.vlgmr.msra.gmra.mrb[84].mxu0 %vm643_vm2, %v8400_v45 }
0x2c31   :  { %5099 = vmatpush1.bf16.msra.mxu0 %v8300_v28  ;;  %5130 = vmatprep.mubr.bf16.mxu0 %v7236_v0 }
0x2c32   :  { %5100 = vmatprep.subr.bf16.mxu0 %v8302_v23 }
0x2c35   :  { %5101 = vmatpush1.bf16.msra.mxu0 %v8309_v12 }
0x2c36   :  { %5102 = vmatprep.subr.bf16.mxu0 %v8313_v14 }
0x2c39   :  { %5103 = vmatpush1.bf16.msra.mxu0 %v8319_v8 }
0x2c3a   :  { %5104 = vmatprep.subr.bf16.mxu0 %v8322_v55 }
0x2c3d   :  { %5105 = vmatpush1.bf16.msra.mxu0 %v8330_v56 }
0x2c3e   :  { %5374 = vmatprep.subr.bf16.mxu0 %v8282_v13 }
0x2d03   :  { %v4856_v60 = vpop.f32.mrb[84].mxu0 }
0x2d04   :  { %v4865_v27 = vadd.f32 %v4863_v5, %v4856_v60  ;;  %v4858_v62 = vpop.f32.mrb[85].mxu0 }
0x2d05   :  { %v4866_v29 = vadd.f32 %v4864_v16, %v4858_v62  ;;  %v4860_v59 = vpop.f32.mrb[86].mxu0  ;;  %v5139_v16 = vunpack.c.l.bf16 %v8371_v50  ;;  %v5140_v62 = vunpack.c.h.bf16 %v8371_v50 }
0x2d06   :  { %v4861_v20 = vpop.f32.mrb[87].mxu0  ;;  %v6137_v15 = vmul.f32 -1.442695, %v4865_v27 }
0x2d07   :  { %6801 = vtanh.f32 %v4866_v29  ;;  %v6138_v49 = vmul.f32 -1.442695, %v4866_v29 }
0x2d08   :  { %6803 = vpow2.f32 %v6137_v15 }
0x2d11   :  { %v6802_v34 = vpop.eup %6801 }
0x2d12   :  { %4882 = vrot.lane.b32.xlu0 %v6802_v34, %s7237_s21  ;;  %v6804_v18 = vpop.eup %6803 }
0x2d13   :  { %v4873_v35 = vadd.f32 1.0, %v6804_v18 }
0x2d15   :  { %6805 = vrcp.f32 %v4873_v35 }
0x2d1f   :  { %v6806_v53 = vpop.eup %6805 }
0x2d20   :  { %v4880_v26 = vmul.f32 %v6806_v53, %v4752_v22 }
0x2d84   :  { %v4883_v46 = vpop.permute.xlu0 %4882 }
0x2d85   :  { %v4885_v61 = vmul.f32 %v6806_v53, %v4883_v46 }
0x2d87   :  { %4887 = vrot.lane.b32.xlu1 %v4885_v61, %s7237_s21 }
0x2df9   :  { %v4888_v31 = vpop.permute.xlu1 %4887 }
0x2dfa   :  { %v4890_v47 = vadd.f32 %v4888_v31, %v4880_v26 }
0x2dfc   :  { %6807 = vtanh.f32 %v4890_v47 }
0x2dfd   :  { %6809 = vpow2.f32 %v6138_v49 }
0x2e06   :  { %v6808_v33 = vpop.eup %6807 }
0x2e07   :  { %4893 = vrot.lane.b32.xlu0 %v6808_v33, %s7237_s21  ;;  %v6810_v6 = vpop.eup %6809 }
0x2e08   :  { %v4874_v25 = vadd.f32 1.0, %v6810_v6 }
0x2e0a   :  { %6811 = vrcp.f32 %v4874_v25 }
0x2e14   :  { %v6812_v52 = vpop.eup %6811 }
0x2e79   :  { %v4894_v9 = vpop.permute.xlu0 %4893 }
0x2e7a   :  { %v4896_v24 = vmul.f32 %v6812_v52, %v4894_v9 }
0x2e7c   :  { %v8418_v36 = vpack.c.bf16 %v4896_v24, %v4896_v24 }
0x2e7e   :  { %6148 = vmatmul.mubr.msk.bf16.vlgmr.msra.gmra.mrb[84].mxu1 %vm643_vm2, %v8418_v36 }
0x2e7f   :  { %5237 = vmatpush1.bf16.msra.mxu1 %v8300_v28  ;;  %5268 = vmatprep.mubr.bf16.mxu1 %v7236_v0 }
0x2e80   :  { %5238 = vmatprep.subr.bf16.mxu1 %v8302_v23 }
0x2e83   :  { %5239 = vmatpush1.bf16.msra.mxu1 %v8309_v12 }
0x2e84   :  { %5240 = vmatprep.subr.bf16.mxu1 %v8313_v14 }
0x2e87   :  { %5241 = vmatpush1.bf16.msra.mxu1 %v8319_v8 }
0x2e88   :  { %5242 = vmatprep.subr.bf16.mxu1 %v8322_v55 }
0x2e8b   :  { %5243 = vmatpush1.bf16.msra.mxu1 %v8330_v56 }
0x2e8c   :  { %5512 = vmatprep.subr.bf16.mxu1 %v8282_v13 }
0x2f51   :  { %v4994_v58 = vpop.f32.mrb[84].mxu1 }
0x2f52   :  { %v5003_v38 = vadd.f32 %v5001_v57, %v4994_v58  ;;  %v4996_v1 = vpop.f32.mrb[85].mxu1 }
0x2f53   :  { %v5004_v51 = vadd.f32 %v5002_v37, %v4996_v1  ;;  %v4998_v63 = vpop.f32.mrb[86].mxu1  ;;  %v5277_v37 = vunpack.c.l.bf16 %v8373_v54  ;;  %v5278_v1 = vunpack.c.h.bf16 %v8373_v54 }
0x2f54   :  { %v4999_v48 = vpop.f32.mrb[87].mxu1  ;;  %v6149_v2 = vmul.f32 -1.442695, %v5003_v38 }
0x2f55   :  { %6813 = vtanh.f32 %v5004_v51  ;;  %v6150_v39 = vmul.f32 -1.442695, %v5004_v51 }
0x2f56   :  { %6815 = vpow2.f32 %v6149_v2 }
0x2f5f   :  { %v6814_v30 = vpop.eup %6813 }
0x2f60   :  { %5020 = vrot.lane.b32.xlu1 %v6814_v30, %s7237_s21  ;;  %v6816_v11 = vpop.eup %6815 }
0x2f61   :  { %v5011_v41 = vadd.f32 1.0, %v6816_v11 }
0x2f63   :  { %6817 = vrcp.f32 %v5011_v41 }
0x2f6d   :  { %v6818_v13 = vpop.eup %6817 }
0x2f6e   :  { %v5018_v32 = vmul.f32 %v6818_v13, %v4890_v47 }
0x2fd2   :  { %v5021_v42 = vpop.permute.xlu1 %5020 }
0x2fd3   :  { %v5023_v19 = vmul.f32 %v6818_v13, %v5021_v42 }
0x2fd5   :  { %5025 = vrot.lane.b32.xlu0 %v5023_v19, %s7237_s21 }
0x3047   :  { %v5026_v22 = vpop.permute.xlu0 %5025 }
0x3048   :  { %v5028_v10 = vadd.f32 %v5026_v22, %v5018_v32 }
0x304a   :  { %6819 = vtanh.f32 %v5028_v10 }
0x304b   :  { %6821 = vpow2.f32 %v6150_v39  ;;  %v5415_v39 = vunpack.c.l.bf16 %v8377_v21 }
0x3054   :  { %v6820_v44 = vpop.eup %6819 }
0x3055   :  { %5031 = vrot.lane.b32.xlu1 %v6820_v44, %s7237_s21  ;;  %v6822_v4 = vpop.eup %6821 }
0x3056   :  { %v5012_v7 = vadd.f32 1.0, %v6822_v4 }
0x3058   :  { %6823 = vrcp.f32 %v5012_v7  ;;  %v5416_v7 = vunpack.c.h.bf16 %v8377_v21 }
0x3062   :  { %v6824_v17 = vpop.eup %6823 }
0x30c7   :  { %v5032_v3 = vpop.permute.xlu1 %5031 }
0x30c8   :  { %v5034_v5 = vmul.f32 %v6824_v17, %v5032_v3 }
0x30ca   :  { %v8436_v60 = vpack.c.bf16 %v5034_v5, %v5034_v5 }
0x30cc   :  { %6160 = vmatmul.mubr.msk.bf16.vlgmr.msra.gmra.mrb[88].mxu0 %vm643_vm2, %v8436_v60 }
0x30cd   :  { %5375 = vmatpush1.bf16.msra.mxu0 %v8300_v28  ;;  %5406 = vmatprep.mubr.bf16.mxu0 %v7236_v0 }
0x30ce   :  { %5376 = vmatprep.subr.bf16.mxu0 %v8302_v23 }
0x30d1   :  { %5377 = vmatpush1.bf16.msra.mxu0 %v8309_v12 }
0x30d2   :  { %5378 = vmatprep.subr.bf16.mxu0 %v8313_v14 }
0x30d5   :  { %5379 = vmatpush1.bf16.msra.mxu0 %v8319_v8 }
0x30d6   :  { %5380 = vmatprep.subr.bf16.mxu0 %v8322_v55 }
0x30d9   :  { %5381 = vmatpush1.bf16.msra.mxu0 %v8330_v56 }
0x319f   :  { %v5132_v27 = vpop.f32.mrb[88].mxu0 }
0x31a0   :  { %v5141_v29 = vadd.f32 %v5139_v16, %v5132_v27  ;;  %v5134_v59 = vpop.f32.mrb[89].mxu0 }
0x31a1   :  { %v5142_v20 = vadd.f32 %v5140_v62, %v5134_v59  ;;  %v5136_v34 = vpop.f32.mrb[90].mxu0 }
0x31a2   :  { %v5137_v15 = vpop.f32.mrb[91].mxu0  ;;  %v6161_v35 = vmul.f32 -1.442695, %v5141_v29 }
0x31a3   :  { %6825 = vtanh.f32 %v5142_v20  ;;  %v6162_v6 = vmul.f32 -1.442695, %v5142_v20 }
0x31a4   :  { %6827 = vpow2.f32 %v6161_v35 }
0x31ad   :  { %v6826_v18 = vpop.eup %6825 }
0x31ae   :  { %5158 = vrot.lane.b32.xlu0 %v6826_v18, %s7237_s21  ;;  %v6828_v53 = vpop.eup %6827 }
0x31af   :  { %v5149_v46 = vadd.f32 1.0, %v6828_v53 }
0x31b1   :  { %6829 = vrcp.f32 %v5149_v46 }
0x31bb   :  { %v6830_v61 = vpop.eup %6829 }
0x31bc   :  { %v5156_v50 = vmul.f32 %v6830_v61, %v5028_v10 }
0x3220   :  { %v5159_v26 = vpop.permute.xlu0 %5158 }
0x3221   :  { %v5161_v31 = vmul.f32 %v6830_v61, %v5159_v26 }
0x3223   :  { %5163 = vrot.lane.b32.xlu1 %v5161_v31, %s7237_s21 }
0x3295   :  { %v5164_v47 = vpop.permute.xlu1 %5163 }
0x3296   :  { %v5166_v33 = vadd.f32 %v5164_v47, %v5156_v50 }
0x3298   :  { %6831 = vtanh.f32 %v5166_v33 }
0x3299   :  { %6833 = vpow2.f32 %v6162_v6  ;;  %v5553_v6 = vunpack.c.l.bf16 %v8379_v40 }
0x32a2   :  { %v6832_v49 = vpop.eup %6831 }
0x32a3   :  { %5169 = vrot.lane.b32.xlu0 %v6832_v49, %s7237_s21  ;;  %v6834_v25 = vpop.eup %6833 }
0x32a4   :  { %v5150_v52 = vadd.f32 1.0, %v6834_v25 }
0x32a6   :  { %6835 = vrcp.f32 %v5150_v52  ;;  %v5554_v52 = vunpack.c.h.bf16 %v8379_v40 }
0x32b0   :  { %v6836_v9 = vpop.eup %6835 }
0x3315   :  { %v5170_v24 = vpop.permute.xlu0 %5169 }
0x3316   :  { %v5172_v57 = vmul.f32 %v6836_v9, %v5170_v24 }
0x3318   :  { %v8453_v58 = vpack.c.bf16 %v5172_v57, %v5172_v57 }
0x331a   :  { %6172 = vmatmul.mubr.msk.bf16.vlgmr.msra.gmra.mrb[88].mxu1 %vm643_vm2, %v8453_v58 }
0x331b   :  { %5513 = vmatpush1.bf16.msra.mxu1 %v8300_v28  ;;  %5544 = vmatprep.mubr.bf16.mxu1 %v7236_v0 }
0x331c   :  { %5514 = vmatprep.subr.bf16.mxu1 %v8302_v23 }
0x331f   :  { %5515 = vmatpush1.bf16.msra.mxu1 %v8309_v12 }
0x3320   :  { %5516 = vmatprep.subr.bf16.mxu1 %v8313_v14 }
0x3323   :  { %5517 = vmatpush1.bf16.msra.mxu1 %v8319_v8 }
0x3324   :  { %5518 = vmatprep.subr.bf16.mxu1 %v8322_v55 }
0x3327   :  { %5519 = vmatpush1.bf16.msra.mxu1 %v8330_v56 }
0x33ed   :  { %v5270_v38 = vpop.f32.mrb[88].mxu1 }
0x33ee   :  { %v5279_v28 = vadd.f32 %v5277_v37, %v5270_v38  ;;  %v5272_v51 = vpop.f32.mrb[89].mxu1 }
0x33ef   :  { %v5280_v0 = vadd.f32 %v5278_v1, %v5272_v51  ;;  %v5274_v63 = vpop.f32.mrb[90].mxu1 }
0x33f0   :  { %v5275_v23 = vpop.f32.mrb[91].mxu1  ;;  %v6173_v14 = vmul.f32 -1.442695, %v5279_v28  ;;  %v6581_v63 = vld [vmem:[%s8573_s11 + $0x10] sm:$0xff]  }
0x33f1   :  { %6837 = vtanh.f32 %v5280_v0  ;;  %v6174_v13 = vmul.f32 -1.442695, %v5280_v0  ;;  %v7239_v23 = vmov 0.0  }
0x33f2   :  { %6839 = vpow2.f32 %v6173_v14  ;;  %6261 = vmatprep.subr.bf16.mxu0 %v7239_v23  ;;  %6269 = vmatprep.subr.bf16.mxu1 %v7239_v23 }
0x33fb   :  { %v6838_v12 = vpop.eup %6837 }
0x33fc   :  { %5296 = vrot.lane.b32.xlu1 %v6838_v12, %s7237_s21  ;;  %v6840_v8 = vpop.eup %6839 }
0x33fd   :  { %v5287_v55 = vadd.f32 1.0, %v6840_v8  ;;  %v6582_v8 = vld [vmem:[%s8573_s11 + $0x18] sm:$0xff]  }
0x33ff   :  { %6841 = vrcp.f32 %v5287_v55 }
0x3409   :  { %v6842_v56 = vpop.eup %6841 }
0x340a   :  { %v5294_v54 = vmul.f32 %v6842_v56, %v5166_v33 }
0x346e   :  { %v5297_v48 = vpop.permute.xlu1 %5296 }
0x346f   :  { %v5299_v30 = vmul.f32 %v6842_v56, %v5297_v48 }
0x3471   :  { %5301 = vrot.lane.b32.xlu0 %v5299_v30, %s7237_s21 }
0x34e3   :  { %v5302_v2 = vpop.permute.xlu0 %5301 }
0x34e4   :  { %v5304_v11 = vadd.f32 %v5302_v2, %v5294_v54  ;;  %v5603_v54 = vld [vmem:[#allocation5 + $0x1c] sm:$0xf] }
0x34e5   :  { %v5599_v2 = vld [vmem:[#allocation3 + $0x1c] sm:$0xf] }
0x34e6   :  { %6843 = vtanh.f32 %v5304_v11 }
0x34e7   :  { %6845 = vpow2.f32 %v6174_v13 }
0x34f0   :  { %v6844_v41 = vpop.eup %6843 }
0x34f1   :  { %5307 = vrot.lane.b32.xlu1 %v6844_v41, %s7237_s21  ;;  %v6846_v42 = vpop.eup %6845  ;;  %v5600_v41 = vunpack.c.l.bf16 %v5599_v2 }
0x34f2   :  { %v5288_v19 = vadd.f32 1.0, %v6846_v42 }
0x34f4   :  { %6847 = vrcp.f32 %v5288_v19 }
0x34fe   :  { %v6848_v32 = vpop.eup %6847 }
0x3563   :  { %v5308_v22 = vpop.permute.xlu1 %5307 }
0x3564   :  { %v5310_v10 = vmul.f32 %v6848_v32, %v5308_v22  ;;  %v6584_v22 = vld [vmem:[%s8573_s11 + $0x8] sm:$0xff]  }
0x3566   :  { %v8470_v44 = vpack.c.bf16 %v5310_v10, %v5310_v10 }
0x3568   :  { %6184 = vmatmul.mubr.msk.bf16.vlgmr.msra.gmra.mrb[92].mxu0 %vm643_vm2, %v8470_v44 }
0x3569   :  { %6262 = vmatpush3.bf16.msra.mxu0 %v6581_v63  ;;  %6265 = vmatprep.mubr.msk.bf16.mxu0 %vm7240_vm4, %v7239_v23 }
0x356a   :  { %6263 = vmatprep.subr.bf16.mxu0 %v7239_v23 }
0x356d   :  { %6264 = vmatpush3.bf16.msra.mxu0 %v6582_v8 }
0x363b   :  { %v5408_v4 = vpop.f32.mrb[92].mxu0 }
0x363c   :  { %v5417_v17 = vadd.f32 %v5415_v39, %v5408_v4  ;;  %v5410_v3 = vpop.f32.mrb[93].mxu0 }
0x363d   :  { %v5418_v5 = vadd.f32 %v5416_v7, %v5410_v3  ;;  %v5412_v16 = vpop.f32.mrb[94].mxu0 }
0x363e   :  { %v5413_v27 = vpop.f32.mrb[95].mxu0  ;;  %v6185_v29 = vmul.f32 -1.442695, %v5417_v17 }
0x363f   :  { %6849 = vtanh.f32 %v5418_v5  ;;  %v6186_v61 = vmul.f32 -1.442695, %v5418_v5 }
0x3640   :  { %6851 = vpow2.f32 %v6185_v29 }
0x3649   :  { %v6850_v62 = vpop.eup %6849 }
0x364a   :  { %5434 = vrot.lane.b32.xlu0 %v6850_v62, %s7237_s21  ;;  %v6852_v59 = vpop.eup %6851 }
0x364b   :  { %v5425_v20 = vadd.f32 1.0, %v6852_v59 }
0x364d   :  { %6853 = vrcp.f32 %v5425_v20 }
0x3657   :  { %v6854_v34 = vpop.eup %6853 }
0x3658   :  { %v5432_v21 = vmul.f32 %v6854_v34, %v5304_v11  ;;  %v5604_v11 = vunpack.c.l.bf16 %v5603_v54 }
0x365a   :  { %v5606_v19 = vadd.f32 %v5604_v11, %v5600_v41 }
0x36bc   :  { %v5435_v15 = vpop.permute.xlu0 %5434 }
0x36bd   :  { %v5437_v18 = vmul.f32 %v6854_v34, %v5435_v15 }
0x36bf   :  { %5439 = vrot.lane.b32.xlu1 %v5437_v18, %s7237_s21 }
0x3731   :  { %v5440_v35 = vpop.permute.xlu1 %5439 }
0x3732   :  { %v5442_v53 = vadd.f32 %v5440_v35, %v5432_v21 }
0x3734   :  { %6855 = vtanh.f32 %v5442_v53 }
0x3735   :  { %6857 = vpow2.f32 %v6186_v61 }
0x373e   :  { %v6856_v46 = vpop.eup %6855 }
0x373f   :  { %5445 = vrot.lane.b32.xlu0 %v6856_v46, %s7237_s21  ;;  %v6858_v26 = vpop.eup %6857 }
0x3740   :  { %v5426_v31 = vadd.f32 1.0, %v6858_v26 }
0x3742   :  { %6859 = vrcp.f32 %v5426_v31 }
0x374c   :  { %v6860_v50 = vpop.eup %6859 }
0x37b1   :  { %v5446_v47 = vpop.permute.xlu0 %5445 }
0x37b2   :  { %v5448_v33 = vmul.f32 %v6860_v50, %v5446_v47 }
0x37b4   :  { %v5449_v49 = vpack.c.bf16 %v5448_v33, %v5448_v33  ;;  %v6206_v33 = vld [vmem:[%s8574_s12] ss:$0 sm:$0xff] }
0x37b6   :  { %6196 = vmatmul.mubr.msk.bf16.vlgmr.msra.gmra.mrb[92].mxu1 %vm643_vm2, %v5449_v49 }
0x37b7   :  { %6273 = vmatprep.mubr.msk.bf16.mxu1 %vm7240_vm4, %v7239_v23 }
0x3889   :  { %v5546_v25 = vpop.f32.mrb[92].mxu1 }
0x388a   :  { %v5555_v9 = vadd.f32 %v5553_v6, %v5546_v25  ;;  %v5548_v24 = vpop.f32.mrb[93].mxu1 }
0x388b   :  { %v5556_v57 = vadd.f32 %v5554_v52, %v5548_v24  ;;  %v5550_v37 = vpop.f32.mrb[94].mxu1 }
0x388c   :  { %v5551_v38 = vpop.f32.mrb[95].mxu1  ;;  %v6197_v28 = vmul.f32 -1.442695, %v5555_v9 }
0x388d   :  { %6861 = vtanh.f32 %v5556_v57  ;;  %v6198_v7 = vmul.f32 -1.442695, %v5556_v57 }
0x388e   :  { %6863 = vpow2.f32 %v6197_v28 }
0x3897   :  { %v6862_v1 = vpop.eup %6861 }
0x3898   :  { %5572 = vrot.lane.b32.xlu1 %v6862_v1, %s7237_s21  ;;  %v6864_v51 = vpop.eup %6863 }
0x3899   :  { %v5563_v0 = vadd.f32 1.0, %v6864_v51 }
0x389b   :  { %6865 = vrcp.f32 %v5563_v0 }
0x38a5   :  { %v6866_v40 = vpop.eup %6865 }
0x38a6   :  { %v5570_v55 = vmul.f32 %v6866_v40, %v5442_v53 }
0x390a   :  { %v5573_v12 = vpop.permute.xlu1 %5572 }
0x390b   :  { %v5575_v14 = vmul.f32 %v6866_v40, %v5573_v12 }
0x390d   :  { %5577 = vrot.lane.b32.xlu0 %v5575_v14, %s7237_s21 }
0x3911   :  { %4627 = vrot.lane.b32.xlu0 %v8384_v43, %s7238_s20 }
0x3915   :  { %4903 = vrot.lane.b32.xlu0 %v8418_v36, %s7238_s20  ;;  %v6583_v36 = vld [vmem:[%s8573_s11] sm:$0xff]  }
0x3916   :  { %6270 = vmatpush3.bf16.msra.mxu1 %v6583_v36 }
0x3917   :  { %6271 = vmatprep.subr.bf16.mxu1 %v7239_v23 }
0x3919   :  { %5179 = vrot.lane.b32.xlu0 %v8453_v58, %s7238_s20 }
0x391a   :  { %6272 = vmatpush3.bf16.msra.mxu1 %v6584_v22 }
0x391d   :  { %5455 = vrot.lane.b32.xlu0 %v5449_v49, %s7238_s20 }
0x397f   :  { %v5578_v56 = vpop.permute.xlu0 %5577 }
0x3980   :  { %v5580_v48 = vadd.f32 %v5578_v56, %v5570_v55 }
0x3982   :  { %6867 = vtanh.f32 %v5580_v48 }
0x3983   :  { %v4628_v30 = vpop.permute.xlu0 %4627  ;;  %6869 = vpow2.f32 %v6198_v7 }
0x3984   :  { %4631 = vst.msk [vmem:[#allocation7 + $0x1c] sm:$0xf] %vm723_vm1, %v4628_v30 }
0x3987   :  { %v4904_v43 = vpop.permute.xlu0 %4903 }
0x398b   :  { %v5180_v58 = vpop.permute.xlu0 %5179  ;;  %v5609_v13 = vld [vmem:[#allocation7 + $0x1c] sm:$0xf] }
0x398c   :  { %v6868_v42 = vpop.eup %6867  ;;  %v5610_v32 = vunpack.c.l.bf16 %v5609_v13 }
0x398d   :  { %5583 = vrot.lane.b32.xlu1 %v6868_v42, %s7237_s21  ;;  %v6870_v17 = vpop.eup %6869 }
0x398e   :  { %v5612_v10 = vadd.f32 %v5610_v32, %v5606_v19  ;;  %v5564_v3 = vadd.f32 1.0, %v6870_v17 }
0x398f   :  { %v5456_v39 = vpop.permute.xlu0 %5455 }
0x3990   :  { %v5618_v4 = vpack.c.bf16 %v5612_v10, %v5612_v10  ;;  %6871 = vrcp.f32 %v5564_v3 }
0x3991   :  { %4765 = vrot.lane.b32.xlu1 %v8400_v45, %s7238_s20  ;;  %v5601_v45 = vld [vmem:[#allocation4 + $0x1c] sm:$0xf] }
0x3992   :  { %6266 = vmatmul.mubr.msk.bf16.vlgmr.msra.gmra.mrb[96].mxu0 %vm1766_vm3, %v5618_v4  ;;  %v5602_v20 = vunpack.c.l.bf16 %v5601_v45 }
0x3995   :  { %5041 = vrot.lane.b32.xlu1 %v8436_v60, %s7238_s20  ;;  %v5597_v60 = vld [vmem:[#allocation2 + $0x1c] sm:$0xf] }
0x3996   :  { %v5598_v34 = vunpack.c.l.bf16 %v5597_v60 }
0x3998   :  { %v5605_v18 = vadd.f32 %v5602_v20, %v5598_v34 }
0x3999   :  { %5317 = vrot.lane.b32.xlu1 %v8470_v44, %s7238_s20 }
0x399a   :  { %v6872_v5 = vpop.eup %6871 }
0x39ff   :  { %v5584_v16 = vpop.permute.xlu1 %5583 }
0x3a00   :  { %v5586_v27 = vmul.f32 %v6872_v5, %v5584_v16 }
0x3a02   :  { %v5587_v62 = vpack.c.bf16 %v5586_v27, %v5586_v27 }
0x3a03   :  { %v4766_v29 = vpop.permute.xlu1 %4765 }
0x3a04   :  { %5589 = vst.msk [vmem:[#allocation6 + $0x1c] sm:$0xf] %vm723_vm1, %v5587_v62  ;;  %5593 = vrot.lane.b32.xlu1 %v5587_v62, %s7238_s20 }
0x3a07   :  { %v5042_v59 = vpop.permute.xlu1 %5041 }
0x3a0b   :  { %v5318_v44 = vpop.permute.xlu1 %5317  ;;  %v5607_v15 = vld [vmem:[#allocation6 + $0x1c] sm:$0xf] }
0x3a0c   :  { %v5608_v21 = vunpack.c.l.bf16 %v5607_v15 }
0x3a0e   :  { %v5611_v35 = vadd.f32 %v5608_v21, %v5605_v18 }
0x3a10   :  { %v5613_v53 = vpack.c.bf16 %v5611_v35, %v5611_v35 }
0x3a12   :  { %6274 = vmatmul.mubr.msk.bf16.vlgmr.msra.gmra.mrb[96].mxu1 %vm1766_vm3, %v5613_v53 }
0x3a65   :  { %v5672_v46 = vpop.f32.mrb[96].mxu0 }
0x3a66   :  { %v6267_v61 = vpop.f32.mrb[97].mxu0 }
0x3a67   :  { %v5675_v26 = vpop.f32.mrb[98].mxu0 }
0x3a68   :  { %v6268_v31 = vpop.f32.mrb[99].mxu0 }
0x3a76   :  { %v5594_v50 = vpop.permute.xlu1 %5593 }
0x3ae5   :  { %v5727_v47 = vpop.f32.mrb[96].mxu1 }
0x3ae6   :  { %v5728_v49 = vadd.f32 %v5727_v47, %v5672_v46  ;;  %v6275_v6 = vpop.f32.mrb[97].mxu1 }
0x3ae7   :  { %v5730_v25 = vpop.f32.mrb[98].mxu1 }
0x3ae8   :  { %v5740_v52 = vadd.f32 %v6206_v33, %v5728_v49  ;;  %v6276_v9 = vpop.f32.mrb[99].mxu1 }
0x3aea   :  { %5742 = vst.msk [vmem:[%s8575_s0] sm:$0xff] %vm5741_vm5, %v5740_v52 }
0x3aeb   :  { %5747 = vsyncpa [#allocation10], 1 }
0x3aec   :  { %5748 = vsyncpa [#allocation12], 1 }
0x3aed   :  { %5749 = vsyncpa [#allocation15], 1 }
0x3aee   :  { %5750 = vsyncpa [#allocation18], 1 }
0x3aef   :  { %5751 = vsyncpa [#allocation21], 1 }
0x3af0   :  { %5752 = vsyncpa [#allocation24], 1 }
0x3af1   :  { %5753 = vsyncpa [#allocation27], 1 }
0x3af2   :  { %5754 = vsyncpa [#allocation30], 1 }

</bundles_post_ra>
